<compile_context>
chip_gen: v5e
topology: v5e:2x2
jax: 0.10.0
libtpu: 0.0.40
codegen_flags: <defaults>
</compile_context>

<pallas_src>
import functools
import math

import jax
import jax.numpy as jnp
from jax import lax
from jax.experimental import pallas as pl
from jax.experimental.pallas import tpu as pltpu

NUM_GROUPS = 32
EPS = 1e-5


def _vae_attention_kernel(
    x_ref,        # (1, C, HW) f32  -- full image (NCHW, spatial flattened), resident
    gamma_ref,    # (C, 1)  f32
    beta_ref,     # (C, 1)  f32
    m_ref,        # (C, G)  f32  one-hot group membership
    mT_ref,       # (G, C)  f32  membership transposed
    wq_ref,       # (C, C)  bf16  (C_in x C_out, 1/sqrt(C) pre-folded)
    wk_ref,       # (C, C)  bf16  (out x in: K^T = wk @ xn_ct)
    wv_ref,       # (C, C)  bf16  (out x in: V^T = wv @ xn_ct)
    wo_ref,       # (C, C)  bf16  (out x in: out^T = wo .NT. attn)
    bq_ref,       # (1, C)  f32  (1/sqrt(C) pre-folded)
    bk_ref,       # (C, 1)  f32
    bv_ref,       # (C, 1)  f32
    bo_ref,       # (C, 1)  f32
    o_ref,        # (1, C, TQ) f32
    xn_scr,       # (C, HW) bf16  normalized activations (channel-major)
    kT_scr,       # (C, HW) bf16  K^T
    vT_scr,       # (C, HW) bf16  V^T
    *,
    prologue_chunk,
    bf16_softmax,
):
    qi = pl.program_id(1)
    tq = o_ref.shape[2]
    c, hw = kT_scr.shape
    g = m_ref.shape[1]
    chunk = prologue_chunk
    n_chunks = hw // chunk

    # ----- once per image: GroupNorm + K/V projections into resident bf16 scratch -----
    @pl.when(qi == 0)
    def _prologue():
        cnt = float(hw * (c // g))

        # pass 1: per-group mean (f32, chunked over HW to keep transients small)
        def s1_body(ci, s1):
            off = pl.multiple_of(ci * chunk, chunk)
            xs = x_ref[0, :, pl.ds(off, chunk)]                       # (C, chunk) f32
            return s1 + jnp.sum(xs, axis=1, keepdims=True)
        s1 = lax.fori_loop(0, n_chunks, s1_body, jnp.zeros((c, 1), jnp.float32))
        gmean = jnp.dot(mT_ref[...], s1, preferred_element_type=jnp.float32) / cnt
        mean_c = jnp.dot(m_ref[...], gmean, preferred_element_type=jnp.float32)  # (C, 1)

        # pass 2: centered (two-pass) variance -- no E[x^2]-E[x]^2 cancellation
        def s2_body(ci, s2):
            off = pl.multiple_of(ci * chunk, chunk)
            xc = x_ref[0, :, pl.ds(off, chunk)] - mean_c
            return s2 + jnp.sum(xc * xc, axis=1, keepdims=True)
        s2 = lax.fori_loop(0, n_chunks, s2_body, jnp.zeros((c, 1), jnp.float32))
        gvar = jnp.dot(mT_ref[...], s2, preferred_element_type=jnp.float32) / cnt
        var_c = jnp.dot(m_ref[...], gvar, preferred_element_type=jnp.float32)     # (C, 1)
        inv = lax.rsqrt(var_c + EPS)
        scale_c = inv * gamma_ref[...]
        shift_c = beta_ref[...] - mean_c * scale_c

        # pass 3: normalize + K^T / V^T projections, chunked over HW
        def proj_body(ci, carry):
            off = pl.multiple_of(ci * chunk, chunk)
            xs = x_ref[0, :, pl.ds(off, chunk)]                        # (C, chunk) f32
            xn_bf = (xs * scale_c + shift_c).astype(jnp.bfloat16)
            xn_scr[:, pl.ds(off, chunk)] = xn_bf
            kT_scr[:, pl.ds(off, chunk)] = (
                jnp.dot(wk_ref[...], xn_bf, preferred_element_type=jnp.float32)
                + bk_ref[...]).astype(jnp.bfloat16)
            vT_scr[:, pl.ds(off, chunk)] = (
                jnp.dot(wv_ref[...], xn_bf, preferred_element_type=jnp.float32)
                + bv_ref[...]).astype(jnp.bfloat16)
            return carry
        lax.fori_loop(0, n_chunks, proj_body, 0)

    # ----- per query tile: attention against resident K^T / V^T -----
    q_start = pl.multiple_of(qi * tq, tq)
    xn_ct = xn_scr[:, pl.ds(q_start, tq)]                              # (C, TQ) bf16
    xn_q = jnp.transpose(xn_ct)                                        # (TQ, C) bf16 (XLU slot)

    q = (jnp.dot(xn_q, wq_ref[...], preferred_element_type=jnp.float32)
         + bq_ref[...])                                                # scale pre-folded

    scores = jnp.dot(q.astype(jnp.bfloat16), kT_scr[...],
                     preferred_element_type=jnp.float32)               # (TQ, HW) f32
    smax = jnp.max(scores, axis=-1, keepdims=True)
    if bf16_softmax:
        # bf16 exp / slab on chips with bf16 EUP/VPU; row-sum accumulated in f32.
        p_mm = jnp.exp((scores - smax).astype(jnp.bfloat16))
        rowsum = jnp.sum(p_mm.astype(jnp.float32), axis=-1, keepdims=True)
    else:
        p_f32 = jnp.exp(scores - smax)
        rowsum = jnp.sum(p_f32, axis=-1, keepdims=True)
        p_mm = p_f32.astype(jnp.bfloat16)

    attn = lax.dot_general(p_mm, vT_scr[...],
                           dimension_numbers=(((1,), (1,)), ((), ())),
                           preferred_element_type=jnp.float32)         # (TQ, C) f32
    attn = attn * pl.reciprocal(rowsum, approx=True)                   # deferred normalization

    out_ct = lax.dot_general(wo_ref[...], attn.astype(jnp.bfloat16),
                             dimension_numbers=(((1,), (1,)), ((), ())),
                             preferred_element_type=jnp.float32)       # (C, TQ) f32
    out_ct = out_ct + bo_ref[...]

    # residual with the *pre-norm* input, in f32, written directly in NCHW layout
    o_ref[0] = (out_ct + x_ref[0, :, pl.ds(q_start, tq)]).astype(o_ref.dtype)


def _device_info():
    kind = ""
    try:
        kind = jax.devices()[0].device_kind.lower()
    except Exception:
        kind = ""
    vmem_cap = None
    try:
        vmem_cap = int(pltpu.get_tpu_info().vmem_capacity_bytes)
    except Exception:
        vmem_cap = None
    if vmem_cap is None or vmem_cap <= 0:
        if "v7" in kind:
            vmem_cap = 64 * 1024 * 1024
        elif kind:
            vmem_cap = 128 * 1024 * 1024
        else:
            vmem_cap = 64 * 1024 * 1024   # unknown -> conservative
    return kind, vmem_cap


def vae_attention_block(x_nchw, params, tq=None):
    """x_nchw: (N, C, H, W) float32.  Returns (N, C, H, W)."""
    n, c, h, w = x_nchw.shape
    assert c % NUM_GROUPS == 0
    hw = h * w
    x3 = x_nchw.reshape(n, c, hw)                      # free reshape, no transpose round-trip

    kind, vmem_cap = _device_info()
    is_v7 = "v7" in kind
    bf16_softmax = ("v6" in kind) or is_v7             # v5e keeps the f32 softmax path

    if tq is None:
        candidates = (256, 128) if (is_v7 and hw >= 2048) else (512, 256, 128)
        tq = next((t for t in candidates if hw % t == 0), hw)
    assert hw % tq == 0
    n_qt = hw // tq

    prologue_chunk = next((t for t in (512, 256, 128) if hw % t == 0), hw)

    gamma = params["gn_weight"].reshape(c, 1).astype(jnp.float32)
    beta = params["gn_bias"].reshape(c, 1).astype(jnp.float32)

    gsz = c // NUM_GROUPS
    member = (jnp.arange(c)[:, None] // gsz
              == jnp.arange(NUM_GROUPS)[None, :]).astype(jnp.float32)   # (C, G)
    memberT = member.T                                                  # (G, C)

    in_w, in_b = params["in_w"], params["in_b"]
    scale = 1.0 / math.sqrt(float(c))
    wq = (in_w[:c].T * scale).astype(jnp.bfloat16)     # (C_in, C_out), 1/sqrt(C) folded in
    wk = in_w[c:2 * c].astype(jnp.bfloat16)            # (C_out, C_in)
    wv = in_w[2 * c:].astype(jnp.bfloat16)             # (C_out, C_in)
    wo = params["out_w"].astype(jnp.bfloat16)          # (C_out, C_in)
    bq = (in_b[:c] * scale).reshape(1, c).astype(jnp.float32)
    bk = in_b[c:2 * c].reshape(c, 1).astype(jnp.float32)
    bv = in_b[2 * c:].reshape(c, 1).astype(jnp.float32)
    bo = params["out_b"].reshape(c, 1).astype(jnp.float32)

    # VMEM budget (single-buffered constant inputs, resident bf16 scratch, per-tile slabs).
    est = (c * hw * 4                                    # resident x block
           + 2 * c * tq * 4                              # double-buffered output block
           + 4 * c * c * 2                               # bf16 weights
           + 3 * c * hw * 2                              # xn / K^T / V^T bf16 scratch
           + 6 * c * prologue_chunk * 4                  # prologue transients (chunked)
           + tq * hw * (6 if bf16_softmax else 8)        # scores + p slab
           + 8 * tq * c * 4)                             # q / attn / out_ct temporaries
    vmem_limit = int(min(max(est * 3 // 2, 32 * 1024 * 1024),
                         vmem_cap - 2 * 1024 * 1024))

    flops = int(n * (8 * c * c * hw + 4 * c * hw * hw))
    cost = pl.CostEstimate(flops=flops,
                           transcendentals=int(n * hw * hw),
                           bytes_accessed=int(2 * n * c * hw * 4 + 8 * c * c))

    kernel = functools.partial(_vae_attention_kernel,
                               prologue_chunk=prologue_chunk,
                               bf16_softmax=bf16_softmax)

    def _run(single_buffer_consts):
        if single_buffer_consts:
            def const_spec(shape):
                return pl.BlockSpec(shape, lambda b, qi: (0,) * len(shape),
                                    pipeline_mode=pl.Buffered(1))
            x_spec = pl.BlockSpec((1, c, hw), lambda b, qi: (b, 0, 0),
                                  pipeline_mode=pl.Buffered(1))
        else:
            def const_spec(shape):
                return pl.BlockSpec(shape, lambda b, qi: (0,) * len(shape))
            x_spec = pl.BlockSpec((1, c, hw), lambda b, qi: (b, 0, 0))

        out3 = pl.pallas_call(
            kernel,
            out_shape=jax.ShapeDtypeStruct((n, c, hw), x_nchw.dtype),
            grid=(n, n_qt),
            in_specs=[
                x_spec,                                             # x: resident per image
                const_spec((c, 1)), const_spec((c, 1)),             # gamma, beta
                const_spec((c, NUM_GROUPS)), const_spec((NUM_GROUPS, c)),
                const_spec((c, c)), const_spec((c, c)),             # wq, wk
                const_spec((c, c)), const_spec((c, c)),             # wv, wo
                const_spec((1, c)), const_spec((c, 1)),             # bq, bk
                const_spec((c, 1)), const_spec((c, 1)),             # bv, bo
            ],
            out_specs=pl.BlockSpec((1, c, tq), lambda b, qi: (b, 0, qi)),
            scratch_shapes=[
                pltpu.VMEM((c, hw), jnp.bfloat16),    # xn (channel-major)
                pltpu.VMEM((c, hw), jnp.bfloat16),    # K^T
                pltpu.VMEM((c, hw), jnp.bfloat16),    # V^T
            ],
            compiler_params=pltpu.CompilerParams(
                # q-tile axis must stay "arbitrary": scratch is filled at q-tile 0 and
                # reused by later tiles of the same image.  Batch axis is parallel.
                dimension_semantics=("parallel", "arbitrary"),
                vmem_limit_bytes=vmem_limit,
            ),
            cost_estimate=cost,
        )(x3, gamma, beta, member, memberT, wq, wk, wv, wo, bq, bk, bv, bo)
        return jax.block_until_ready(out3)

    try:
        out3 = _run(True)
    except Exception:
        # Fallback for JAX versions that reject pl.Buffered(1); identical semantics.
        out3 = _run(False)

    return out3.reshape(n, c, h, w)


def reference(x, params):
    """Pure-JAX f32 reference mirroring the PyTorch forward."""
    n, c, h, w = x.shape
    xg = x.reshape(n, NUM_GROUPS, c // NUM_GROUPS, h, w)
    mean = xg.mean(axis=(2, 3, 4), keepdims=True)
    var = xg.var(axis=(2, 3, 4), keepdims=True)
    xn = ((xg - mean) / jnp.sqrt(var + EPS)).reshape(n, c, h, w)
    xn = xn * params["gn_weight"][None, :, None, None] + params["gn_bias"][None, :, None, None]
    t = jnp.transpose(xn.reshape(n, c, h * w), (0, 2, 1))            # (N, HW, C)
    qkv = t @ params["in_w"].T + params["in_b"]
    q, k, v = jnp.split(qkv, 3, axis=-1)
    s = q @ jnp.swapaxes(k, -1, -2) / math.sqrt(c)
    p = jax.nn.softmax(s, axis=-1)
    o = p @ v
    o = o @ params["out_w"].T + params["out_b"]
    o = jnp.swapaxes(o, -1, -2).reshape(n, c, h, w)
    return o + x


def init_params(key, c):
    ks = jax.random.split(key, 6)
    scale = 1.0 / math.sqrt(c)
    return {
        "gn_weight": 1.0 + 0.1 * jax.random.normal(ks[0], (c,), jnp.float32),
        "gn_bias": 0.1 * jax.random.normal(ks[1], (c,), jnp.float32),
        "in_w": scale * jax.random.normal(ks[2], (3 * c, c), jnp.float32),
        "in_b": 0.05 * jax.random.normal(ks[3], (3 * c,), jnp.float32),
        "out_w": scale * jax.random.normal(ks[4], (c, c), jnp.float32),
        "out_b": 0.05 * jax.random.normal(ks[5], (c,), jnp.float32),
    }


if __name__ == "__main__":
    key = jax.random.PRNGKey(0)
    kx, kp = jax.random.split(key)

    # Small demo shapes (C must be divisible by 32); tq=128 exercises the multi-tile path.
    # Production VAE shapes are C=512, HW=1024-4096; tq is picked generation-aware there.
    N, C, H, W = 2, 64, 16, 16
    x = jax.random.normal(kx, (N, C, H, W), jnp.float32)
    params = init_params(kp, C)

    out = jax.block_until_ready(vae_attention_block(x, params, tq=128))
    ref = jax.block_until_ready(reference(x, params))

    assert out.shape == (N, C, H, W)
    err = float(jnp.max(jnp.abs(out - ref)))
    # Tolerance reflects bf16 MXU operands (f32 accumulation) vs. a pure-f32 reference.
    assert jnp.allclose(out, ref, atol=1e-1, rtol=1e-1), err
    print("KERNEL_OK")
</pallas_src>

<mosaic_0001>
module attributes {stable_mosaic.version = 11 : i64} {
  func.func @_vae_attention_kernel(%arg0: i32, %arg1: i32, %arg2: memref<1x64x256xf32, #tpu.memory_space<vmem>>, %arg3: memref<64x1xf32, #tpu.memory_space<vmem>>, %arg4: memref<64x1xf32, #tpu.memory_space<vmem>>, %arg5: memref<64x32xf32, #tpu.memory_space<vmem>>, %arg6: memref<32x64xf32, #tpu.memory_space<vmem>>, %arg7: memref<64x64xbf16, #tpu.memory_space<vmem>>, %arg8: memref<64x64xbf16, #tpu.memory_space<vmem>>, %arg9: memref<64x64xbf16, #tpu.memory_space<vmem>>, %arg10: memref<64x64xbf16, #tpu.memory_space<vmem>>, %arg11: memref<1x64xf32, #tpu.memory_space<vmem>>, %arg12: memref<64x1xf32, #tpu.memory_space<vmem>>, %arg13: memref<64x1xf32, #tpu.memory_space<vmem>>, %arg14: memref<64x1xf32, #tpu.memory_space<vmem>>, %arg15: memref<1x64x128xf32, #tpu.memory_space<vmem>>, %arg16: memref<64x256xbf16, #tpu.memory_space<vmem>>, %arg17: memref<64x256xbf16, #tpu.memory_space<vmem>>, %arg18: memref<64x256xbf16, #tpu.memory_space<vmem>>) attributes {dimension_semantics = [#tpu.dimension_semantics<parallel>, #tpu.dimension_semantics<arbitrary>], iteration_bounds = array<i64: 2, 2>, scalar_prefetch = 0 : i64, scratch_operands = 3 : i64, tpu.core_type = #tpu.core_type<tc>, window_params = [{pipeline_mode = #tpu.pipeline_mode<synchronous>, transform_indices = @transform_0, window_bounds = array<i64: 1, 64, 256>}, {pipeline_mode = #tpu.pipeline_mode<synchronous>, transform_indices = @transform_1, window_bounds = array<i64: 64, 1>}, {pipeline_mode = #tpu.pipeline_mode<synchronous>, transform_indices = @transform_2, window_bounds = array<i64: 64, 1>}, {pipeline_mode = #tpu.pipeline_mode<synchronous>, transform_indices = @transform_3, window_bounds = array<i64: 64, 32>}, {pipeline_mode = #tpu.pipeline_mode<synchronous>, transform_indices = @transform_4, window_bounds = array<i64: 32, 64>}, {pipeline_mode = #tpu.pipeline_mode<synchronous>, transform_indices = @transform_5, window_bounds = array<i64: 64, 64>}, {pipeline_mode = #tpu.pipeline_mode<synchronous>, transform_indices = @transform_6, window_bounds = array<i64: 64, 64>}, {pipeline_mode = #tpu.pipeline_mode<synchronous>, transform_indices = @transform_7, window_bounds = array<i64: 64, 64>}, {pipeline_mode = #tpu.pipeline_mode<synchronous>, transform_indices = @transform_8, window_bounds = array<i64: 64, 64>}, {pipeline_mode = #tpu.pipeline_mode<synchronous>, transform_indices = @transform_9, window_bounds = array<i64: 1, 64>}, {pipeline_mode = #tpu.pipeline_mode<synchronous>, transform_indices = @transform_10, window_bounds = array<i64: 64, 1>}, {pipeline_mode = #tpu.pipeline_mode<synchronous>, transform_indices = @transform_11, window_bounds = array<i64: 64, 1>}, {pipeline_mode = #tpu.pipeline_mode<synchronous>, transform_indices = @transform_12, window_bounds = array<i64: 64, 1>}, {transform_indices = @transform_13, window_bounds = array<i64: 1, 64, 128>}]} {
    %c0_i32 = arith.constant 0 : i32
    %0 = arith.cmpi eq, %arg1, %c0_i32 : i32
    %1 = arith.extui %0 : i1 to i32
    %c0_i32_0 = arith.constant 0 : i32
    %2 = arith.cmpi ne, %1, %c0_i32_0 : i32
    scf.if %2 {
      %cst_23 = arith.constant 0.000000e+00 : f32
      %42 = vector.broadcast %cst_23 : f32 to vector<64x1xf32>
      %c0_i32_24 = arith.constant 0 : i32
      %c256_i32 = arith.constant 256 : i32
      %43 = arith.muli %c0_i32_24, %c256_i32 : i32
      %44 = tpu.assume_multiple %43, 256 : i32
      %c0_25 = arith.constant 0 : index
      %c0_26 = arith.constant 0 : index
      %45 = arith.index_cast %44 : i32 to index
      %46 = vector.load %arg2[%c0_25, %c0_26, %45] : memref<1x64x256xf32, #tpu.memory_space<vmem>>, vector<1x64x256xf32>
      %47 = vector.shape_cast %46 : vector<1x64x256xf32> to vector<64x256xf32>
      %cst_27 = arith.constant dense<0.000000e+00> : vector<64xf32>
      %48 = vector.multi_reduction <add>, %47, %cst_27 [1] : vector<64x256xf32> to vector<64xf32>
      %49 = vector.shape_cast %48 : vector<64xf32> to vector<64x1xf32>
      %50 = arith.addf %42, %49 : vector<64x1xf32>
      %c1_i32 = arith.constant 1 : i32
      %c0_28 = arith.constant 0 : index
      %c0_29 = arith.constant 0 : index
      %51 = vector.load %arg6[%c0_28, %c0_29] : memref<32x64xf32, #tpu.memory_space<vmem>>, vector<32x64xf32>
      %cst_30 = arith.constant dense<0.000000e+00> : vector<32x1xf32>
      %52 = tpu.matmul %51, %50, %cst_30 {dimension_numbers = #tpu.dot_dimension_numbers<[1], [0], [0], [1], [0, 0, 1, 1], [], []>} : vector<32x64xf32>, vector<64x1xf32>, vector<32x1xf32> -> vector<32x1xf32>
      %cst_31 = arith.constant 5.120000e+02 : f32
      %53 = vector.broadcast %cst_31 : f32 to vector<32x1xf32>
      %54 = arith.divf %52, %53 : vector<32x1xf32>
      %c0_32 = arith.constant 0 : index
      %c0_33 = arith.constant 0 : index
      %55 = vector.load %arg5[%c0_32, %c0_33] : memref<64x32xf32, #tpu.memory_space<vmem>>, vector<64x32xf32>
      %cst_34 = arith.constant dense<0.000000e+00> : vector<64x1xf32>
      %56 = tpu.matmul %55, %54, %cst_34 {dimension_numbers = #tpu.dot_dimension_numbers<[1], [0], [0], [1], [0, 0, 1, 1], [], []>} : vector<64x32xf32>, vector<32x1xf32>, vector<64x1xf32> -> vector<64x1xf32>
      %cst_35 = arith.constant 0.000000e+00 : f32
      %57 = vector.broadcast %cst_35 : f32 to vector<64x1xf32>
      %c0_i32_36 = arith.constant 0 : i32
      %c256_i32_37 = arith.constant 256 : i32
      %58 = arith.muli %c0_i32_36, %c256_i32_37 : i32
      %59 = tpu.assume_multiple %58, 256 : i32
      %c0_38 = arith.constant 0 : index
      %c0_39 = arith.constant 0 : index
      %60 = arith.index_cast %59 : i32 to index
      %61 = vector.load %arg2[%c0_38, %c0_39, %60] : memref<1x64x256xf32, #tpu.memory_space<vmem>>, vector<1x64x256xf32>
      %62 = vector.shape_cast %61 : vector<1x64x256xf32> to vector<64x256xf32>
      %63 = vector.broadcast %56 : vector<64x1xf32> to vector<64x256xf32>
      %64 = arith.subf %62, %63 : vector<64x256xf32>
      %65 = arith.mulf %64, %64 : vector<64x256xf32>
      %cst_40 = arith.constant dense<0.000000e+00> : vector<64xf32>
      %66 = vector.multi_reduction <add>, %65, %cst_40 [1] : vector<64x256xf32> to vector<64xf32>
      %67 = vector.shape_cast %66 : vector<64xf32> to vector<64x1xf32>
      %68 = arith.addf %57, %67 : vector<64x1xf32>
      %c1_i32_41 = arith.constant 1 : i32
      %c0_42 = arith.constant 0 : index
      %c0_43 = arith.constant 0 : index
      %69 = vector.load %arg6[%c0_42, %c0_43] : memref<32x64xf32, #tpu.memory_space<vmem>>, vector<32x64xf32>
      %cst_44 = arith.constant dense<0.000000e+00> : vector<32x1xf32>
      %70 = tpu.matmul %69, %68, %cst_44 {dimension_numbers = #tpu.dot_dimension_numbers<[1], [0], [0], [1], [0, 0, 1, 1], [], []>} : vector<32x64xf32>, vector<64x1xf32>, vector<32x1xf32> -> vector<32x1xf32>
      %cst_45 = arith.constant 5.120000e+02 : f32
      %71 = vector.broadcast %cst_45 : f32 to vector<32x1xf32>
      %72 = arith.divf %70, %71 : vector<32x1xf32>
      %c0_46 = arith.constant 0 : index
      %c0_47 = arith.constant 0 : index
      %73 = vector.load %arg5[%c0_46, %c0_47] : memref<64x32xf32, #tpu.memory_space<vmem>>, vector<64x32xf32>
      %cst_48 = arith.constant dense<0.000000e+00> : vector<64x1xf32>
      %74 = tpu.matmul %73, %72, %cst_48 {dimension_numbers = #tpu.dot_dimension_numbers<[1], [0], [0], [1], [0, 0, 1, 1], [], []>} : vector<64x32xf32>, vector<32x1xf32>, vector<64x1xf32> -> vector<64x1xf32>
      %cst_49 = arith.constant 9.99999974E-6 : f32
      %75 = vector.broadcast %cst_49 : f32 to vector<64x1xf32>
      %76 = arith.addf %74, %75 : vector<64x1xf32>
      %77 = math.rsqrt %76 : vector<64x1xf32>
      %c0_50 = arith.constant 0 : index
      %c0_51 = arith.constant 0 : index
      %78 = vector.load %arg3[%c0_50, %c0_51] : memref<64x1xf32, #tpu.memory_space<vmem>>, vector<64x1xf32>
      %79 = arith.mulf %77, %78 : vector<64x1xf32>
      %c0_52 = arith.constant 0 : index
      %c0_53 = arith.constant 0 : index
      %80 = vector.load %arg4[%c0_52, %c0_53] : memref<64x1xf32, #tpu.memory_space<vmem>>, vector<64x1xf32>
      %81 = arith.mulf %56, %79 : vector<64x1xf32>
      %82 = arith.subf %80, %81 : vector<64x1xf32>
      %c0_i32_54 = arith.constant 0 : i32
      %c256_i32_55 = arith.constant 256 : i32
      %83 = arith.muli %c0_i32_54, %c256_i32_55 : i32
      %84 = tpu.assume_multiple %83, 256 : i32
      %c0_56 = arith.constant 0 : index
      %c0_57 = arith.constant 0 : index
      %85 = arith.index_cast %84 : i32 to index
      %86 = vector.load %arg2[%c0_56, %c0_57, %85] : memref<1x64x256xf32, #tpu.memory_space<vmem>>, vector<1x64x256xf32>
      %87 = vector.shape_cast %86 : vector<1x64x256xf32> to vector<64x256xf32>
      %88 = vector.broadcast %79 : vector<64x1xf32> to vector<64x256xf32>
      %89 = arith.mulf %87, %88 : vector<64x256xf32>
      %90 = vector.broadcast %82 : vector<64x1xf32> to vector<64x256xf32>
      %91 = arith.addf %89, %90 : vector<64x256xf32>
      %92 = arith.truncf %91 : vector<64x256xf32> to vector<64x256xbf16>
      %c0_58 = arith.constant 0 : index
      %93 = arith.index_cast %84 : i32 to index
      %94 = vector.load %arg16[%c0_58, %93] : memref<64x256xbf16, #tpu.memory_space<vmem>>, vector<64x256xbf16>
      tpu.vector_store %arg16[%c0_58, %93], %92 {strides = array<i32>} : memref<64x256xbf16, #tpu.memory_space<vmem>>, vector<64x256xbf16>,
      %c0_59 = arith.constant 0 : index
      %c0_60 = arith.constant 0 : index
      %95 = vector.load %arg8[%c0_59, %c0_60] : memref<64x64xbf16, #tpu.memory_space<vmem>>, vector<64x64xbf16>
      %cst_61 = arith.constant dense<0.000000e+00> : vector<64x256xf32>
      %96 = tpu.matmul %95, %92, %cst_61 {dimension_numbers = #tpu.dot_dimension_numbers<[1], [0], [0], [1], [0, 0, 1, 1], [], []>} : vector<64x64xbf16>, vector<64x256xbf16>, vector<64x256xf32> -> vector<64x256xf32>
      %c0_62 = arith.constant 0 : index
      %c0_63 = arith.constant 0 : index
      %97 = vector.load %arg12[%c0_62, %c0_63] : memref<64x1xf32, #tpu.memory_space<vmem>>, vector<64x1xf32>
      %98 = vector.broadcast %97 : vector<64x1xf32> to vector<64x256xf32>
      %99 = arith.addf %96, %98 : vector<64x256xf32>
      %100 = arith.truncf %99 : vector<64x256xf32> to vector<64x256xbf16>
      %c0_64 = arith.constant 0 : index
      %101 = arith.index_cast %84 : i32 to index
      %102 = vector.load %arg17[%c0_64, %101] : memref<64x256xbf16, #tpu.memory_space<vmem>>, vector<64x256xbf16>
      tpu.vector_store %arg17[%c0_64, %101], %100 {strides = array<i32>} : memref<64x256xbf16, #tpu.memory_space<vmem>>, vector<64x256xbf16>,
      %c0_65 = arith.constant 0 : index
      %c0_66 = arith.constant 0 : index
      %103 = vector.load %arg9[%c0_65, %c0_66] : memref<64x64xbf16, #tpu.memory_space<vmem>>, vector<64x64xbf16>
      %cst_67 = arith.constant dense<0.000000e+00> : vector<64x256xf32>
      %104 = tpu.matmul %103, %92, %cst_67 {dimension_numbers = #tpu.dot_dimension_numbers<[1], [0], [0], [1], [0, 0, 1, 1], [], []>} : vector<64x64xbf16>, vector<64x256xbf16>, vector<64x256xf32> -> vector<64x256xf32>
      %c0_68 = arith.constant 0 : index
      %c0_69 = arith.constant 0 : index
      %105 = vector.load %arg13[%c0_68, %c0_69] : memref<64x1xf32, #tpu.memory_space<vmem>>, vector<64x1xf32>
      %106 = vector.broadcast %105 : vector<64x1xf32> to vector<64x256xf32>
      %107 = arith.addf %104, %106 : vector<64x256xf32>
      %108 = arith.truncf %107 : vector<64x256xf32> to vector<64x256xbf16>
      %c0_70 = arith.constant 0 : index
      %109 = arith.index_cast %84 : i32 to index
      %110 = vector.load %arg18[%c0_70, %109] : memref<64x256xbf16, #tpu.memory_space<vmem>>, vector<64x256xbf16>
      tpu.vector_store %arg18[%c0_70, %109], %108 {strides = array<i32>} : memref<64x256xbf16, #tpu.memory_space<vmem>>, vector<64x256xbf16>,
      %c1_i32_71 = arith.constant 1 : i32
    } else {
    }
    %c128_i32 = arith.constant 128 : i32
    %3 = arith.muli %arg1, %c128_i32 : i32
    %4 = tpu.assume_multiple %3, 128 : i32
    %c0 = arith.constant 0 : index
    %5 = arith.index_cast %4 : i32 to index
    %6 = vector.load %arg16[%c0, %5] : memref<64x256xbf16, #tpu.memory_space<vmem>>, vector<64x128xbf16>
    %7 = tpu.transpose %6, [1, 0] : vector<64x128xbf16> -> vector<128x64xbf16>
    %c0_1 = arith.constant 0 : index
    %c0_2 = arith.constant 0 : index
    %8 = vector.load %arg7[%c0_1, %c0_2] : memref<64x64xbf16, #tpu.memory_space<vmem>>, vector<64x64xbf16>
    %cst = arith.constant dense<0.000000e+00> : vector<128x64xf32>
    %9 = tpu.matmul %7, %8, %cst {dimension_numbers = #tpu.dot_dimension_numbers<[1], [0], [0], [1], [0, 0, 1, 1], [], []>} : vector<128x64xbf16>, vector<64x64xbf16>, vector<128x64xf32> -> vector<128x64xf32>
    %c0_3 = arith.constant 0 : index
    %c0_4 = arith.constant 0 : index
    %10 = vector.load %arg11[%c0_3, %c0_4] : memref<1x64xf32, #tpu.memory_space<vmem>>, vector<1x64xf32>
    %11 = vector.broadcast %10 : vector<1x64xf32> to vector<128x64xf32>
    %12 = arith.addf %9, %11 : vector<128x64xf32>
    %13 = arith.truncf %12 : vector<128x64xf32> to vector<128x64xbf16>
    %c0_5 = arith.constant 0 : index
    %c0_6 = arith.constant 0 : index
    %14 = vector.load %arg17[%c0_5, %c0_6] : memref<64x256xbf16, #tpu.memory_space<vmem>>, vector<64x256xbf16>
    %cst_7 = arith.constant dense<0.000000e+00> : vector<128x256xf32>
    %15 = tpu.matmul %13, %14, %cst_7 {dimension_numbers = #tpu.dot_dimension_numbers<[1], [0], [0], [1], [0, 0, 1, 1], [], []>} : vector<128x64xbf16>, vector<64x256xbf16>, vector<128x256xf32> -> vector<128x256xf32>
    %cst_8 = arith.constant dense<0xFF800000> : vector<128xf32>
    %16 = vector.multi_reduction <maximumf>, %15, %cst_8 [1] : vector<128x256xf32> to vector<128xf32>
    %17 = vector.shape_cast %16 : vector<128xf32> to vector<128x1xf32>
    %18 = vector.broadcast %17 : vector<128x1xf32> to vector<128x256xf32>
    %19 = arith.subf %15, %18 : vector<128x256xf32>
    %20 = math.exp %19 : vector<128x256xf32>
    %cst_9 = arith.constant dense<0.000000e+00> : vector<128xf32>
    %21 = vector.multi_reduction <add>, %20, %cst_9 [1] : vector<128x256xf32> to vector<128xf32>
    %22 = vector.shape_cast %21 : vector<128xf32> to vector<128x1xf32>
    %23 = arith.truncf %20 : vector<128x256xf32> to vector<128x256xbf16>
    %c0_10 = arith.constant 0 : index
    %c0_11 = arith.constant 0 : index
    %24 = vector.load %arg18[%c0_10, %c0_11] : memref<64x256xbf16, #tpu.memory_space<vmem>>, vector<64x256xbf16>
    %cst_12 = arith.constant dense<0.000000e+00> : vector<128x64xf32>
    %25 = tpu.matmul %23, %24, %cst_12 {dimension_numbers = #tpu.dot_dimension_numbers<[1], [1], [0], [0], [0, 0, 1, 0], [], []>} : vector<128x256xbf16>, vector<64x256xbf16>, vector<128x64xf32> -> vector<128x64xf32>
    %26 = tpu.reciprocal %22 {approx = true} : vector<128x1xf32> -> vector<128x1xf32>
    %27 = vector.broadcast %26 : vector<128x1xf32> to vector<128x64xf32>
    %28 = arith.mulf %25, %27 : vector<128x64xf32>
    %c0_13 = arith.constant 0 : index
    %c0_14 = arith.constant 0 : index
    %29 = vector.load %arg10[%c0_13, %c0_14] : memref<64x64xbf16, #tpu.memory_space<vmem>>, vector<64x64xbf16>
    %30 = arith.truncf %28 : vector<128x64xf32> to vector<128x64xbf16>
    %cst_15 = arith.constant dense<0.000000e+00> : vector<64x128xf32>
    %31 = tpu.matmul %29, %30, %cst_15 {dimension_numbers = #tpu.dot_dimension_numbers<[1], [1], [0], [0], [0, 0, 1, 0], [], []>} : vector<64x64xbf16>, vector<128x64xbf16>, vector<64x128xf32> -> vector<64x128xf32>
    %c0_16 = arith.constant 0 : index
    %c0_17 = arith.constant 0 : index
    %32 = vector.load %arg14[%c0_16, %c0_17] : memref<64x1xf32, #tpu.memory_space<vmem>>, vector<64x1xf32>
    %33 = vector.broadcast %32 : vector<64x1xf32> to vector<64x128xf32>
    %34 = arith.addf %31, %33 : vector<64x128xf32>
    %c0_18 = arith.constant 0 : index
    %c0_19 = arith.constant 0 : index
    %35 = arith.index_cast %4 : i32 to index
    %36 = vector.load %arg2[%c0_18, %c0_19, %35] : memref<1x64x256xf32, #tpu.memory_space<vmem>>, vector<1x64x128xf32>
    %37 = vector.shape_cast %36 : vector<1x64x128xf32> to vector<64x128xf32>
    %38 = arith.addf %34, %37 : vector<64x128xf32>
    %c0_20 = arith.constant 0 : index
    %c0_21 = arith.constant 0 : index
    %c0_22 = arith.constant 0 : index
    %39 = vector.load %arg15[%c0_20, %c0_21, %c0_22] : memref<1x64x128xf32, #tpu.memory_space<vmem>>, vector<1x64x128xf32>
    %40 = vector.shape_cast %39 : vector<1x64x128xf32> to vector<64x128xf32>
    %41 = vector.shape_cast %38 : vector<64x128xf32> to vector<1x64x128xf32>
    tpu.vector_store %arg15[%c0_20, %c0_21, %c0_22], %41 {strides = array<i32>} : memref<1x64x128xf32, #tpu.memory_space<vmem>>, vector<1x64x128xf32>,
    return
  }
  func.func @transform_0(%arg0: i32, %arg1: i32) -> (i32, i32, i32) {
    %c0_i32 = arith.constant 0 : i32
    %c0_i32_0 = arith.constant 0 : i32
    %c0_i32_1 = arith.constant 0 : i32
    return %arg0, %c0_i32, %c0_i32_0 : i32, i32, i32
  }
  func.func @transform_1(%arg0: i32, %arg1: i32) -> (i32, i32) {
    %c0_i32 = arith.constant 0 : i32
    %c0_i32_0 = arith.constant 0 : i32
    %c0_i32_1 = arith.constant 0 : i32
    return %c0_i32, %c0_i32_0 : i32, i32
  }
  func.func @transform_2(%arg0: i32, %arg1: i32) -> (i32, i32) {
    %c0_i32 = arith.constant 0 : i32
    %c0_i32_0 = arith.constant 0 : i32
    %c0_i32_1 = arith.constant 0 : i32
    return %c0_i32, %c0_i32_0 : i32, i32
  }
  func.func @transform_3(%arg0: i32, %arg1: i32) -> (i32, i32) {
    %c0_i32 = arith.constant 0 : i32
    %c0_i32_0 = arith.constant 0 : i32
    %c0_i32_1 = arith.constant 0 : i32
    return %c0_i32, %c0_i32_0 : i32, i32
  }
  func.func @transform_4(%arg0: i32, %arg1: i32) -> (i32, i32) {
    %c0_i32 = arith.constant 0 : i32
    %c0_i32_0 = arith.constant 0 : i32
    %c0_i32_1 = arith.constant 0 : i32
    return %c0_i32, %c0_i32_0 : i32, i32
  }
  func.func @transform_5(%arg0: i32, %arg1: i32) -> (i32, i32) {
    %c0_i32 = arith.constant 0 : i32
    %c0_i32_0 = arith.constant 0 : i32
    %c0_i32_1 = arith.constant 0 : i32
    return %c0_i32, %c0_i32_0 : i32, i32
  }
  func.func @transform_6(%arg0: i32, %arg1: i32) -> (i32, i32) {
    %c0_i32 = arith.constant 0 : i32
    %c0_i32_0 = arith.constant 0 : i32
    %c0_i32_1 = arith.constant 0 : i32
    return %c0_i32, %c0_i32_0 : i32, i32
  }
  func.func @transform_7(%arg0: i32, %arg1: i32) -> (i32, i32) {
    %c0_i32 = arith.constant 0 : i32
    %c0_i32_0 = arith.constant 0 : i32
    %c0_i32_1 = arith.constant 0 : i32
    return %c0_i32, %c0_i32_0 : i32, i32
  }
  func.func @transform_8(%arg0: i32, %arg1: i32) -> (i32, i32) {
    %c0_i32 = arith.constant 0 : i32
    %c0_i32_0 = arith.constant 0 : i32
    %c0_i32_1 = arith.constant 0 : i32
    return %c0_i32, %c0_i32_0 : i32, i32
  }
  func.func @transform_9(%arg0: i32, %arg1: i32) -> (i32, i32) {
    %c0_i32 = arith.constant 0 : i32
    %c0_i32_0 = arith.constant 0 : i32
    %c0_i32_1 = arith.constant 0 : i32
    return %c0_i32, %c0_i32_0 : i32, i32
  }
  func.func @transform_10(%arg0: i32, %arg1: i32) -> (i32, i32) {
    %c0_i32 = arith.constant 0 : i32
    %c0_i32_0 = arith.constant 0 : i32
    %c0_i32_1 = arith.constant 0 : i32
    return %c0_i32, %c0_i32_0 : i32, i32
  }
  func.func @transform_11(%arg0: i32, %arg1: i32) -> (i32, i32) {
    %c0_i32 = arith.constant 0 : i32
    %c0_i32_0 = arith.constant 0 : i32
    %c0_i32_1 = arith.constant 0 : i32
    return %c0_i32, %c0_i32_0 : i32, i32
  }
  func.func @transform_12(%arg0: i32, %arg1: i32) -> (i32, i32) {
    %c0_i32 = arith.constant 0 : i32
    %c0_i32_0 = arith.constant 0 : i32
    %c0_i32_1 = arith.constant 0 : i32
    return %c0_i32, %c0_i32_0 : i32, i32
  }
  func.func @transform_13(%arg0: i32, %arg1: i32) -> (i32, i32, i32) {
    %c0_i32 = arith.constant 0 : i32
    %c0_i32_0 = arith.constant 0 : i32
    return %arg0, %c0_i32, %arg1 : i32, i32, i32
  }
}

module attributes {stable_mosaic.version = 11 : i64} {
  func.func @_vae_attention_kernel(%arg0: i32, %arg1: i32, %arg2: memref<1x64x256xf32, #tpu.memory_space<vmem>>, %arg3: memref<64x1xf32, #tpu.memory_space<vmem>>, %arg4: memref<64x1xf32, #tpu.memory_space<vmem>>, %arg5: memref<64x32xf32, #tpu.memory_space<vmem>>, %arg6: memref<32x64xf32, #tpu.memory_space<vmem>>, %arg7: memref<64x64xbf16, #tpu.memory_space<vmem>>, %arg8: memref<64x64xbf16, #tpu.memory_space<vmem>>, %arg9: memref<64x64xbf16, #tpu.memory_space<vmem>>, %arg10: memref<64x64xbf16, #tpu.memory_space<vmem>>, %arg11: memref<1x64xf32, #tpu.memory_space<vmem>>, %arg12: memref<64x1xf32, #tpu.memory_space<vmem>>, %arg13: memref<64x1xf32, #tpu.memory_space<vmem>>, %arg14: memref<64x1xf32, #tpu.memory_space<vmem>>, %arg15: memref<1x64x128xf32, #tpu.memory_space<vmem>>, %arg16: memref<64x256xbf16, #tpu.memory_space<vmem>>, %arg17: memref<64x256xbf16, #tpu.memory_space<vmem>>, %arg18: memref<64x256xbf16, #tpu.memory_space<vmem>>) attributes {dimension_semantics = [#tpu.dimension_semantics<parallel>, #tpu.dimension_semantics<arbitrary>], iteration_bounds = array<i64: 2, 2>, scalar_prefetch = 0 : i64, scratch_operands = 3 : i64, tpu.core_type = #tpu.core_type<tc>, window_params = [{transform_indices = @transform_0, window_bounds = array<i64: 1, 64, 256>}, {pipeline_mode = #tpu.pipeline_mode<synchronous>, transform_indices = @transform_1, window_bounds = array<i64: 64, 1>}, {pipeline_mode = #tpu.pipeline_mode<synchronous>, transform_indices = @transform_2, window_bounds = array<i64: 64, 1>}, {pipeline_mode = #tpu.pipeline_mode<synchronous>, transform_indices = @transform_3, window_bounds = array<i64: 64, 32>}, {pipeline_mode = #tpu.pipeline_mode<synchronous>, transform_indices = @transform_4, window_bounds = array<i64: 32, 64>}, {pipeline_mode = #tpu.pipeline_mode<synchronous>, transform_indices = @transform_5, window_bounds = array<i64: 64, 64>}, {pipeline_mode = #tpu.pipeline_mode<synchronous>, transform_indices = @transform_6, window_bounds = array<i64: 64, 64>}, {pipeline_mode = #tpu.pipeline_mode<synchronous>, transform_indices = @transform_7, window_bounds = array<i64: 64, 64>}, {pipeline_mode = #tpu.pipeline_mode<synchronous>, transform_indices = @transform_8, window_bounds = array<i64: 64, 64>}, {pipeline_mode = #tpu.pipeline_mode<synchronous>, transform_indices = @transform_9, window_bounds = array<i64: 1, 64>}, {pipeline_mode = #tpu.pipeline_mode<synchronous>, transform_indices = @transform_10, window_bounds = array<i64: 64, 1>}, {pipeline_mode = #tpu.pipeline_mode<synchronous>, transform_indices = @transform_11, window_bounds = array<i64: 64, 1>}, {pipeline_mode = #tpu.pipeline_mode<synchronous>, transform_indices = @transform_12, window_bounds = array<i64: 64, 1>}, {transform_indices = @transform_13, window_bounds = array<i64: 1, 64, 128>}]} {
    %c0_i32 = arith.constant 0 : i32
    %0 = arith.cmpi eq, %arg1, %c0_i32 : i32
    %1 = arith.extui %0 : i1 to i32
    %c0_i32_0 = arith.constant 0 : i32
    %2 = arith.cmpi ne, %1, %c0_i32_0 : i32
    scf.if %2 {
      %cst_23 = arith.constant 0.000000e+00 : f32
      %42 = vector.broadcast %cst_23 : f32 to vector<64x1xf32>
      %c0_i32_24 = arith.constant 0 : i32
      %c256_i32 = arith.constant 256 : i32
      %43 = arith.muli %c0_i32_24, %c256_i32 : i32
      %44 = tpu.assume_multiple %43, 256 : i32
      %c0_25 = arith.constant 0 : index
      %c0_26 = arith.constant 0 : index
      %45 = arith.index_cast %44 : i32 to index
      %46 = vector.load %arg2[%c0_25, %c0_26, %45] : memref<1x64x256xf32, #tpu.memory_space<vmem>>, vector<1x64x256xf32>
      %47 = vector.shape_cast %46 : vector<1x64x256xf32> to vector<64x256xf32>
      %cst_27 = arith.constant dense<0.000000e+00> : vector<64xf32>
      %48 = vector.multi_reduction <add>, %47, %cst_27 [1] : vector<64x256xf32> to vector<64xf32>
      %49 = vector.shape_cast %48 : vector<64xf32> to vector<64x1xf32>
      %50 = arith.addf %42, %49 : vector<64x1xf32>
      %c1_i32 = arith.constant 1 : i32
      %c0_28 = arith.constant 0 : index
      %c0_29 = arith.constant 0 : index
      %51 = vector.load %arg6[%c0_28, %c0_29] : memref<32x64xf32, #tpu.memory_space<vmem>>, vector<32x64xf32>
      %cst_30 = arith.constant dense<0.000000e+00> : vector<32x1xf32>
      %52 = tpu.matmul %51, %50, %cst_30 {dimension_numbers = #tpu.dot_dimension_numbers<[1], [0], [0], [1], [0, 0, 1, 1], [], []>} : vector<32x64xf32>, vector<64x1xf32>, vector<32x1xf32> -> vector<32x1xf32>
      %cst_31 = arith.constant 5.120000e+02 : f32
      %53 = vector.broadcast %cst_31 : f32 to vector<32x1xf32>
      %54 = arith.divf %52, %53 : vector<32x1xf32>
      %c0_32 = arith.constant 0 : index
      %c0_33 = arith.constant 0 : index
      %55 = vector.load %arg5[%c0_32, %c0_33] : memref<64x32xf32, #tpu.memory_space<vmem>>, vector<64x32xf32>
      %cst_34 = arith.constant dense<0.000000e+00> : vector<64x1xf32>
      %56 = tpu.matmul %55, %54, %cst_34 {dimension_numbers = #tpu.dot_dimension_numbers<[1], [0], [0], [1], [0, 0, 1, 1], [], []>} : vector<64x32xf32>, vector<32x1xf32>, vector<64x1xf32> -> vector<64x1xf32>
      %cst_35 = arith.constant 0.000000e+00 : f32
      %57 = vector.broadcast %cst_35 : f32 to vector<64x1xf32>
      %c0_i32_36 = arith.constant 0 : i32
      %c256_i32_37 = arith.constant 256 : i32
      %58 = arith.muli %c0_i32_36, %c256_i32_37 : i32
      %59 = tpu.assume_multiple %58, 256 : i32
      %c0_38 = arith.constant 0 : index
      %c0_39 = arith.constant 0 : index
      %60 = arith.index_cast %59 : i32 to index
      %61 = vector.load %arg2[%c0_38, %c0_39, %60] : memref<1x64x256xf32, #tpu.memory_space<vmem>>, vector<1x64x256xf32>
      %62 = vector.shape_cast %61 : vector<1x64x256xf32> to vector<64x256xf32>
      %63 = vector.broadcast %56 : vector<64x1xf32> to vector<64x256xf32>
      %64 = arith.subf %62, %63 : vector<64x256xf32>
      %65 = arith.mulf %64, %64 : vector<64x256xf32>
      %cst_40 = arith.constant dense<0.000000e+00> : vector<64xf32>
      %66 = vector.multi_reduction <add>, %65, %cst_40 [1] : vector<64x256xf32> to vector<64xf32>
      %67 = vector.shape_cast %66 : vector<64xf32> to vector<64x1xf32>
      %68 = arith.addf %57, %67 : vector<64x1xf32>
      %c1_i32_41 = arith.constant 1 : i32
      %c0_42 = arith.constant 0 : index
      %c0_43 = arith.constant 0 : index
      %69 = vector.load %arg6[%c0_42, %c0_43] : memref<32x64xf32, #tpu.memory_space<vmem>>, vector<32x64xf32>
      %cst_44 = arith.constant dense<0.000000e+00> : vector<32x1xf32>
      %70 = tpu.matmul %69, %68, %cst_44 {dimension_numbers = #tpu.dot_dimension_numbers<[1], [0], [0], [1], [0, 0, 1, 1], [], []>} : vector<32x64xf32>, vector<64x1xf32>, vector<32x1xf32> -> vector<32x1xf32>
      %cst_45 = arith.constant 5.120000e+02 : f32
      %71 = vector.broadcast %cst_45 : f32 to vector<32x1xf32>
      %72 = arith.divf %70, %71 : vector<32x1xf32>
      %c0_46 = arith.constant 0 : index
      %c0_47 = arith.constant 0 : index
      %73 = vector.load %arg5[%c0_46, %c0_47] : memref<64x32xf32, #tpu.memory_space<vmem>>, vector<64x32xf32>
      %cst_48 = arith.constant dense<0.000000e+00> : vector<64x1xf32>
      %74 = tpu.matmul %73, %72, %cst_48 {dimension_numbers = #tpu.dot_dimension_numbers<[1], [0], [0], [1], [0, 0, 1, 1], [], []>} : vector<64x32xf32>, vector<32x1xf32>, vector<64x1xf32> -> vector<64x1xf32>
      %cst_49 = arith.constant 9.99999974E-6 : f32
      %75 = vector.broadcast %cst_49 : f32 to vector<64x1xf32>
      %76 = arith.addf %74, %75 : vector<64x1xf32>
      %77 = math.rsqrt %76 : vector<64x1xf32>
      %c0_50 = arith.constant 0 : index
      %c0_51 = arith.constant 0 : index
      %78 = vector.load %arg3[%c0_50, %c0_51] : memref<64x1xf32, #tpu.memory_space<vmem>>, vector<64x1xf32>
      %79 = arith.mulf %77, %78 : vector<64x1xf32>
      %c0_52 = arith.constant 0 : index
      %c0_53 = arith.constant 0 : index
      %80 = vector.load %arg4[%c0_52, %c0_53] : memref<64x1xf32, #tpu.memory_space<vmem>>, vector<64x1xf32>
      %81 = arith.mulf %56, %79 : vector<64x1xf32>
      %82 = arith.subf %80, %81 : vector<64x1xf32>
      %c0_i32_54 = arith.constant 0 : i32
      %c256_i32_55 = arith.constant 256 : i32
      %83 = arith.muli %c0_i32_54, %c256_i32_55 : i32
      %84 = tpu.assume_multiple %83, 256 : i32
      %c0_56 = arith.constant 0 : index
      %c0_57 = arith.constant 0 : index
      %85 = arith.index_cast %84 : i32 to index
      %86 = vector.load %arg2[%c0_56, %c0_57, %85] : memref<1x64x256xf32, #tpu.memory_space<vmem>>, vector<1x64x256xf32>
      %87 = vector.shape_cast %86 : vector<1x64x256xf32> to vector<64x256xf32>
      %88 = vector.broadcast %79 : vector<64x1xf32> to vector<64x256xf32>
      %89 = arith.mulf %87, %88 : vector<64x256xf32>
      %90 = vector.broadcast %82 : vector<64x1xf32> to vector<64x256xf32>
      %91 = arith.addf %89, %90 : vector<64x256xf32>
      %92 = arith.truncf %91 : vector<64x256xf32> to vector<64x256xbf16>
      %c0_58 = arith.constant 0 : index
      %93 = arith.index_cast %84 : i32 to index
      %94 = vector.load %arg16[%c0_58, %93] : memref<64x256xbf16, #tpu.memory_space<vmem>>, vector<64x256xbf16>
      tpu.vector_store %arg16[%c0_58, %93], %92 {strides = array<i32>} : memref<64x256xbf16, #tpu.memory_space<vmem>>, vector<64x256xbf16>,
      %c0_59 = arith.constant 0 : index
      %c0_60 = arith.constant 0 : index
      %95 = vector.load %arg8[%c0_59, %c0_60] : memref<64x64xbf16, #tpu.memory_space<vmem>>, vector<64x64xbf16>
      %cst_61 = arith.constant dense<0.000000e+00> : vector<64x256xf32>
      %96 = tpu.matmul %95, %92, %cst_61 {dimension_numbers = #tpu.dot_dimension_numbers<[1], [0], [0], [1], [0, 0, 1, 1], [], []>} : vector<64x64xbf16>, vector<64x256xbf16>, vector<64x256xf32> -> vector<64x256xf32>
      %c0_62 = arith.constant 0 : index
      %c0_63 = arith.constant 0 : index
      %97 = vector.load %arg12[%c0_62, %c0_63] : memref<64x1xf32, #tpu.memory_space<vmem>>, vector<64x1xf32>
      %98 = vector.broadcast %97 : vector<64x1xf32> to vector<64x256xf32>
      %99 = arith.addf %96, %98 : vector<64x256xf32>
      %100 = arith.truncf %99 : vector<64x256xf32> to vector<64x256xbf16>
      %c0_64 = arith.constant 0 : index
      %101 = arith.index_cast %84 : i32 to index
      %102 = vector.load %arg17[%c0_64, %101] : memref<64x256xbf16, #tpu.memory_space<vmem>>, vector<64x256xbf16>
      tpu.vector_store %arg17[%c0_64, %101], %100 {strides = array<i32>} : memref<64x256xbf16, #tpu.memory_space<vmem>>, vector<64x256xbf16>,
      %c0_65 = arith.constant 0 : index
      %c0_66 = arith.constant 0 : index
      %103 = vector.load %arg9[%c0_65, %c0_66] : memref<64x64xbf16, #tpu.memory_space<vmem>>, vector<64x64xbf16>
      %cst_67 = arith.constant dense<0.000000e+00> : vector<64x256xf32>
      %104 = tpu.matmul %103, %92, %cst_67 {dimension_numbers = #tpu.dot_dimension_numbers<[1], [0], [0], [1], [0, 0, 1, 1], [], []>} : vector<64x64xbf16>, vector<64x256xbf16>, vector<64x256xf32> -> vector<64x256xf32>
      %c0_68 = arith.constant 0 : index
      %c0_69 = arith.constant 0 : index
      %105 = vector.load %arg13[%c0_68, %c0_69] : memref<64x1xf32, #tpu.memory_space<vmem>>, vector<64x1xf32>
      %106 = vector.broadcast %105 : vector<64x1xf32> to vector<64x256xf32>
      %107 = arith.addf %104, %106 : vector<64x256xf32>
      %108 = arith.truncf %107 : vector<64x256xf32> to vector<64x256xbf16>
      %c0_70 = arith.constant 0 : index
      %109 = arith.index_cast %84 : i32 to index
      %110 = vector.load %arg18[%c0_70, %109] : memref<64x256xbf16, #tpu.memory_space<vmem>>, vector<64x256xbf16>
      tpu.vector_store %arg18[%c0_70, %109], %108 {strides = array<i32>} : memref<64x256xbf16, #tpu.memory_space<vmem>>, vector<64x256xbf16>,
      %c1_i32_71 = arith.constant 1 : i32
    } else {
    }
    %c128_i32 = arith.constant 128 : i32
    %3 = arith.muli %arg1, %c128_i32 : i32
    %4 = tpu.assume_multiple %3, 128 : i32
    %c0 = arith.constant 0 : index
    %5 = arith.index_cast %4 : i32 to index
    %6 = vector.load %arg16[%c0, %5] : memref<64x256xbf16, #tpu.memory_space<vmem>>, vector<64x128xbf16>
    %7 = tpu.transpose %6, [1, 0] : vector<64x128xbf16> -> vector<128x64xbf16>
    %c0_1 = arith.constant 0 : index
    %c0_2 = arith.constant 0 : index
    %8 = vector.load %arg7[%c0_1, %c0_2] : memref<64x64xbf16, #tpu.memory_space<vmem>>, vector<64x64xbf16>
    %cst = arith.constant dense<0.000000e+00> : vector<128x64xf32>
    %9 = tpu.matmul %7, %8, %cst {dimension_numbers = #tpu.dot_dimension_numbers<[1], [0], [0], [1], [0, 0, 1, 1], [], []>} : vector<128x64xbf16>, vector<64x64xbf16>, vector<128x64xf32> -> vector<128x64xf32>
    %c0_3 = arith.constant 0 : index
    %c0_4 = arith.constant 0 : index
    %10 = vector.load %arg11[%c0_3, %c0_4] : memref<1x64xf32, #tpu.memory_space<vmem>>, vector<1x64xf32>
    %11 = vector.broadcast %10 : vector<1x64xf32> to vector<128x64xf32>
    %12 = arith.addf %9, %11 : vector<128x64xf32>
    %13 = arith.truncf %12 : vector<128x64xf32> to vector<128x64xbf16>
    %c0_5 = arith.constant 0 : index
    %c0_6 = arith.constant 0 : index
    %14 = vector.load %arg17[%c0_5, %c0_6] : memref<64x256xbf16, #tpu.memory_space<vmem>>, vector<64x256xbf16>
    %cst_7 = arith.constant dense<0.000000e+00> : vector<128x256xf32>
    %15 = tpu.matmul %13, %14, %cst_7 {dimension_numbers = #tpu.dot_dimension_numbers<[1], [0], [0], [1], [0, 0, 1, 1], [], []>} : vector<128x64xbf16>, vector<64x256xbf16>, vector<128x256xf32> -> vector<128x256xf32>
    %cst_8 = arith.constant dense<0xFF800000> : vector<128xf32>
    %16 = vector.multi_reduction <maximumf>, %15, %cst_8 [1] : vector<128x256xf32> to vector<128xf32>
    %17 = vector.shape_cast %16 : vector<128xf32> to vector<128x1xf32>
    %18 = vector.broadcast %17 : vector<128x1xf32> to vector<128x256xf32>
    %19 = arith.subf %15, %18 : vector<128x256xf32>
    %20 = math.exp %19 : vector<128x256xf32>
    %cst_9 = arith.constant dense<0.000000e+00> : vector<128xf32>
    %21 = vector.multi_reduction <add>, %20, %cst_9 [1] : vector<128x256xf32> to vector<128xf32>
    %22 = vector.shape_cast %21 : vector<128xf32> to vector<128x1xf32>
    %23 = arith.truncf %20 : vector<128x256xf32> to vector<128x256xbf16>
    %c0_10 = arith.constant 0 : index
    %c0_11 = arith.constant 0 : index
    %24 = vector.load %arg18[%c0_10, %c0_11] : memref<64x256xbf16, #tpu.memory_space<vmem>>, vector<64x256xbf16>
    %cst_12 = arith.constant dense<0.000000e+00> : vector<128x64xf32>
    %25 = tpu.matmul %23, %24, %cst_12 {dimension_numbers = #tpu.dot_dimension_numbers<[1], [1], [0], [0], [0, 0, 1, 0], [], []>} : vector<128x256xbf16>, vector<64x256xbf16>, vector<128x64xf32> -> vector<128x64xf32>
    %26 = tpu.reciprocal %22 {approx = true} : vector<128x1xf32> -> vector<128x1xf32>
    %27 = vector.broadcast %26 : vector<128x1xf32> to vector<128x64xf32>
    %28 = arith.mulf %25, %27 : vector<128x64xf32>
    %c0_13 = arith.constant 0 : index
    %c0_14 = arith.constant 0 : index
    %29 = vector.load %arg10[%c0_13, %c0_14] : memref<64x64xbf16, #tpu.memory_space<vmem>>, vector<64x64xbf16>
    %30 = arith.truncf %28 : vector<128x64xf32> to vector<128x64xbf16>
    %cst_15 = arith.constant dense<0.000000e+00> : vector<64x128xf32>
    %31 = tpu.matmul %29, %30, %cst_15 {dimension_numbers = #tpu.dot_dimension_numbers<[1], [1], [0], [0], [0, 0, 1, 0], [], []>} : vector<64x64xbf16>, vector<128x64xbf16>, vector<64x128xf32> -> vector<64x128xf32>
    %c0_16 = arith.constant 0 : index
    %c0_17 = arith.constant 0 : index
    %32 = vector.load %arg14[%c0_16, %c0_17] : memref<64x1xf32, #tpu.memory_space<vmem>>, vector<64x1xf32>
    %33 = vector.broadcast %32 : vector<64x1xf32> to vector<64x128xf32>
    %34 = arith.addf %31, %33 : vector<64x128xf32>
    %c0_18 = arith.constant 0 : index
    %c0_19 = arith.constant 0 : index
    %35 = arith.index_cast %4 : i32 to index
    %36 = vector.load %arg2[%c0_18, %c0_19, %35] : memref<1x64x256xf32, #tpu.memory_space<vmem>>, vector<1x64x128xf32>
    %37 = vector.shape_cast %36 : vector<1x64x128xf32> to vector<64x128xf32>
    %38 = arith.addf %34, %37 : vector<64x128xf32>
    %c0_20 = arith.constant 0 : index
    %c0_21 = arith.constant 0 : index
    %c0_22 = arith.constant 0 : index
    %39 = vector.load %arg15[%c0_20, %c0_21, %c0_22] : memref<1x64x128xf32, #tpu.memory_space<vmem>>, vector<1x64x128xf32>
    %40 = vector.shape_cast %39 : vector<1x64x128xf32> to vector<64x128xf32>
    %41 = vector.shape_cast %38 : vector<64x128xf32> to vector<1x64x128xf32>
    tpu.vector_store %arg15[%c0_20, %c0_21, %c0_22], %41 {strides = array<i32>} : memref<1x64x128xf32, #tpu.memory_space<vmem>>, vector<1x64x128xf32>,
    return
  }
  func.func @transform_0(%arg0: i32, %arg1: i32) -> (i32, i32, i32) {
    %c0_i32 = arith.constant 0 : i32
    %c0_i32_0 = arith.constant 0 : i32
    %c0_i32_1 = arith.constant 0 : i32
    return %arg0, %c0_i32, %c0_i32_0 : i32, i32, i32
  }
  func.func @transform_1(%arg0: i32, %arg1: i32) -> (i32, i32) {
    %c0_i32 = arith.constant 0 : i32
    %c0_i32_0 = arith.constant 0 : i32
    %c0_i32_1 = arith.constant 0 : i32
    return %c0_i32, %c0_i32_0 : i32, i32
  }
  func.func @transform_2(%arg0: i32, %arg1: i32) -> (i32, i32) {
    %c0_i32 = arith.constant 0 : i32
    %c0_i32_0 = arith.constant 0 : i32
    %c0_i32_1 = arith.constant 0 : i32
    return %c0_i32, %c0_i32_0 : i32, i32
  }
  func.func @transform_3(%arg0: i32, %arg1: i32) -> (i32, i32) {
    %c0_i32 = arith.constant 0 : i32
    %c0_i32_0 = arith.constant 0 : i32
    %c0_i32_1 = arith.constant 0 : i32
    return %c0_i32, %c0_i32_0 : i32, i32
  }
  func.func @transform_4(%arg0: i32, %arg1: i32) -> (i32, i32) {
    %c0_i32 = arith.constant 0 : i32
    %c0_i32_0 = arith.constant 0 : i32
    %c0_i32_1 = arith.constant 0 : i32
    return %c0_i32, %c0_i32_0 : i32, i32
  }
  func.func @transform_5(%arg0: i32, %arg1: i32) -> (i32, i32) {
    %c0_i32 = arith.constant 0 : i32
    %c0_i32_0 = arith.constant 0 : i32
    %c0_i32_1 = arith.constant 0 : i32
    return %c0_i32, %c0_i32_0 : i32, i32
  }
  func.func @transform_6(%arg0: i32, %arg1: i32) -> (i32, i32) {
    %c0_i32 = arith.constant 0 : i32
    %c0_i32_0 = arith.constant 0 : i32
    %c0_i32_1 = arith.constant 0 : i32
    return %c0_i32, %c0_i32_0 : i32, i32
  }
  func.func @transform_7(%arg0: i32, %arg1: i32) -> (i32, i32) {
    %c0_i32 = arith.constant 0 : i32
    %c0_i32_0 = arith.constant 0 : i32
    %c0_i32_1 = arith.constant 0 : i32
    return %c0_i32, %c0_i32_0 : i32, i32
  }
  func.func @transform_8(%arg0: i32, %arg1: i32) -> (i32, i32) {
    %c0_i32 = arith.constant 0 : i32
    %c0_i32_0 = arith.constant 0 : i32
    %c0_i32_1 = arith.constant 0 : i32
    return %c0_i32, %c0_i32_0 : i32, i32
  }
  func.func @transform_9(%arg0: i32, %arg1: i32) -> (i32, i32) {
    %c0_i32 = arith.constant 0 : i32
    %c0_i32_0 = arith.constant 0 : i32
    %c0_i32_1 = arith.constant 0 : i32
    return %c0_i32, %c0_i32_0 : i32, i32
  }
  func.func @transform_10(%arg0: i32, %arg1: i32) -> (i32, i32) {
    %c0_i32 = arith.constant 0 : i32
    %c0_i32_0 = arith.constant 0 : i32
    %c0_i32_1 = arith.constant 0 : i32
    return %c0_i32, %c0_i32_0 : i32, i32
  }
  func.func @transform_11(%arg0: i32, %arg1: i32) -> (i32, i32) {
    %c0_i32 = arith.constant 0 : i32
    %c0_i32_0 = arith.constant 0 : i32
    %c0_i32_1 = arith.constant 0 : i32
    return %c0_i32, %c0_i32_0 : i32, i32
  }
  func.func @transform_12(%arg0: i32, %arg1: i32) -> (i32, i32) {
    %c0_i32 = arith.constant 0 : i32
    %c0_i32_0 = arith.constant 0 : i32
    %c0_i32_1 = arith.constant 0 : i32
    return %c0_i32, %c0_i32_0 : i32, i32
  }
  func.func @transform_13(%arg0: i32, %arg1: i32) -> (i32, i32, i32) {
    %c0_i32 = arith.constant 0 : i32
    %c0_i32_0 = arith.constant 0 : i32
    return %arg0, %c0_i32, %arg1 : i32, i32, i32
  }
}

</mosaic_0001>

<bundles_post_ra>
// kernel: tpu_custom_call.1
= control target key start
LH: loop header
LB: loop body
LE: loop exit
PB: predicated region body
PF: predicated region fallthrough
CT: control target
= control target key end

     0   :  { %s3933_s0 = inlined_call_operand.vmem [shape: f32[2,64,256], index: 0, kind: input, shape index: {}]   ;;  %s3934_s1 = inlined_call_operand.vmem [shape: f32[64,1], index: 1, kind: input, shape index: {}]   ;;  %s3935_s2 = inlined_call_operand.vmem [shape: f32[64,1], index: 2, kind: input, shape index: {}]   ;;  %s3936_s3 = inlined_call_operand.vmem [shape: f32[64,32], index: 3, kind: input, shape index: {}]   ;;  %s3937_s4 = inlined_call_operand.vmem [shape: f32[32,64], index: 4, kind: input, shape index: {}]   ;;  %s3938_s5 = inlined_call_operand.vmem [shape: bf16[64,64], index: 5, kind: input, shape index: {}]   ;;  %s3939_s6 = inlined_call_operand.vmem [shape: bf16[64,64], index: 6, kind: input, shape index: {}]   ;;  %s3940_s7 = inlined_call_operand.vmem [shape: bf16[64,64], index: 7, kind: input, shape index: {}]   ;;  %s3941_s8 = inlined_call_operand.vmem [shape: bf16[64,64], index: 8, kind: input, shape index: {}]   ;;  %s3942_s9 = inlined_call_operand.vmem [shape: f32[1,64], index: 9, kind: input, shape index: {}]   ;;  %s3943_s10 = inlined_call_operand.vmem [shape: f32[64,1], index: 10, kind: input, shape index: {}]   ;;  %s3944_s11 = inlined_call_operand.vmem [shape: f32[64,1], index: 11, kind: input, shape index: {}]   ;;  %s3945_s12 = inlined_call_operand.vmem [shape: f32[64,1], index: 12, kind: input, shape index: {}]   ;;  %s3946_s13 = inlined_call_operand.hbm [shape: f32[2,64,256], index: 13, kind: output, shape index: {}]  }
   0x1   :  { %3957 = sst [smem:[#allocation15_spill]] %s3933_s0 }
   0x2   :  { %3958 = sst [smem:[#allocation16_spill]] %s3934_s1 }
   0x3   :  { %3959 = sst [smem:[#allocation17_spill]] %s3935_s2 }
   0x4   :  { %3960 = sst [smem:[#allocation18_spill]] %s3936_s3 }
   0x5   :  { %18 = vsyncpa [#allocation6], 0 }
   0x6   :  { %20 = vsyncpa [#allocation6 + $0x1], 0  ;;  %s3079_s25 = smov 0   ;;  %s3081_s26 = smov 0  }
   0x7   :  { %s3083_s27 = smov 0   ;;  %s3085_s28 = smov 0  }
   0x8   :  { %s3087_s29 = smov 0   ;;  %s3089_s30 = smov 0  }
   0x9   :  { %s3091_s14 = smov 0   ;;  %s3093_s15 = smov 0  }
   0xa LB: > { %3961 = sst [smem:[#allocation8_spill]] %s2973_s25  ;;  %s2428_s16 = sadd.s32 4294967295, %s3001_s15   ;;  %s3001_s15 = sphi %s3093_s15, %s26_s15   ;;  %s2997_s14 = sphi %s3091_s14, %s3986_s14   ;;  %s2993_s30 = sphi %s3089_s30, %s3980_s30   ;;  %s2989_s29 = sphi %s3087_s29, %s3985_s29   ;;  %s2985_s28 = sphi %s3085_s28, %s3979_s28   ;;  %s2981_s27 = sphi %s3083_s27, %s3984_s27   ;;  %s2977_s26 = sphi %s3081_s26, %s3983_s26   ;;  %s2973_s25 = sphi %s3079_s25, %s3982_s25  }
   0xb   : > { %3962 = sst [smem:[#allocation9_spill]] %s2993_s30  ;;  %s2429_s17 = sadd.s32 4294967294, %s3001_s15  }
   0xc   : > { %3963 = sst [smem:[#allocation10_spill]] %s3001_s15  ;;  %s35_s18 = sadd.s32 1, %s2993_s30 }
   0xd   : > { %p36_p0 = scmp.ge.s32.totalorder %s35_s18, 2  ;;  %s38_s19 = sadd.s32 1, %s2997_s14 }
   0xe   : > { %p335_p1 = scmp.ne.s32.totalorder %s2981_s27, %s2977_s26  ;;  %p336_p2 = scmp.eq.s32.totalorder %s2428_s16, 3 }
   0xf   : > { %s3988_s18 = smov (%p36_p0, %s35_s18), 0  ;;  %s3990_s19 = smov (!%p36_p0, %s38_s19), %s2997_s14 }
  0x10   : > { %3964 = sst [smem:[#allocation11_spill]] %s3988_s18  ;;  %s321_s20 = ssub.s32 %s2993_s30, %s3988_s18 }
  0x11   : > { %p3130_p3 = por %p336_p2, %p335_p1  ;;  %p40_p4 = scmp.ge.s32.totalorder %s3990_s19, 2 }
  0x12   : > { %p341_p5 = scmp.ne.s32.totalorder %s2977_s26, %s2973_s25  ;;  %p342_p6 = scmp.eq.s32.totalorder %s2429_s17, 3 }
  0x13   : > { %s3965_s21 = scalar_select %p3130_p3, 1, 0 }
  0x14   : > { %p2431_p7 = scmp.ge.s32.totalorder %s3001_s15, 1  ;;  %s3992_s19 = smov (%p40_p4, %s3990_s19), 0 }
  0x15   : > { %3966 = sst [smem:[#allocation12_spill]] %s3965_s21  ;;  %p3139_p8 = por %p342_p6, %p341_p5 }
  0x16   : > { %3967 = sst [smem:[#allocation13_spill]] %s3992_s19  ;;  %p404_p9 = scmp.lt.s32.totalorder %s3001_s15, 5 }
  0x17   : > { %s3968_s22 = scalar_select %p3139_p8, 1, 0 }
  0x18   : > { %s320_s23 = ssub.s32 %s2997_s14, %s3992_s19  ;;  %s325_s24 = sadd.s32 1, %s2981_s27 }
  0x19   : > { %3969 = sst [smem:[#allocation14_spill]] %s3968_s22  ;;  %s322_s16 = sor.u32 %s321_s20, %s320_s23 }
  0x1a   : > { %p405_p10 = pnand %p2431_p7, %p404_p9  ;;  %p323_p11 = scmp.eq.s32.totalorder %s322_s16, 0 }
  0x1b   : > { %s3956_s17 = sand.u32 (!%p405_p10), 1, %s2977_s26   ;;  %p448_p12 = scmp.lt.s32.totalorder (!%p405_p10), %s2989_s29, 1 }
  0x1c   : > { %s3148_s18 = scalar_select %p323_p11, %s2981_s27, %s325_s24  }
  0x1d   : > { %408 = sbr.rel (%p405_p10) target bundleno = 2576 (0xa10), region = 72  ;;  %s2432_s30 = sshll.u32 (!%p405_p10), %s3956_s17, 6 }
  0x1e   : > { %s3970_s0 = sld [smem:[#allocation15_spill]] (!%p405_p10)  ;;  %s3160_s20 = scalar_lea.vmem (!%p405_p10), [#allocation5], %s2432_s30 }
  0x1f   : > { %p2435_p13 = scmp.ne.s32.totalorder (!%p405_p10), %s2985_s28, 0 }
  0x22   : > { %s449_s25 = scalar_select %p448_p12, %s2989_s29, 1 }
  0x23   : > { %457 = sbr.rel (%p2435_p13) target bundleno = 1484 (0x5cc), region = 76  ;;  %s3971_s3 = sld [smem:[#allocation18_spill]] (!%p2435_p13) }
  0x24   : > { %s2656_s21 = sshll.u32 %s449_s25, 7  ;;  %s3972_s1 = sld [smem:[#allocation16_spill]] (!%p2435_p13) }
  0x25   : > { %s3158_s19 = scalar_lea.vmem %s3970_s0, %s2656_s21  ;;  %s3973_s2 = sld [smem:[#allocation17_spill]] (!%p2435_p13) }
  0x28   : > { %v3164_v0 = vld [vmem:[%s3158_s19 + $0x70] sm:$0xff]  ;;  %v3167_v1 = vld [vmem:[%s3158_s19 + $0x78] sm:$0xff]  ;;  %v3188_v9 = vld [vmem:[%s3158_s19 + $0x60] sm:$0xff]  ;;  %vm510_vm0 = vcmask 523264   ;;  %v3003_v36 = vmov 512.0   ;;  %vm571_vm2 = vcmask 261120  }
  0x29   : > { %v3170_v2 = vld [vmem:[%s3158_s19 + $0x50] sm:$0xff]  ;;  %v495_v3 = vadd.f32 %v3167_v1, %v3164_v0  ;;  %v3175_v4 = vld [vmem:[%s3158_s19 + $0x58] sm:$0xff]  ;;  %v3191_v10 = vld [vmem:[%s3158_s19 + $0x68] sm:$0xff]  ;;  %2789 = vrcp.f32 %v3003_v36  ;;  %v3004_v59 = vmov 0  }
  0x2a   : > { %v489_v5 = vadd.f32 %v3175_v4, %v3170_v2  ;;  %v3180_v6 = vld [vmem:[%s3158_s19 + $0x30] sm:$0xff]  ;;  %v3183_v7 = vld [vmem:[%s3158_s19 + $0x38] sm:$0xff]  ;;  %v3194_v11 = vld [vmem:[%s3158_s19 + $0x40] sm:$0xff]  ;;  %v492_v15 = vadd.f32 %v3191_v10, %v3188_v9  ;;  %2788 = vset.pattern.permute.xlu2 %v3004_v59  ;;  %2787 = vset.pattern.permute.xlu1 %v3004_v59 }
  0x2b   : > { %496 = vadd.xlane.f32.xlu0 %v495_v3  ;;  %v483_v8 = vadd.f32 %v3183_v7, %v3180_v6  ;;  %v3197_v12 = vld [vmem:[%s3158_s19 + $0x48] sm:$0xff]  ;;  %v3200_v13 = vld [vmem:[%s3158_s19 + $0x20] sm:$0xff]  ;;  %v3212_v18 = vld [vmem:[%s3158_s19 + $0x10] sm:$0xff] }
  0x2c   : > { %490 = vadd.xlane.f32.xlu1 %v489_v5  ;;  %v3203_v14 = vld [vmem:[%s3158_s19 + $0x28] sm:$0xff]  ;;  %v486_v16 = vadd.f32 %v3197_v12, %v3194_v11  ;;  %v3215_v19 = vld [vmem:[%s3158_s19 + $0x18] sm:$0xff]  ;;  %v3218_v20 = vld [vmem:[%s3158_s19] sm:$0xff]  ;;  %2786 = vset.pattern.permute.xlu0 %v3004_v59 }
  0x2d   : > { %484 = vadd.xlane.f32.xlu2 %v483_v8  ;;  %v480_v17 = vadd.f32 %v3203_v14, %v3200_v13  ;;  %v3221_v21 = vld [vmem:[%s3158_s19 + $0x8] sm:$0xff]  ;;  %v477_v22 = vadd.f32 %v3215_v19, %v3212_v18  ;;  %v3230_v32 = vld [vmem:[%s3937_s4] sm:$0xff]  ;;  %v3244_v34 = vld [vmem:[%s3937_s4 + $0x10] sm:$0xff] }
  0x2e   : > { %v474_v23 = vadd.f32 %v3221_v21, %v3218_v20  ;;  %v3237_v33 = vld [vmem:[%s3937_s4 + $0x8] sm:$0xff]  ;;  %v3251_v35 = vld [vmem:[%s3937_s4 + $0x18] sm:$0xff]  ;;  %v3264_v51 = vld [vmem:[%s3971_s3] sm:$0xff] }
  0x2f   : > { %v2790_v38 = vpop.eup %2789  ;;  %v3271_v52 = vld [vmem:[%s3971_s3 + $0x8] sm:$0xff]  ;;  %v3278_v53 = vld [vmem:[%s3971_s3 + $0x10] sm:$0xff]  ;;  %v3285_v54 = vld [vmem:[%s3971_s3 + $0x18] sm:$0xff] }
  0x30   : > { %v553_v39 = vmul.f32 512.0, %v2790_v38  ;;  %vm557_vm1 = vweird.f32 %v2790_v38  ;;  %v3292_v55 = vld [vmem:[%s3971_s3 + $0x20] sm:$0xff]  ;;  %v3299_v56 = vld [vmem:[%s3971_s3 + $0x28] sm:$0xff]  ;;  %v3306_v57 = vld [vmem:[%s3971_s3 + $0x30] sm:$0xff] }
  0x31   : > { %v3313_v58 = vld [vmem:[%s3971_s3 + $0x38] sm:$0xff] }
  0x32   : > { %v554_v41 = vsub.f32 1.0, %v553_v39 }
  0x33   : > { %493 = vadd.xlane.f32.xlu0 %v492_v15 }
  0x34   : > { %487 = vadd.xlane.f32.xlu1 %v486_v16  ;;  %v555_v42 = vmul.f32 %v2790_v38, %v554_v41 }
  0x35   : > { %481 = vadd.xlane.f32.xlu2 %v480_v17 }
  0x36   : > { %v556_v44 = vadd.f32 %v2790_v38, %v555_v42 }
  0x38   : > { %v3255_v45 = vsel %vm557_vm1, %v2790_v38, %v556_v44 }
  0x3b   : > { %478 = vadd.xlane.f32.xlu0 %v477_v22 }
  0x3c   : > { %475 = vadd.xlane.f32.xlu1 %v474_v23 }
  0x9e   : > { %v497_v24 = vpop.xlane.xlu0 %496 }
  0x9f   : > { %531 = vmatpush.msra.mxu0 %v497_v24  ;;  %v491_v25 = vpop.xlane.xlu1 %490 }
  0xa0   : > { %v485_v26 = vpop.xlane.xlu2 %484 }
  0xa6   : > { %v494_v27 = vpop.xlane.xlu0 %493 }
  0xa7   : > { %532 = vmatpush.msra.mxu0 %v494_v27  ;;  %v488_v28 = vpop.xlane.xlu1 %487 }
  0xa8   : > { %v482_v29 = vpop.xlane.xlu2 %481 }
  0xa9   : > { %533 = vmatpush.msra.mxu0 %v491_v25 }
  0xab   : > { %534 = vmatpush.msra.mxu0 %v488_v28 }
  0xad   : > { %535 = vmatpush.msra.mxu0 %v485_v26 }
  0xae   : > { %v479_v30 = vpop.xlane.xlu0 %478 }
  0xaf   : > { %536 = vmatpush.msra.mxu0 %v482_v29  ;;  %v476_v31 = vpop.xlane.xlu1 %475 }
  0xb1   : > { %537 = vmatpush.msra.mxu0 %v479_v30 }
  0xb3   : > { %538 = vmatpush.msra.mxu0 %v476_v31 }
  0xb4   : > { %2436 = vmatmul.msk.f32.vlgmr.msra.gmra.mxu0 %vm510_vm0, %v3230_v32 }
  0xbc   : > { %2437 = vmatmul.msk.f32.gmra.mxu0 %vm510_vm0, %v3237_v33 }
  0xc4   : > { %2438 = vmatmul.msk.f32.gmra.mxu0 %vm510_vm0, %v3244_v34 }
  0xcc   : > { %2439 = vmatmul.msk.f32.gmra.mxu0 %vm510_vm0, %v3251_v35 }
 0x131   : > { %v540_v37 = vpop.f32.mrf.mxu0 }
 0x132   : > { %v559_v50 = vmul.f32 %v3255_v45, %v540_v37 }
 0x139   : > { %v543_v40 = vpop.f32.mrf.mxu0 }
 0x13a   : > { %v560_v49 = vmul.f32 %v3255_v45, %v543_v40 }
 0x141   : > { %v546_v43 = vpop.f32.mrf.mxu0 }
 0x142   : > { %v561_v48 = vmul.f32 %v3255_v45, %v546_v43 }
 0x149   : > { %v549_v46 = vpop.f32.mrf.mxu0 }
 0x14a   : > { %v562_v47 = vmul.f32 %v3255_v45, %v549_v46 }
 0x14c   : > { %608 = vmatpush.msra.mxu1 %v562_v47 }
 0x14e   : > { %609 = vmatpush.msra.mxu1 %v561_v48 }
 0x150   : > { %610 = vmatpush.msra.mxu1 %v560_v49 }
 0x152   : > { %611 = vmatpush.msra.mxu1 %v559_v50 }
 0x153   : > { %2440 = vmatmul.msk.f32.vlgmr.msra.gmra.mxu1 %vm571_vm2, %v3264_v51 }
 0x15b   : > { %2441 = vmatmul.msk.f32.gmra.mxu1 %vm571_vm2, %v3271_v52 }
 0x163   : > { %2442 = vmatmul.msk.f32.gmra.mxu1 %vm571_vm2, %v3278_v53 }
 0x16b   : > { %2443 = vmatmul.msk.f32.gmra.mxu1 %vm571_vm2, %v3285_v54 }
 0x173   : > { %2444 = vmatmul.msk.f32.gmra.mxu1 %vm571_vm2, %v3292_v55 }
 0x17b   : > { %2445 = vmatmul.msk.f32.gmra.mxu1 %vm571_vm2, %v3299_v56 }
 0x183   : > { %2446 = vmatmul.msk.f32.gmra.mxu1 %vm571_vm2, %v3306_v57 }
 0x18b   : > { %2447 = vmatmul.msk.f32.gmra.mxu1 %vm571_vm2, %v3313_v58 }
 0x1d0   : > { %v3317_v60 = vpop.f32.mrf.mxu1 }
 0x1d8   : > { %v3319_v61 = vpop.f32.mrf.mxu1 }
 0x1e0   : > { %v3321_v62 = vpop.f32.mrf.mxu1 }
 0x1e8   : > { %v3323_v63 = vpop.f32.mrf.mxu1 }
 0x1f0   : > { %v3325_v3 = vpop.f32.mrf.mxu1 }
 0x1f1   : > { %659 = vperm.xlu2 %2788, %v3325_v3  }
 0x1f8   : > { %v3328_v5 = vpop.f32.mrf.mxu1 }
 0x1f9   : > { %664 = vperm.xlu1 %2787, %v3328_v5  }
 0x200   : > { %v3331_v8 = vpop.f32.mrf.mxu1 }
 0x201   : > { %649 = vperm.xlu1 %2787, %v3321_v62   ;;  %669 = vperm.xlu0 %2786, %v3331_v8  }
 0x208   : > { %v3335_v15 = vpop.f32.mrf.mxu1 }
 0x209   : > { %639 = vperm.xlu1 %2787, %v3317_v60   ;;  %674 = vperm.xlu2 %2788, %v3335_v15  }
 0x211   : > { %654 = vperm.xlu2 %2788, %v3323_v63  }
 0x219   : > { %644 = vperm.xlu2 %2788, %v3319_v61  }
 0x24b   : > { %v660_v16 = vpop.permute.xlu2 %659 }
 0x263   : > { %v675_v17 = vpop.permute.xlu2 %674 }
 0x264   : > { %v691_v22 = vsub.f32 %v3164_v0, %v675_v17  ;;  %v692_v23 = vsub.f32 %v3167_v1, %v675_v17 }
 0x266   : > { %v707_v24 = vmul.f32 %v691_v22, %v691_v22  ;;  %v708_v25 = vmul.f32 %v692_v23, %v692_v23  ;;  %v685_v23 = vsub.f32 %v3194_v11, %v660_v16 }
 0x268   : > { %v730_v26 = vadd.f32 %v708_v25, %v707_v24  ;;  %v686_v24 = vsub.f32 %v3197_v12, %v660_v16 }
 0x26a   : > { %731 = vadd.xlane.f32.xlu0 %v730_v26 }
 0x26b   : > { %v665_v27 = vpop.permute.xlu1 %664  ;;  %v655_v28 = vpop.permute.xlu2 %654 }
 0x26c   : > { %v687_v29 = vsub.f32 %v3170_v2, %v665_v27  ;;  %v688_v30 = vsub.f32 %v3175_v4, %v665_v27  ;;  %v683_v31 = vsub.f32 %v3180_v6, %v655_v28  ;;  %v684_v36 = vsub.f32 %v3183_v7, %v655_v28 }
 0x26d   : > { %v701_v28 = vmul.f32 %v685_v23, %v685_v23 }
 0x26e   : > { %v703_v37 = vmul.f32 %v687_v29, %v687_v29  ;;  %v704_v38 = vmul.f32 %v688_v30, %v688_v30  ;;  %v699_v39 = vmul.f32 %v683_v31, %v683_v31  ;;  %v700_v40 = vmul.f32 %v684_v36, %v684_v36 }
 0x26f   : > { %v702_v29 = vmul.f32 %v686_v24, %v686_v24 }
 0x270   : > { %v724_v41 = vadd.f32 %v704_v38, %v703_v37  ;;  %v718_v42 = vadd.f32 %v700_v40, %v699_v39 }
 0x272   : > { %725 = vadd.xlane.f32.xlu1 %v724_v41  ;;  %719 = vadd.xlane.f32.xlu0 %v718_v42  ;;  %v721_v41 = vadd.f32 %v702_v29, %v701_v28 }
 0x273   : > { %v650_v43 = vpop.permute.xlu1 %649  ;;  %v670_v44 = vpop.permute.xlu0 %669 }
 0x274   : > { %v681_v46 = vsub.f32 %v3200_v13, %v650_v43  ;;  %v682_v47 = vsub.f32 %v3203_v14, %v650_v43  ;;  %v689_v48 = vsub.f32 %v3188_v9, %v670_v44  ;;  %v690_v49 = vsub.f32 %v3191_v10, %v670_v44  ;;  %v645_v36 = vpop.permute.xlu2 %644 }
 0x275   : > { %v679_v39 = vsub.f32 %v3212_v18, %v645_v36  ;;  %v680_v40 = vsub.f32 %v3215_v19, %v645_v36 }
 0x276   : > { %v697_v50 = vmul.f32 %v681_v46, %v681_v46  ;;  %v698_v59 = vmul.f32 %v682_v47, %v682_v47  ;;  %v705_v17 = vmul.f32 %v689_v48, %v689_v48  ;;  %v706_v22 = vmul.f32 %v690_v49, %v690_v49 }
 0x277   : > { %v695_v42 = vmul.f32 %v679_v39, %v679_v39  ;;  %v696_v43 = vmul.f32 %v680_v40, %v680_v40 }
 0x278   : > { %v715_v25 = vadd.f32 %v698_v59, %v697_v50  ;;  %v727_v26 = vadd.f32 %v706_v22, %v705_v17 }
 0x279   : > { %v712_v44 = vadd.f32 %v696_v43, %v695_v42 }
 0x27a   : > { %716 = vadd.xlane.f32.xlu1 %v715_v25  ;;  %728 = vadd.xlane.f32.xlu2 %v727_v26 }
 0x27b   : > { %v640_v27 = vpop.permute.xlu1 %639 }
 0x27c   : > { %v677_v30 = vsub.f32 %v3218_v20, %v640_v27  ;;  %v678_v31 = vsub.f32 %v3221_v21, %v640_v27 }
 0x27e   : > { %v693_v37 = vmul.f32 %v677_v30, %v677_v30  ;;  %v694_v38 = vmul.f32 %v678_v31, %v678_v31 }
 0x280   : > { %v709_v16 = vadd.f32 %v694_v38, %v693_v37  ;;  %v897_v38 = vld [vmem:[%s3972_s1 + $0x10] sm:$0xff] }
 0x282   : > { %722 = vadd.xlane.f32.xlu2 %v721_v41  ;;  %710 = vadd.xlane.f32.xlu0 %v709_v16 }
 0x28a   : > { %713 = vadd.xlane.f32.xlu2 %v712_v44 }
 0x2dd   : > { %v732_v46 = vpop.xlane.xlu0 %731 }
 0x2de   : > { %749 = vmatpush.msra.mxu2 %v732_v46 }
 0x2e5   : > { %v726_v48 = vpop.xlane.xlu1 %725  ;;  %v720_v50 = vpop.xlane.xlu0 %719 }
 0x2ed   : > { %v729_v47 = vpop.xlane.xlu2 %728  ;;  %v717_v59 = vpop.xlane.xlu1 %716 }
 0x2ee   : > { %750 = vmatpush.msra.mxu2 %v729_v47 }
 0x2f0   : > { %751 = vmatpush.msra.mxu2 %v726_v48 }
 0x2f5   : > { %v723_v49 = vpop.xlane.xlu2 %722  ;;  %v711_v22 = vpop.xlane.xlu0 %710 }
 0x2f6   : > { %752 = vmatpush.msra.mxu2 %v723_v49  ;;  %v898_v49 = vld [vmem:[%s3972_s1 + $0x18] sm:$0xff] }
 0x2f8   : > { %753 = vmatpush.msra.mxu2 %v720_v50 }
 0x2fa   : > { %754 = vmatpush.msra.mxu2 %v717_v59 }
 0x2fd   : > { %v714_v17 = vpop.xlane.xlu2 %713 }
 0x2fe   : > { %755 = vmatpush.msra.mxu2 %v714_v17 }
 0x300   : > { %756 = vmatpush.msra.mxu2 %v711_v22 }
 0x301   : > { %2448 = vmatmul.msk.f32.vlgmr.msra.gmra.mxu2 %vm510_vm0, %v3230_v32 }
 0x309   : > { %2449 = vmatmul.msk.f32.gmra.mxu2 %vm510_vm0, %v3237_v33 }
 0x311   : > { %2450 = vmatmul.msk.f32.gmra.mxu2 %vm510_vm0, %v3244_v34 }
 0x319   : > { %2451 = vmatmul.msk.f32.gmra.mxu2 %vm510_vm0, %v3251_v35 }
 0x384   : > { %v758_v23 = vpop.f32.mrf.mxu2 }
 0x385   : > { %v770_v33 = vmul.f32 %v758_v23, %v3255_v45 }
 0x38c   : > { %v761_v24 = vpop.f32.mrf.mxu2 }
 0x38d   : > { %v771_v32 = vmul.f32 %v761_v24, %v3255_v45 }
 0x394   : > { %v764_v25 = vpop.f32.mrf.mxu2 }
 0x395   : > { %v772_v28 = vmul.f32 %v764_v25, %v3255_v45 }
 0x39c   : > { %v767_v26 = vpop.f32.mrf.mxu2 }
 0x39d   : > { %v773_v27 = vmul.f32 %v767_v26, %v3255_v45 }
 0x39f   : > { %786 = vmatpush.msra.mxu3 %v773_v27 }
 0x3a1   : > { %787 = vmatpush.msra.mxu3 %v772_v28 }
 0x3a3   : > { %788 = vmatpush.msra.mxu3 %v771_v32 }
 0x3a5   : > { %789 = vmatpush.msra.mxu3 %v770_v33  ;;  %v899_v33 = vld [vmem:[%s3972_s1 + $0x20] sm:$0xff] }
 0x3a6   : > { %2452 = vmatmul.msk.f32.vlgmr.msra.gmra.mxu3 %vm571_vm2, %v3264_v51 }
 0x3ae   : > { %2453 = vmatmul.msk.f32.gmra.mxu3 %vm571_vm2, %v3271_v52 }
 0x3b6   : > { %2454 = vmatmul.msk.f32.gmra.mxu3 %vm571_vm2, %v3278_v53 }
 0x3be   : > { %2455 = vmatmul.msk.f32.gmra.mxu3 %vm571_vm2, %v3285_v54 }
 0x3c6   : > { %2456 = vmatmul.msk.f32.gmra.mxu3 %vm571_vm2, %v3292_v55 }
 0x3ce   : > { %2457 = vmatmul.msk.f32.gmra.mxu3 %vm571_vm2, %v3299_v56 }
 0x3d6   : > { %2458 = vmatmul.msk.f32.gmra.mxu3 %vm571_vm2, %v3306_v57 }
 0x3de   : > { %2459 = vmatmul.msk.f32.gmra.mxu3 %vm571_vm2, %v3313_v58 }
 0x429   : > { %v791_v34 = vpop.f32.mrf.mxu3 }
 0x42a   : > { %v3397_v23 = vadd.f32 1e-05, %v791_v34 }
 0x431   : > { %v794_v35 = vpop.f32.mrf.mxu3 }
 0x432   : > { %v3403_v34 = vadd.f32 1e-05, %v794_v35 }
 0x439   : > { %v797_v45 = vpop.f32.mrf.mxu3 }
 0x43a   : > { %v798_v51 = vadd.f32 1e-05, %v797_v45 }
 0x43c   : > { %2791 = vrsqrt.f32 %v798_v51  ;;  %vm841_vm4 = vweird.f32 %v798_v51 }
 0x441   : > { %v800_v52 = vpop.f32.mrf.mxu3 }
 0x442   : > { %v2792_v53 = vpop.eup %2791  ;;  %v801_v54 = vadd.f32 1e-05, %v800_v52 }
 0x443   : > { %v836_v29 = vmul.f32 %v2792_v53, %v798_v51  ;;  %vm842_vm3 = vweird.f32 %v2792_v53 }
 0x444   : > { %2793 = vrsqrt.f32 %v801_v54  ;;  %vm843_vm5 = vmor %vm841_vm4, %vm842_vm3  ;;  %vm851_vm7 = vweird.f32 %v801_v54 }
 0x445   : > { %v837_v55 = vmul.f32 %v2792_v53, %v836_v29 }
 0x447   : > { %v838_v30 = vmul.f32 0.5, %v837_v55 }
 0x449   : > { %v839_v31 = vsub.f32 1.5, %v838_v30  ;;  %v803_v56 = vpop.f32.mrf.mxu3 }
 0x44a   : > { %v2794_v36 = vpop.eup %2793  ;;  %v804_v57 = vadd.f32 1e-05, %v803_v56 }
 0x44b   : > { %v846_v37 = vmul.f32 %v2794_v36, %v801_v54  ;;  %v840_v58 = vmul.f32 %v2792_v53, %v839_v31  ;;  %vm852_vm6 = vweird.f32 %v2794_v36  ;;  %v915_v54 = vld [vmem:[%s3973_s2 + $0x20] sm:$0xff] }
 0x44c   : > { %2795 = vrsqrt.f32 %v804_v57  ;;  %vm853_vm8 = vmor %vm851_vm7, %vm852_vm6  ;;  %vm861_vm10 = vweird.f32 %v804_v57  ;;  %vm821_vm7 = vweird.f32 %v3397_v23 }
 0x44d   : > { %v847_v39 = vmul.f32 %v2794_v36, %v846_v37  ;;  %v844_v40 = vsel %vm843_vm5, %v2792_v53, %v840_v58  ;;  %v900_v58 = vld [vmem:[%s3972_s1 + $0x28] sm:$0xff] }
 0x44e   : > { %v3388_v41 = vmul.f32 %v897_v38, %v844_v40 }
 0x44f   : > { %v848_v16 = vmul.f32 0.5, %v847_v39 }
 0x450   : > { %947 = vperm.xlu2 %2788, %v3388_v41  }
 0x451   : > { %v849_v42 = vsub.f32 1.5, %v848_v16  ;;  %v806_v43 = vpop.f32.mrf.mxu3 }
 0x452   : > { %v2796_v44 = vpop.eup %2795  ;;  %v807_v46 = vadd.f32 1e-05, %v806_v43 }
 0x453   : > { %v856_v47 = vmul.f32 %v2796_v44, %v804_v57  ;;  %v850_v48 = vmul.f32 %v2794_v36, %v849_v42  ;;  %vm862_vm9 = vweird.f32 %v2796_v44  ;;  %v916_v42 = vld [vmem:[%s3973_s2 + $0x28] sm:$0xff] }
 0x454   : > { %2797 = vrsqrt.f32 %v807_v46  ;;  %vm863_vm11 = vmor %vm861_vm10, %vm862_vm9  ;;  %vm871_vm13 = vweird.f32 %v807_v46  ;;  %vm831_vm10 = vweird.f32 %v3403_v34 }
 0x455   : > { %v857_v50 = vmul.f32 %v2796_v44, %v856_v47  ;;  %v854_v59 = vsel %vm853_vm8, %v2794_v36, %v850_v48 }
 0x456   : > { %v3394_v17 = vmul.f32 %v898_v49, %v854_v59 }
 0x457   : > { %v858_v22 = vmul.f32 0.5, %v857_v50 }
 0x458   : > { %952 = vperm.xlu1 %2787, %v3394_v17  }
 0x459   : > { %v859_v24 = vsub.f32 1.5, %v858_v22  ;;  %v809_v25 = vpop.f32.mrf.mxu3 }
 0x45a   : > { %v2798_v26 = vpop.eup %2797  ;;  %v810_v27 = vadd.f32 1e-05, %v809_v25 }
 0x45b   : > { %v866_v28 = vmul.f32 %v2798_v26, %v807_v46  ;;  %v860_v32 = vmul.f32 %v2796_v44, %v859_v24  ;;  %vm872_vm12 = vweird.f32 %v2798_v26  ;;  %v901_v24 = vld [vmem:[%s3972_s1 + $0x30] sm:$0xff] }
 0x45c   : > { %2799 = vrsqrt.f32 %v810_v27  ;;  %vm873_vm14 = vmor %vm871_vm13, %vm872_vm12  ;;  %vm881_vm1 = vweird.f32 %v810_v27 }
 0x45d   : > { %2801 = vrsqrt.f32 %v3397_v23  ;;  %v867_v45 = vmul.f32 %v2798_v26, %v866_v28  ;;  %v864_v51 = vsel %vm863_vm11, %v2796_v44, %v860_v32 }
 0x45e   : > { %v907_v52 = vmul.f32 %v899_v33, %v864_v51  ;;  %2803 = vrsqrt.f32 %v3403_v34 }
 0x45f   : > { %v868_v53 = vmul.f32 0.5, %v867_v45  ;;  %v917_v45 = vld [vmem:[%s3973_s2 + $0x30] sm:$0xff] }
 0x460   : > { %957 = vperm.xlu0 %2786, %v907_v52   ;;  %v923_v29 = vmul.f32 %v907_v52, %v3325_v3 }
 0x461   : > { %v869_v55 = vsub.f32 1.5, %v868_v53  ;;  %v812_v30 = vpop.f32.mrf.mxu3 }
 0x462   : > { %v2800_v31 = vpop.eup %2799  ;;  %v813_v56 = vadd.f32 1e-05, %v812_v30  ;;  %v931_v36 = vsub.f32 %v915_v54, %v923_v29 }
 0x463   : > { %v3410_v57 = vpop.eup %2801  ;;  %v876_v35 = vmul.f32 %v2800_v31, %v810_v27  ;;  %v870_v37 = vmul.f32 %v2798_v26, %v869_v55  ;;  %vm882_vm15 = vweird.f32 %v2800_v31  ;;  %v902_v55 = vld [vmem:[%s3972_s1 + $0x38] sm:$0xff] }
 0x464   : > { %2805 = vrsqrt.f32 %v813_v56  ;;  %1013 = vperm.xlu1 %2787, %v931_v36   ;;  %v816_v39 = vmul.f32 %v3410_v57, %v3397_v23  ;;  %v3420_v43 = vpop.eup %2803  ;;  %vm883_vm2 = vmor %vm881_vm1, %vm882_vm15  ;;  %vm891_vm4 = vweird.f32 %v813_v56  ;;  %v921_v36 = vmul.f32 %v3388_v41, %v3321_v62 }
 0x465   : > { %v877_v3 = vmul.f32 %v2800_v31, %v876_v35  ;;  %v874_v38 = vsel %vm873_vm14, %v2798_v26, %v870_v37  ;;  %v826_v50 = vmul.f32 %v3420_v43, %v3403_v34  ;;  %vm822_vm6 = vweird.f32 %v3410_v57  ;;  %v918_v35 = vld [vmem:[%s3973_s2 + $0x38] sm:$0xff] }
 0x466   : > { %v908_v40 = vmul.f32 %v900_v58, %v874_v38  ;;  %v817_v48 = vmul.f32 %v3410_v57, %v816_v39  ;;  %vm823_vm8 = vmor %vm821_vm7, %vm822_vm6  ;;  %vm832_vm9 = vweird.f32 %v3420_v43  ;;  %v914_v38 = vld [vmem:[%s3973_s2 + $0x18] sm:$0xff] }
 0x467   : > { %v878_v16 = vmul.f32 0.5, %v877_v3  ;;  %v827_v32 = vmul.f32 %v3420_v43, %v826_v50  ;;  %v922_v3 = vmul.f32 %v3394_v17, %v3323_v63  ;;  %vm833_vm11 = vmor %vm831_vm10, %vm832_vm9  ;;  %v1075_v50 = vld [vmem:[%s3943_s10 + $0x20] sm:$0xff] }
 0x468   : > { %962 = vperm.xlu2 %2788, %v908_v40   ;;  %v924_v44 = vmul.f32 %v908_v40, %v3328_v5  ;;  %v818_v28 = vmul.f32 0.5, %v817_v48 }
 0x469   : > { %v879_v46 = vsub.f32 1.5, %v878_v16  ;;  %v828_v54 = vmul.f32 0.5, %v827_v32  ;;  %v930_v63 = vsub.f32 %v914_v38, %v922_v3  ;;  %v896_v16 = vld [vmem:[%s3972_s1 + $0x8] sm:$0xff]  ;;  %v1276_v32 = vld [vmem:[%s3944_s11 + $0x18] sm:$0xff] }
 0x46a   : > { %v2806_v47 = vpop.eup %2805  ;;  %v932_v49 = vsub.f32 %v916_v42, %v924_v44  ;;  %v819_v53 = vsub.f32 1.5, %v818_v28  ;;  %v911_v44 = vld [vmem:[%s3973_s2] sm:$0xff] }
 0x46b   : > { %v886_v59 = vmul.f32 %v2806_v47, %v813_v56  ;;  %v880_v22 = vmul.f32 %v2800_v31, %v879_v46  ;;  %vm892_vm3 = vweird.f32 %v2806_v47  ;;  %v913_v56 = vld [vmem:[%s3973_s2 + $0x10] sm:$0xff]  ;;  %v1277_v28 = vld [vmem:[%s3944_s11 + $0x20] sm:$0xff] }
 0x46c   : > { %1018 = vperm.xlu0 %2786, %v932_v49   ;;  %vm893_vm5 = vmor %vm891_vm4, %vm892_vm3  ;;  %v820_v37 = vmul.f32 %v3410_v57, %v819_v53  ;;  %v929_v41 = vsub.f32 %v913_v56, %v921_v36  ;;  %v1073_v49 = vld [vmem:[%s3943_s10 + $0x10] sm:$0xff] }
 0x46d   : > { %v887_v25 = vmul.f32 %v2806_v47, %v886_v59  ;;  %v884_v5 = vsel %vm883_vm2, %v2800_v31, %v880_v22  ;;  %v1077_v59 = vld [vmem:[%s3943_s10 + $0x30] sm:$0xff]  ;;  %v1076_v22 = vld [vmem:[%s3943_s10 + $0x28] sm:$0xff] }
 0x46e   : > { %v909_v26 = vmul.f32 %v901_v24, %v884_v5  ;;  %v824_v40 = vsel %vm823_vm8, %v3410_v57, %v820_v37  ;;  %v1078_v24 = vld [vmem:[%s3943_s10 + $0x38] sm:$0xff]  ;;  %v1273_v5 = vld [vmem:[%s3944_s11] sm:$0xff] }
 0x46f   : > { %v888_v33 = vmul.f32 0.5, %v887_v25  ;;  %v1274_v25 = vld [vmem:[%s3944_s11 + $0x8] sm:$0xff] }
 0x470   : > { %967 = vperm.xlu1 %2787, %v909_v26   ;;  %v925_v27 = vmul.f32 %v909_v26, %v3331_v8  ;;  %v829_v8 = vsub.f32 1.5, %v828_v54  ;;  %v1275_v26 = vld [vmem:[%s3944_s11 + $0x10] sm:$0xff] }
 0x471   : > { %v889_v51 = vsub.f32 1.5, %v888_v33  ;;  %v1278_v33 = vld [vmem:[%s3944_s11 + $0x28] sm:$0xff] }
 0x472   : > { %v933_v52 = vsub.f32 %v917_v45, %v925_v27  ;;  %v830_v39 = vmul.f32 %v3420_v43, %v829_v8  ;;  %v1280_v45 = vld [vmem:[%s3944_s11 + $0x38] sm:$0xff]  ;;  %v1279_v27 = vld [vmem:[%s3944_s11 + $0x30] sm:$0xff] }
 0x473   : > { %v890_v29 = vmul.f32 %v2806_v47, %v889_v51 }
 0x474   : > { %1023 = vperm.xlu0 %2786, %v933_v52   ;;  %v834_v23 = vsel %vm833_vm11, %v3420_v43, %v830_v39  ;;  %v912_v43 = vld [vmem:[%s3973_s2 + $0x8] sm:$0xff] }
 0x475   : > { %v894_v30 = vsel %vm893_vm5, %v2806_v47, %v890_v29  ;;  %v904_v42 = vmul.f32 %v896_v16, %v834_v23  ;;  %v1071_v47 = vld [vmem:[%s3943_s10] sm:$0xff] }
 0x476   : > { %v910_v31 = vmul.f32 %v902_v55, %v894_v30 }
 0x477   : > { %v920_v46 = vmul.f32 %v904_v42, %v3319_v61  ;;  %v1074_v61 = vld [vmem:[%s3943_s10 + $0x18] sm:$0xff] }
 0x478   : > { %972 = vperm.xlu2 %2788, %v910_v31   ;;  %v926_v58 = vmul.f32 %v910_v31, %v3335_v15  ;;  %v895_v15 = vld [vmem:[%s3972_s1] sm:$0xff] }
 0x479   : > { %v903_v17 = vmul.f32 %v895_v15, %v824_v40  ;;  %v928_v48 = vsub.f32 %v912_v43, %v920_v46 }
 0x47a   : > { %v934_v62 = vsub.f32 %v918_v35, %v926_v58 }
 0x47b   : > { %v919_v57 = vmul.f32 %v903_v17, %v3317_v60  ;;  %v1072_v60 = vld [vmem:[%s3943_s10 + $0x8] sm:$0xff] }
 0x47c   : > { %1028 = vperm.xlu1 %2787, %v934_v62   ;;  %1003 = vperm.xlu0 %2786, %v929_v41  }
 0x47d   : > { %v927_v34 = vsub.f32 %v911_v44, %v919_v57 }
 0x480   : > { %1008 = vperm.xlu2 %2788, %v930_v63  }
 0x484   : > { %942 = vperm.xlu0 %2786, %v904_v42   ;;  %937 = vperm.xlu1 %2787, %v903_v17  }
 0x488   : > { %993 = vperm.xlu2 %2788, %v927_v34  }
 0x48c   : > { %1081 = vperm.xlu0 %2786, %v1071_v47   ;;  %998 = vperm.xlu1 %2787, %v928_v48  }
 0x490   : > { %1086 = vperm.xlu2 %2788, %v1072_v60  }
 0x494   : > { %1096 = vperm.xlu0 %2786, %v1074_v61   ;;  %1091 = vperm.xlu1 %2787, %v1073_v49  }
 0x498   : > { %1101 = vperm.xlu2 %2788, %v1075_v50  }
 0x49c   : > { %1111 = vperm.xlu0 %2786, %v1077_v59   ;;  %1106 = vperm.xlu1 %2787, %v1076_v22  }
 0x4a0   : > { %1116 = vperm.xlu2 %2788, %v1078_v24  }
 0x4a4   : > { %1288 = vperm.xlu0 %2786, %v1274_v25   ;;  %1283 = vperm.xlu1 %2787, %v1273_v5  }
 0x4a8   : > { %1293 = vperm.xlu2 %2788, %v1275_v26  }
 0x4aa   : > { %v948_v51 = vpop.permute.xlu2 %947 }
 0x4ab   : > { %v980_v42 = vmul.f32 %v948_v51, %v3203_v14 }
 0x4ac   : > { %1303 = vperm.xlu0 %2786, %v1277_v28   ;;  %1298 = vperm.xlu1 %2787, %v1276_v32  }
 0x4b0   : > { %1308 = vperm.xlu2 %2788, %v1278_v33  }
 0x4b4   : > { %1318 = vperm.xlu0 %2786, %v1280_v45   ;;  %1313 = vperm.xlu1 %2787, %v1279_v27  }
 0x4c2   : > { %v963_v52 = vpop.permute.xlu2 %962 }
 0x4c3   : > { %v985_v3 = vmul.f32 %v963_v52, %v3170_v2  ;;  %v986_v38 = vmul.f32 %v963_v52, %v3175_v4  ;;  %v979_v4 = vmul.f32 %v948_v51, %v3200_v13 }
 0x4ca   : > { %v953_v53 = vpop.permute.xlu1 %952 }
 0x4cb   : > { %v981_v35 = vmul.f32 %v953_v53, %v3180_v6  ;;  %v982_v56 = vmul.f32 %v953_v53, %v3183_v7 }
 0x4d2   : > { %v958_v54 = vpop.permute.xlu0 %957  ;;  %v973_v29 = vpop.permute.xlu2 %972 }
 0x4d3   : > { %v983_v55 = vmul.f32 %v958_v54, %v3194_v11  ;;  %v984_v30 = vmul.f32 %v958_v54, %v3197_v12  ;;  %v989_v57 = vmul.f32 %v973_v29, %v3164_v0  ;;  %v990_v44 = vmul.f32 %v973_v29, %v3167_v1 }
 0x4d6   : > { %v1014_v31 = vpop.permute.xlu1 %1013 }
 0x4d7   : > { %v1039_v36 = vadd.f32 %v1014_v31, %v983_v55  ;;  %v1040_v8 = vadd.f32 %v1014_v31, %v984_v30 }
 0x4d9   : > { %v1051_v37 = vpack.c.bf16 %v1040_v8, %v1039_v36 }
 0x4da   : > { %v1009_v58 = vpop.permute.xlu2 %1008 }
 0x4db   : > { %1059 = vst [vmem:[#allocation2 + $0x20] sm:$0xff] %v1051_v37  ;;  %v1037_v62 = vadd.f32 %v1009_v58, %v981_v35  ;;  %v1038_v41 = vadd.f32 %v1009_v58, %v982_v56  ;;  %v1155_v5 = vunpack.c.l.b16 %v1051_v37  ;;  %v1156_v28 = vunpack.c.h.b16 %v1051_v37 }
 0x4dd   : > { %v3527_v39 = vpack.c.bf16 %v1038_v41, %v1037_v62 }
 0x4de   : > { %v1019_v11 = vpop.permute.xlu0 %1018 }
 0x4df   : > { %1058 = vst [vmem:[#allocation2 + $0x18] sm:$0xff] %v3527_v39  ;;  %v1041_v12 = vadd.f32 %v1019_v11, %v985_v3  ;;  %v1042_v40 = vadd.f32 %v1019_v11, %v986_v38  ;;  %v2661_v38 = vld [vmem:[%s3940_s7] sm:$0xff]  ;;  %v2662_v11 = vld [vmem:[%s3940_s7 + $0x8] sm:$0xff] }
 0x4e1   : > { %v1052_v15 = vpack.c.bf16 %v1042_v40, %v1041_v12  ;;  %v2659_v12 = vld [vmem:[%s3939_s6 + $0x10] sm:$0xff] }
 0x4e2   : > { %v968_v6 = vpop.permute.xlu1 %967  ;;  %v994_v26 = vpop.permute.xlu2 %993  ;;  %v2663_v40 = vld [vmem:[%s3940_s7 + $0x10] sm:$0xff] }
 0x4e3   : > { %1060 = vst [vmem:[#allocation2 + $0x28] sm:$0xff] %v1052_v15  ;;  %v987_v7 = vmul.f32 %v968_v6, %v3188_v9  ;;  %v988_v63 = vmul.f32 %v968_v6, %v3191_v10  ;;  %v1157_v22 = vunpack.c.l.b16 %v1052_v15  ;;  %v1158_v24 = vunpack.c.h.b16 %v1052_v15  ;;  %v2660_v15 = vld [vmem:[%s3939_s6 + $0x18] sm:$0xff] }
 0x4e4   : > { %v2664_v6 = vld [vmem:[%s3940_s7 + $0x18] sm:$0xff] }
 0x4e5   : > { %v1167_v45 = vpack.c.b16 %v1157_v22, %v1155_v5  ;;  %v1168_v52 = vpack.c.b16 %v1158_v24, %v1156_v28 }
 0x4e6   : > { %v1024_v17 = vpop.permute.xlu0 %1023 }
 0x4e7   : > { %v1043_v23 = vadd.f32 %v1024_v17, %v987_v7  ;;  %v1044_v16 = vadd.f32 %v1024_v17, %v988_v63 }
 0x4e9   : > { %v1053_v2 = vpack.c.bf16 %v1044_v16, %v1043_v23 }
 0x4ea   : > { %v1087_v17 = vpop.permute.xlu2 %1086 }
 0x4eb   : > { %1061 = vst [vmem:[#allocation2 + $0x30] sm:$0xff] %v1053_v2  ;;  %v1159_v61 = vunpack.c.l.b16 %v1053_v2  ;;  %v1160_v50 = vunpack.c.h.b16 %v1053_v2 }
 0x4ee   : > { %v1029_v34 = vpop.permute.xlu1 %1028  ;;  %v1004_v46 = vpop.permute.xlu0 %1003 }
 0x4ef   : > { %v1045_v43 = vadd.f32 %v1029_v34, %v989_v57  ;;  %v1046_v47 = vadd.f32 %v1029_v34, %v990_v44  ;;  %v1035_v9 = vadd.f32 %v1004_v46, %v979_v4  ;;  %v1036_v48 = vadd.f32 %v1004_v46, %v980_v42 }
 0x4f1   : > { %v1054_v10 = vpack.c.bf16 %v1046_v47, %v1045_v43  ;;  %v1049_v60 = vpack.c.bf16 %v1036_v48, %v1035_v9 }
 0x4f2   : > { %v1102_v42 = vpop.permute.xlu2 %1101 }
 0x4f3   : > { %1062 = vst [vmem:[#allocation2 + $0x38] sm:$0xff] %v1054_v10  ;;  %v1161_v49 = vunpack.c.l.b16 %v1054_v10  ;;  %v1162_v59 = vunpack.c.h.b16 %v1054_v10  ;;  %v1151_v27 = vunpack.c.l.b16 %v1049_v60  ;;  %v1152_v53 = vunpack.c.h.b16 %v1049_v60 }
 0x4f4   : > { %1057 = vst [vmem:[#allocation2 + $0x10] sm:$0xff] %v1049_v60 }
 0x4f5   : > { %v1169_v13 = vpack.c.b16 %v1161_v49, %v1159_v61  ;;  %v1170_v14 = vpack.c.b16 %v1162_v59, %v1160_v50 }
 0x4f6   : > { %v938_v0 = vpop.permute.xlu1 %937  ;;  %v943_v51 = vpop.permute.xlu0 %942 }
 0x4f7   : > { %v975_v1 = vmul.f32 %v938_v0, %v3218_v20  ;;  %v976_v25 = vmul.f32 %v938_v0, %v3221_v21  ;;  %1195 = vmatpush.bf16.msrb.mxu0 %v1169_v13  ;;  %1224 = vmatpush.bf16.msrb.mxu2 %v1170_v14  ;;  %v1153_v20 = vunpack.c.l.b16 %v3527_v39  ;;  %v1154_v21 = vunpack.c.h.b16 %v3527_v39  ;;  %v2658_v39 = vld [vmem:[%s3939_s6 + $0x8] sm:$0xff] }
 0x4f8   : > { %1357 = vmatpush.bf16.msrb.mxu1 %v1169_v13  ;;  %1386 = vmatpush.bf16.msrb.mxu3 %v1170_v14  ;;  %v977_v29 = vmul.f32 %v943_v51, %v3212_v18  ;;  %v978_v55 = vmul.f32 %v943_v51, %v3215_v19  ;;  %v2657_v19 = vld [vmem:[%s3939_s6] sm:$0xff] }
 0x4f9   : > { %v1031_v32 = vadd.f32 %v994_v26, %v975_v1  ;;  %v1032_v33 = vadd.f32 %v994_v26, %v976_v25  ;;  %v1165_v30 = vpack.c.b16 %v1153_v20, %v1151_v27  ;;  %v1166_v36 = vpack.c.b16 %v1154_v21, %v1152_v53 }
 0x4fa   : > { %v3586_v50 = vpop.permute.xlu2 %1116 }
 0x4fb   : > { %v1047_v54 = vpack.c.bf16 %v1032_v33, %v1031_v32  ;;  %1196 = vmatpush.bf16.msrb.mxu0 %v1167_v45  ;;  %1225 = vmatpush.bf16.msrb.mxu2 %v1168_v52 }
 0x4fc   : > { %1358 = vmatpush.bf16.msrb.mxu1 %v1167_v45  ;;  %1387 = vmatpush.bf16.msrb.mxu3 %v1168_v52 }
 0x4fd   : > { %1055 = vst [vmem:[#allocation2] sm:$0xff] %v1047_v54  ;;  %v1147_v37 = vunpack.c.l.b16 %v1047_v54  ;;  %v1148_v62 = vunpack.c.h.b16 %v1047_v54 }
 0x4fe   : > { %v999_v31 = vpop.permute.xlu1 %998  ;;  %v1082_v7 = vpop.permute.xlu0 %1081 }
 0x4ff   : > { %v1033_v8 = vadd.f32 %v999_v31, %v977_v29  ;;  %v1034_v35 = vadd.f32 %v999_v31, %v978_v55  ;;  %1197 = vmatpush.bf16.msrb.mxu0 %v1165_v30  ;;  %1226 = vmatpush.bf16.msrb.mxu2 %v1166_v36 }
 0x500   : > { %1359 = vmatpush.bf16.msrb.mxu1 %v1165_v30  ;;  %1388 = vmatpush.bf16.msrb.mxu3 %v1166_v36 }
 0x501   : > { %v1048_v56 = vpack.c.bf16 %v1034_v35, %v1033_v8 }
 0x502   : > { %v1294_v33 = vpop.permute.xlu2 %1293 }
 0x503   : > { %1056 = vst [vmem:[#allocation2 + $0x8] sm:$0xff] %v1048_v56  ;;  %v1149_v58 = vunpack.c.l.b16 %v1048_v56  ;;  %v1150_v41 = vunpack.c.h.b16 %v1048_v56 }
 0x505   : > { %v1163_v18 = vpack.c.b16 %v1149_v58, %v1147_v37  ;;  %v1164_v3 = vpack.c.b16 %v1150_v41, %v1148_v62 }
 0x506   : > { %v1092_v63 = vpop.permute.xlu1 %1091  ;;  %v1097_v23 = vpop.permute.xlu0 %1096 }
 0x507   : > { %1198 = vmatpush.bf16.msrb.mxu0 %v1163_v18  ;;  %1227 = vmatpush.bf16.msrb.mxu2 %v1164_v3 }
 0x508   : > { %1360 = vmatpush.bf16.msrb.mxu1 %v1163_v18  ;;  %1389 = vmatpush.bf16.msrb.mxu3 %v1164_v3 }
 0x50a   : > { %2476 = vmatmul.msk.bf16.vlgmr.msrb.gmra.mxu0 %vm510_vm0, %v2657_v19  ;;  %2480 = vmatmul.msk.bf16.vlgmr.msrb.gmra.mxu2 %vm510_vm0, %v2657_v19 }
 0x50b   : > { %2500 = vmatmul.msk.bf16.vlgmr.msrb.gmra.mxu1 %vm510_vm0, %v2661_v38  ;;  %2504 = vmatmul.msk.bf16.vlgmr.msrb.gmra.mxu3 %vm510_vm0, %v2661_v38 }
 0x50e   : > { %v3582_v16 = vpop.permute.xlu1 %1106  ;;  %v3584_v57 = vpop.permute.xlu0 %1111 }
 0x516   : > { %v1284_v34 = vpop.permute.xlu1 %1283  ;;  %v1289_v13 = vpop.permute.xlu0 %1288 }
 0x51a   : > { %2477 = vmatmul.msk.bf16.gmra.mxu0 %vm510_vm0, %v2658_v39  ;;  %2481 = vmatmul.msk.bf16.gmra.mxu2 %vm510_vm0, %v2658_v39 }
 0x51b   : > { %2501 = vmatmul.msk.bf16.gmra.mxu1 %vm510_vm0, %v2662_v11  ;;  %2505 = vmatmul.msk.bf16.gmra.mxu3 %vm510_vm0, %v2662_v11 }
 0x51e   : > { %v1299_v30 = vpop.permute.xlu1 %1298  ;;  %v1304_v3 = vpop.permute.xlu0 %1303 }
 0x52a   : > { %2478 = vmatmul.msk.bf16.gmra.mxu0 %vm510_vm0, %v2659_v12  ;;  %2482 = vmatmul.msk.bf16.gmra.mxu2 %vm510_vm0, %v2659_v12 }
 0x52b   : > { %2502 = vmatmul.msk.bf16.gmra.mxu1 %vm510_vm0, %v2663_v40  ;;  %2506 = vmatmul.msk.bf16.gmra.mxu3 %vm510_vm0, %v2663_v40 }
 0x53a   : > { %2479 = vmatmul.msk.bf16.gmra.mxu0 %vm510_vm0, %v2660_v15  ;;  %2483 = vmatmul.msk.bf16.gmra.mxu2 %vm510_vm0, %v2660_v15 }
 0x53b   : > { %2503 = vmatmul.msk.bf16.gmra.mxu1 %vm510_vm0, %v2664_v6  ;;  %2507 = vmatmul.msk.bf16.gmra.mxu3 %vm510_vm0, %v2664_v6 }
 0x587   : > { %v1200_v2 = vpop.f32.mrf.mxu0 }
 0x588   : > { %v1362_v4 = vpop.f32.mrf.mxu1  ;;  %v1201_v46 = vadd.f32 %v1200_v2, %v1082_v7 }
 0x589   : > { %v1363_v9 = vadd.f32 %v1362_v4, %v1284_v34 }
 0x58d   : > { %v1229_v44 = vpop.f32.mrf.mxu2 }
 0x58e   : > { %v1230_v43 = vadd.f32 %v1229_v44, %v1082_v7  ;;  %v1391_v47 = vpop.f32.mrf.mxu3 }
 0x58f   : > { %v1392_v48 = vadd.f32 %v1391_v47, %v1284_v34  ;;  %v1202_v10 = vpop.f32.mrf.mxu0 }
 0x590   : > { %v1249_v60 = vpack.c.bf16 %v1230_v43, %v1201_v46  ;;  %v1364_v61 = vpop.f32.mrf.mxu1  ;;  %v1203_v14 = vadd.f32 %v1202_v10, %v1087_v17 }
 0x591   : > { %v1411_v49 = vpack.c.bf16 %v1392_v48, %v1363_v9  ;;  %v1365_v24 = vadd.f32 %v1364_v61, %v1289_v13  ;;  %v1314_v48 = vpop.permute.xlu1 %1313 }
 0x592   : > { %1257 = vst [vmem:[#allocation3] sm:$0xff] %v1249_v60 }
 0x593   : > { %1419 = vst [vmem:[#allocation4] sm:$0xff] %v1411_v49 }
 0x595   : > { %v1231_v59 = vpop.f32.mrf.mxu2 }
 0x596   : > { %v1232_v22 = vadd.f32 %v1231_v59, %v1087_v17  ;;  %v1393_v0 = vpop.f32.mrf.mxu3  ;;  %v1309_v17 = vpop.permute.xlu2 %1308 }
 0x597   : > { %v1394_v1 = vadd.f32 %v1393_v0, %v1289_v13  ;;  %v1205_v25 = vpop.f32.mrf.mxu0 }
 0x598   : > { %v1250_v5 = vpack.c.bf16 %v1232_v22, %v1203_v14  ;;  %v1367_v26 = vpop.f32.mrf.mxu1  ;;  %v1206_v45 = vadd.f32 %v1205_v25, %v1092_v63 }
 0x599   : > { %v1412_v28 = vpack.c.bf16 %v1394_v1, %v1365_v24  ;;  %v1368_v52 = vadd.f32 %v1367_v26, %v1294_v33  ;;  %v1319_v24 = vpop.permute.xlu0 %1318 }
 0x59a   : > { %1258 = vst [vmem:[#allocation3 + $0x8] sm:$0xff] %v1250_v5 }
 0x59b   : > { %1420 = vst [vmem:[#allocation4 + $0x8] sm:$0xff] %v1412_v28 }
 0x59d   : > { %v1234_v32 = vpop.f32.mrf.mxu2 }
 0x59e   : > { %v1235_v27 = vadd.f32 %v1234_v32, %v1092_v63  ;;  %v1396_v51 = vpop.f32.mrf.mxu3 }
 0x59f   : > { %v1397_v53 = vadd.f32 %v1396_v51, %v1294_v33  ;;  %v1207_v54 = vpop.f32.mrf.mxu0 }
 0x5a0   : > { %v1251_v20 = vpack.c.bf16 %v1235_v27, %v1206_v45  ;;  %v1369_v21 = vpop.f32.mrf.mxu1  ;;  %v1208_v31 = vadd.f32 %v1207_v54, %v1097_v23 }
 0x5a1   : > { %v1413_v29 = vpack.c.bf16 %v1397_v53, %v1368_v52  ;;  %v1370_v35 = vadd.f32 %v1369_v21, %v1299_v30 }
 0x5a2   : > { %1259 = vst [vmem:[#allocation3 + $0x10] sm:$0xff] %v1251_v20 }
 0x5a3   : > { %1421 = vst [vmem:[#allocation4 + $0x10] sm:$0xff] %v1413_v29 }
 0x5a5   : > { %v1236_v55 = vpop.f32.mrf.mxu2 }
 0x5a6   : > { %v1237_v36 = vadd.f32 %v1236_v55, %v1097_v23  ;;  %v1398_v8 = vpop.f32.mrf.mxu3 }
 0x5a7   : > { %v1399_v56 = vadd.f32 %v1398_v8, %v1299_v30  ;;  %v1210_v37 = vpop.f32.mrf.mxu0 }
 0x5a8   : > { %v1252_v58 = vpack.c.bf16 %v1237_v36, %v1208_v31  ;;  %v1372_v62 = vpop.f32.mrf.mxu1  ;;  %v1211_v19 = vadd.f32 %v1210_v37, %v1102_v42 }
 0x5a9   : > { %v1414_v41 = vpack.c.bf16 %v1399_v56, %v1370_v35  ;;  %v1373_v11 = vadd.f32 %v1372_v62, %v1304_v3 }
 0x5aa   : > { %1260 = vst [vmem:[#allocation3 + $0x18] sm:$0xff] %v1252_v58 }
 0x5ab   : > { %1422 = vst [vmem:[#allocation4 + $0x18] sm:$0xff] %v1414_v41 }
 0x5ad   : > { %v1239_v18 = vpop.f32.mrf.mxu2 }
 0x5ae   : > { %v1240_v38 = vadd.f32 %v1239_v18, %v1102_v42  ;;  %v1401_v39 = vpop.f32.mrf.mxu3 }
 0x5af   : > { %v1402_v12 = vadd.f32 %v1401_v39, %v1304_v3  ;;  %v1212_v40 = vpop.f32.mrf.mxu0 }
 0x5b0   : > { %v1253_v15 = vpack.c.bf16 %v1240_v38, %v1211_v19  ;;  %v1374_v6 = vpop.f32.mrf.mxu1  ;;  %v1213_v23 = vadd.f32 %v1212_v40, %v3582_v16 }
 0x5b1   : > { %v1415_v7 = vpack.c.bf16 %v1402_v12, %v1373_v11  ;;  %v1375_v44 = vadd.f32 %v1374_v6, %v1309_v17 }
 0x5b2   : > { %1261 = vst [vmem:[#allocation3 + $0x20] sm:$0xff] %v1253_v15 }
 0x5b3   : > { %1423 = vst [vmem:[#allocation4 + $0x20] sm:$0xff] %v1415_v7 }
 0x5b5   : > { %v1241_v63 = vpop.f32.mrf.mxu2 }
 0x5b6   : > { %v1242_v2 = vadd.f32 %v1241_v63, %v3582_v16  ;;  %v1403_v4 = vpop.f32.mrf.mxu3 }
 0x5b7   : > { %v1404_v34 = vadd.f32 %v1403_v4, %v1309_v17  ;;  %v1215_v43 = vpop.f32.mrf.mxu0 }
 0x5b8   : > { %v1254_v46 = vpack.c.bf16 %v1242_v2, %v1213_v23  ;;  %v1377_v47 = vpop.f32.mrf.mxu1  ;;  %v1216_v10 = vadd.f32 %v1215_v43, %v3584_v57 }
 0x5b9   : > { %v1416_v42 = vpack.c.bf16 %v1404_v34, %v1375_v44  ;;  %v1378_v49 = vadd.f32 %v1377_v47, %v1314_v48 }
 0x5ba   : > { %1262 = vst [vmem:[#allocation3 + $0x28] sm:$0xff] %v1254_v46 }
 0x5bb   : > { %1424 = vst [vmem:[#allocation4 + $0x28] sm:$0xff] %v1416_v42 }
 0x5bd   : > { %v1244_v9 = vpop.f32.mrf.mxu2 }
 0x5be   : > { %v1245_v60 = vadd.f32 %v1244_v9, %v3584_v57  ;;  %v1406_v61 = vpop.f32.mrf.mxu3 }
 0x5bf   : > { %v1407_v59 = vadd.f32 %v1406_v61, %v1314_v48  ;;  %v1217_v14 = vpop.f32.mrf.mxu0 }
 0x5c0   : > { %v1255_v13 = vpack.c.bf16 %v1245_v60, %v1216_v10  ;;  %v1379_v22 = vpop.f32.mrf.mxu1  ;;  %v1218_v1 = vadd.f32 %v1217_v14, %v3586_v50 }
 0x5c1   : > { %v1417_v16 = vpack.c.bf16 %v1407_v59, %v1378_v49  ;;  %v1380_v26 = vadd.f32 %v1379_v22, %v1319_v24 }
 0x5c2   : > { %1263 = vst [vmem:[#allocation3 + $0x30] sm:$0xff] %v1255_v13 }
 0x5c3   : > { %1425 = vst [vmem:[#allocation4 + $0x30] sm:$0xff] %v1417_v16 }
 0x5c5   : > { %v1246_v0 = vpop.f32.mrf.mxu2 }
 0x5c6   : > { %v1247_v25 = vadd.f32 %v1246_v0, %v3586_v50  ;;  %v1408_v5 = vpop.f32.mrf.mxu3 }
 0x5c7   : > { %v1409_v28 = vadd.f32 %v1408_v5, %v1319_v24 }
 0x5c8   : > { %v1256_v32 = vpack.c.bf16 %v1247_v25, %v1218_v1 }
 0x5c9   : > { %v1418_v57 = vpack.c.bf16 %v1409_v28, %v1380_v26 }
 0x5ca   : > { %1264 = vst [vmem:[#allocation3 + $0x38] sm:$0xff] %v1256_v32 }
 0x5cb   : > { %1426 = vst [vmem:[#allocation4 + $0x38] sm:$0xff] %v1418_v57 }
 0x5cc PF: > { %s2508_s16 = sshll.u32 %s2985_s28, 7  ;;  %v2672_v53 = vld [vmem:[%s3938_s5 + $0x18] sm:$0xff]  ;;  %v2671_v54 = vld [vmem:[%s3938_s5 + $0x10] sm:$0xff]  ;;  %v2670_v20 = vld [vmem:[%s3938_s5 + $0x8] sm:$0xff]  ;;  %vm1516_vm0 = vcmask 523264   ;;  %s2343_s24 = sshll.u32 %s3160_s20, 4  ;;  %s2344_s24 = int_to_ptr.vmem [resolvable:$true] %s2343_s24 }
 0x5cd   : > { %s3595_s25 = sshra.s32 %s2508_s16, 7  ;;  %1545 = vmatpush.bf16.msra.mxu0 %v2672_v53  ;;  %2693 = vmatpush.bf16.msra.mxu2 %v2672_v53  ;;  %v2669_v55 = vld [vmem:[%s3938_s5] sm:$0xff]  ;;  %v2576_v18 = vld [vmem:[#allocation3 + $0x30] sm:$0xf]  ;;  %v2679_v19 = vld [vmem:[#allocation3 + $0x34] sm:$0xf] }
 0x5ce   : > { %s2509_s0 = sshll.u32 %s3595_s25, 2  ;;  %2694 = vmatpush.bf16.msra.mxu3 %v2672_v53  ;;  %v2568_v12 = vld [vmem:[#allocation3 + $0x20] sm:$0xf]  ;;  %v2678_v40 = vld [vmem:[#allocation3 + $0x24] sm:$0xf0]  ;;  %s2927_s21 = scalar_lea.hbm %s3946_s13, 256 }
 0x5cf   : > { %s1431_s30 = scalar_lea.vmem [#allocation2], %s2509_s0  ;;  %v2677_v15 = vld [vmem:[#allocation3 + $0x24] sm:$0xf]  ;;  %v2569_v6 = vor.u32 %v2678_v40, %v2568_v12  ;;  %v2570_v7 = vld [vmem:[#allocation3 + $0x28] sm:$0xf0]  ;;  %s2650_s0 = sshll.u32 %s3595_s25, 3 }
 0x5d0   : > { %v2512_v33 = vld [vmem:[%s1431_s30] sm:$0xf]  ;;  %v2665_v45 = vld [vmem:[%s1431_s30 + $0x4] sm:$0xf0]  ;;  %v2516_v50 = vld [vmem:[%s1431_s30 + $0x10] sm:$0xf]  ;;  %v2573_v63 = vor.u32 %v2677_v15, %v2570_v7 }
 0x5d1   : > { %v2513_v27 = vor.u32 %v2665_v45, %v2512_v33  ;;  %v2666_v51 = vld [vmem:[%s1431_s30 + $0x14] sm:$0xf0]  ;;  %1546 = vmatpush.bf16.msra.mxu0 %v2671_v54  ;;  %2695 = vmatpush.bf16.msra.mxu2 %v2671_v54  ;;  %v2520_v21 = vld [vmem:[%s1431_s30 + $0x20] sm:$0xf]  ;;  %v2667_v29 = vld [vmem:[%s1431_s30 + $0x24] sm:$0xf0] }
 0x5d2   : > { %v2517_v52 = vor.u32 %v2666_v51, %v2516_v50  ;;  %2696 = vmatpush.bf16.msra.mxu3 %v2671_v54  ;;  %v2521_v30 = vor.u32 %v2667_v29, %v2520_v21  ;;  %v2524_v31 = vld [vmem:[%s1431_s30 + $0x30] sm:$0xf]  ;;  %v2668_v36 = vld [vmem:[%s1431_s30 + $0x34] sm:$0xf0]  ;;  %v2578_v39 = vld [vmem:[#allocation3 + $0x38] sm:$0xf0]  ;;  %s3869_s30 = scalar_lea.vmem %s3158_s19, %s2650_s0 }
 0x5d3   : > { %1464 = vxpose.xlu0.c.b16.start [1/4] (short) %v2513_v27, 128  ;;  %v2525_v8 = vor.u32 %v2668_v36, %v2524_v31  ;;  %v2680_v3 = vld [vmem:[#allocation3 + $0x34] sm:$0xf0]  ;;  %v2581_v11 = vor.u32 %v2679_v19, %v2578_v39  ;;  %v2560_v17 = vld [vmem:[#allocation3 + $0x10] sm:$0xf]  ;;  %v2675_v2 = vld [vmem:[#allocation3 + $0x14] sm:$0xf] }
 0x5d4   : > { %v2577_v38 = vor.u32 %v2680_v3, %v2576_v18  ;;  %v2676_v23 = vld [vmem:[#allocation3 + $0x14] sm:$0xf0]  ;;  %v2562_v34 = vld [vmem:[#allocation3 + $0x18] sm:$0xf0]  ;;  %v2552_v42 = vld [vmem:[#allocation3] sm:$0xf] }
 0x5d5   : > { %1547 = vmatpush.bf16.msra.mxu0 %v2670_v20  ;;  %2697 = vmatpush.bf16.msra.mxu2 %v2670_v20  ;;  %v2561_v44 = vor.u32 %v2676_v23, %v2560_v17  ;;  %v2565_v46 = vor.u32 %v2675_v2, %v2562_v34  ;;  %v2674_v43 = vld [vmem:[#allocation3 + $0x4] sm:$0xf0]  ;;  %v2673_v47 = vld [vmem:[#allocation3 + $0x4] sm:$0xf]  ;;  %v2554_v48 = vld [vmem:[#allocation3 + $0x8] sm:$0xf0] }
 0x5d6   : > { %2698 = vmatpush.bf16.msra.mxu3 %v2670_v20  ;;  %1674 = vmatpush.bf16.msra.mxu1 %v2577_v38  ;;  %v2553_v9 = vor.u32 %v2674_v43, %v2552_v42  ;;  %v2557_v10 = vor.u32 %v2673_v47, %v2554_v48  ;;  %v2810_v49 = vld [vmem:[%s3942_s9] ss:$0 sm:$0xff]  ;;  %s2652_s19 = sshll.u32 %s2989_s29, 4 }
 0x5d7   : > { %s2340_s25 = sadd.s32 %s2985_s28, %s2652_s19  ;;  %s3975_s28 = sand.u32 1, %s2977_s26  }
 0x5d8   : > { %s2653_s15 = sshll.u32 %s2340_s25, 3  ;;  %s2330_s29 = scalar_lea.sflag [#allocation6], %s3975_s28 }
 0x5d9   : > { %1548 = vmatpush.bf16.msra.mxu0 %v2669_v55  ;;  %2699 = vmatpush.bf16.msra.mxu2 %v2669_v55  ;;  %s2342_s17 = scalar_lea.hbm %s3946_s13, %s2653_s15 }
 0x5da   : > { %2700 = vmatpush.bf16.msra.mxu3 %v2669_v55  ;;  %1675 = vmatpush.bf16.msra.mxu1 %v2569_v6  ;;  %s2345_s16 = sshll.u32 %s2342_s17, 4  ;;  %s2346_s16 = int_to_ptr.hbm [resolvable:$true] %s2345_s16 }
 0x5db   : > { %s2921_s0 = sshra.s32 %s2346_s16, 4  ;;  %s2922_s0 = int_to_ptr.hbm [resolvable:$true] %s2921_s0 }
 0x5dc   : > { %s2923_s19 = scalar_lea.hbm %s2922_s0, 64  ;;  %p2928_p4 = scmp.lt.s32.totalorder %s2922_s0, %s3946_s13 }
 0x5dd   : > { %1723 = vmatpush.bf16.msrb.mxu2 %v2581_v11  ;;  %p2924_p0 = scmp.ne.s32.totalorder %s2922_s0, %s2923_s19  ;;  %p2929_p5 = scmp.lt.s32.totalorder %s2927_s21, %s2923_s19 }
 0x5de   : > { %1676 = vmatpush.bf16.msra.mxu1 %v2561_v44 }
 0x5df   : > { %p2925_p1 = pnand %p2924_p0, %p3130_p3  ;;  %p2930_p6 = por %p2929_p5, %p2928_p4 }
 0x5e1   : > { %1724 = vmatpush.bf16.msrb.mxu2 %v2573_v63  ;;  %p2926_p2 = pneg %p2925_p1 }
 0x5e2   : > { %1677 = vmatpush.bf16.msra.mxu1 %v2553_v9 }
 0x5e3   : > { %1465 = vxpose.xlu0.c.b16.cont [2/4] (short) %v2517_v52, 128  ;;  %p2931_p7 = pnand %p2930_p6, %p2926_p2 }
 0x5e5   : > { %1725 = vmatpush.bf16.msrb.mxu2 %v2565_v46 }
 0x5e9   : > { %1726 = vmatpush.bf16.msrb.mxu2 %v2557_v10 }
 0x5f3   : > { %1466 = vxpose.xlu0.c.b16.cont [3/4] (short) %v2521_v30, 128 }
 0x603   : > { %1467 = vxpose.xlu0.c.b16.end [4/4] (short) %v2525_v8, 128 }
 0x67f   : > { %v1472_v35 = vpop.trf.xlu0 }
 0x680   : > { %2542 = vmatmul.msk.bf16.vlgmr.msra.gmra.mxu0 %vm1516_vm0, %v1472_v35 }
 0x68f   : > { %v1473_v56 = vpop.trf.xlu0 }
 0x690   : > { %2543 = vmatmul.msk.bf16.gmra.mxu0 %vm1516_vm0, %v1473_v56 }
 0x69f   : > { %v1474_v37 = vpop.trf.xlu0 }
 0x6a0   : > { %2544 = vmatmul.msk.bf16.vlgmr.msra.gmra.mxu2 %vm1516_vm0, %v1474_v37 }
 0x6af   : > { %v1475_v58 = vpop.trf.xlu0 }
 0x6b0   : > { %2545 = vmatmul.msk.bf16.gmra.mxu2 %vm1516_vm0, %v1475_v58 }
 0x6bf   : > { %v1476_v62 = vpop.trf.xlu0 }
 0x6c0   : > { %2546 = vmatmul.msk.bf16.gmra.mxu2 %vm1516_vm0, %v1476_v62 }
 0x6cf   : > { %v1477_v41 = vpop.trf.xlu0 }
 0x6d0   : > { %2547 = vmatmul.msk.bf16.gmra.mxu2 %vm1516_vm0, %v1477_v41 }
 0x6df   : > { %v1478_v4 = vpop.trf.xlu0 }
 0x6e0   : > { %2548 = vmatmul.msk.bf16.vlgmr.msra.gmra.mxu3 %vm1516_vm0, %v1478_v4 }
 0x6ef   : > { %v1479_v60 = vpop.trf.xlu0 }
 0x6f0   : > { %2549 = vmatmul.msk.bf16.gmra.mxu3 %vm1516_vm0, %v1479_v60 }
 0x6fd   : > { %v1550_v61 = vpop.f32.mrf.mxu0 }
 0x6fe   : > { %v1551_v13 = vadd.f32 %v2810_v49, %v1550_v61 }
 0x705   : > { %v1552_v59 = vpop.f32.mrf.mxu0 }
 0x706   : > { %v1553_v16 = vadd.f32 %v2810_v49, %v1552_v59 }
 0x708   : > { %v1590_v14 = vpack.c.bf16 %v1553_v16, %v1551_v13 }
 0x70a   : > { %2582 = vmatmul.msk.bf16.vlgmr.msra.gmra.mxu1 %vm1516_vm0, %v1590_v14  ;;  %2590 = vmatmul.msk.bf16.vlgmr.msrb.gmra.mxu2 %vm1516_vm0, %v1590_v14  ;;  %v2624_v14 = vld [vmem:[#allocation4 + $0x30] sm:$0xf] }
 0x70d   : > { %v1555_v22 = vpop.f32.mrf.mxu0 }
 0x70e   : > { %v1556_v24 = vadd.f32 %v2810_v49, %v1555_v22  ;;  %v2688_v22 = vld [vmem:[#allocation4 + $0x34] sm:$0xf0] }
 0x715   : > { %v1557_v0 = vpop.f32.mrf.mxu0 }
 0x716   : > { %v1558_v1 = vadd.f32 %v2810_v49, %v1557_v0  ;;  %v2687_v0 = vld [vmem:[#allocation4 + $0x34] sm:$0xf] }
 0x718   : > { %v1591_v25 = vpack.c.bf16 %v1558_v1, %v1556_v24  ;;  %v2625_v24 = vor.u32 %v2688_v22, %v2624_v14  ;;  %v2626_v1 = vld [vmem:[#allocation4 + $0x38] sm:$0xf0] }
 0x71a   : > { %2583 = vmatmul.msk.bf16.gmra.mxu1 %vm1516_vm0, %v1591_v25  ;;  %2591 = vmatmul.msk.bf16.gmra.mxu2 %vm1516_vm0, %v1591_v25  ;;  %v2629_v25 = vor.u32 %v2687_v0, %v2626_v1 }
 0x71b   : > { %2028 = vmatpush.bf16.xpose.msrb.mxu3 %v2625_v24 }
 0x71c   : > { %2077 = vmatpush.bf16.xpose.msrb.mxu0 %v2629_v25 }
 0x723   : > { %v1560_v5 = vpop.f32.mrf.mxu2 }
 0x724   : > { %v1561_v28 = vadd.f32 %v2810_v49, %v1560_v5 }
 0x72b   : > { %v1562_v26 = vpop.f32.mrf.mxu2 }
 0x72c   : > { %v1563_v32 = vadd.f32 %v2810_v49, %v1562_v26 }
 0x72e   : > { %v1592_v57 = vpack.c.bf16 %v1563_v32, %v1561_v28  ;;  %v2616_v32 = vld [vmem:[#allocation4 + $0x20] sm:$0xf] }
 0x730   : > { %2584 = vmatmul.msk.bf16.gmra.mxu1 %vm1516_vm0, %v1592_v57  ;;  %2592 = vmatmul.msk.bf16.gmra.mxu2 %vm1516_vm0, %v1592_v57  ;;  %v2686_v57 = vld [vmem:[#allocation4 + $0x24] sm:$0xf0] }
 0x733   : > { %v1565_v33 = vpop.f32.mrf.mxu2 }
 0x734   : > { %v1566_v27 = vadd.f32 %v2810_v49, %v1565_v33  ;;  %v2685_v33 = vld [vmem:[#allocation4 + $0x24] sm:$0xf] }
 0x73b   : > { %v1567_v45 = vpop.f32.mrf.mxu2 }
 0x73c   : > { %v1568_v50 = vadd.f32 %v2810_v49, %v1567_v45  ;;  %v2617_v45 = vor.u32 %v2686_v57, %v2616_v32 }
 0x73e   : > { %v1593_v51 = vpack.c.bf16 %v1568_v50, %v1566_v27  ;;  %v2618_v27 = vld [vmem:[#allocation4 + $0x28] sm:$0xf0]  ;;  %2029 = vmatpush.bf16.xpose.msrb.mxu3 %v2617_v45 }
 0x73f   : > { %v2621_v50 = vor.u32 %v2685_v33, %v2618_v27 }
 0x740   : > { %2585 = vmatmul.msk.bf16.gmra.mxu1 %vm1516_vm0, %v1593_v51  ;;  %2593 = vmatmul.msk.bf16.gmra.mxu2 %vm1516_vm0, %v1593_v51 }
 0x741   : > { %2078 = vmatpush.bf16.xpose.msrb.mxu0 %v2621_v50 }
 0x743   : > { %v1570_v52 = vpop.f32.mrf.mxu2 }
 0x744   : > { %v1571_v54 = vadd.f32 %v2810_v49, %v1570_v52 }
 0x74b   : > { %v1572_v53 = vpop.f32.mrf.mxu2 }
 0x74c   : > { %v1573_v20 = vadd.f32 %v2810_v49, %v1572_v53 }
 0x74e   : > { %v1594_v21 = vpack.c.bf16 %v1573_v20, %v1571_v54  ;;  %v2608_v54 = vld [vmem:[#allocation4 + $0x10] sm:$0xf]  ;;  %v2684_v20 = vld [vmem:[#allocation4 + $0x14] sm:$0xf0] }
 0x750   : > { %2586 = vmatmul.msk.bf16.gmra.mxu1 %vm1516_vm0, %v1594_v21  ;;  %2594 = vmatmul.msk.bf16.gmra.mxu2 %vm1516_vm0, %v1594_v21  ;;  %v2683_v21 = vld [vmem:[#allocation4 + $0x14] sm:$0xf] }
 0x753   : > { %v1575_v29 = vpop.f32.mrf.mxu2 }
 0x754   : > { %v1576_v30 = vadd.f32 %v2810_v49, %v1575_v29  ;;  %v2609_v29 = vor.u32 %v2684_v20, %v2608_v54 }
 0x756   : > { %2030 = vmatpush.bf16.xpose.msrb.mxu3 %v2609_v29 }
 0x75b   : > { %v1577_v55 = vpop.f32.mrf.mxu2 }
 0x75c   : > { %v1578_v31 = vadd.f32 %v2810_v49, %v1577_v55  ;;  %v2610_v55 = vld [vmem:[#allocation4 + $0x18] sm:$0xf0] }
 0x75e   : > { %v1595_v36 = vpack.c.bf16 %v1578_v31, %v1576_v30  ;;  %v2613_v30 = vor.u32 %v2683_v21, %v2610_v55 }
 0x760   : > { %2587 = vmatmul.msk.bf16.gmra.mxu1 %vm1516_vm0, %v1595_v36  ;;  %2595 = vmatmul.msk.bf16.gmra.mxu2 %vm1516_vm0, %v1595_v36 }
 0x761   : > { %2079 = vmatpush.bf16.xpose.msrb.mxu0 %v2613_v30 }
 0x763   : > { %v1580_v8 = vpop.f32.mrf.mxu3 }
 0x764   : > { %v1581_v56 = vadd.f32 %v2810_v49, %v1580_v8 }
 0x76b   : > { %v1582_v35 = vpop.f32.mrf.mxu3 }
 0x76c   : > { %v1583_v37 = vadd.f32 %v2810_v49, %v1582_v35  ;;  %v2600_v35 = vld [vmem:[#allocation4] sm:$0xf] }
 0x76e   : > { %v1596_v58 = vpack.c.bf16 %v1583_v37, %v1581_v56  ;;  %v2682_v56 = vld [vmem:[#allocation4 + $0x4] sm:$0xf0]  ;;  %v2681_v37 = vld [vmem:[#allocation4 + $0x4] sm:$0xf] }
 0x770   : > { %2588 = vmatmul.msk.bf16.gmra.mxu1 %vm1516_vm0, %v1596_v58  ;;  %2596 = vmatmul.msk.bf16.gmra.mxu2 %vm1516_vm0, %v1596_v58  ;;  %v2601_v58 = vor.u32 %v2682_v56, %v2600_v35 }
 0x772   : > { %2031 = vmatpush.bf16.xpose.msrb.mxu3 %v2601_v58 }
 0x773   : > { %v1585_v62 = vpop.f32.mrf.mxu3 }
 0x774   : > { %v1586_v18 = vadd.f32 %v2810_v49, %v1585_v62  ;;  %v2602_v62 = vld [vmem:[#allocation4 + $0x8] sm:$0xf0] }
 0x77b   : > { %v1587_v41 = vpop.f32.mrf.mxu3 }
 0x77c   : > { %v1588_v3 = vadd.f32 %v2810_v49, %v1587_v41  ;;  %v2605_v41 = vor.u32 %v2681_v37, %v2602_v62 }
 0x77e   : > { %v1597_v19 = vpack.c.bf16 %v1588_v3, %v1586_v18  ;;  %2080 = vmatpush.bf16.xpose.msrb.mxu0 %v2605_v41 }
 0x780   : > { %2589 = vmatmul.msk.bf16.gmra.mxu1 %vm1516_vm0, %v1597_v19  ;;  %2597 = vmatmul.msk.bf16.gmra.mxu2 %vm1516_vm0, %v1597_v19 }
 0x787   : > { %v3637_v38 = vpop.f32.mrf.mxu1 }
 0x78d   : > { %v3639_v39 = vpop.f32.mrf.mxu2 }
 0x78e   : > { %v1768_v11 = vmax.f32 %v3637_v38, %v3639_v39 }
 0x78f   : > { %v3643_v12 = vpop.f32.mrf.mxu1 }
 0x790   : > { %1769 = vmax.xlane.f32.xlu1 %v1768_v11 }
 0x795   : > { %v3645_v40 = vpop.f32.mrf.mxu2 }
 0x796   : > { %v1771_v15 = vmax.f32 %v3643_v12, %v3645_v40 }
 0x797   : > { %v3649_v6 = vpop.f32.mrf.mxu1 }
 0x798   : > { %1772 = vmax.xlane.f32.xlu1 %v1771_v15 }
 0x79d   : > { %v3651_v7 = vpop.f32.mrf.mxu2 }
 0x79e   : > { %v1774_v63 = vmax.f32 %v3649_v6, %v3651_v7 }
 0x79f   : > { %v3655_v17 = vpop.f32.mrf.mxu1 }
 0x7a0   : > { %1775 = vmax.xlane.f32.xlu2 %v1774_v63 }
 0x7a5   : > { %v3657_v23 = vpop.f32.mrf.mxu2 }
 0x7a6   : > { %v1777_v2 = vmax.f32 %v3655_v17, %v3657_v23 }
 0x7a8   : > { %1778 = vmax.xlane.f32.xlu2 %v1777_v2 }
 0x7ad   : > { %v3661_v4 = vpop.f32.mrf.mxu1 }
 0x7b3   : > { %v3663_v44 = vpop.f32.mrf.mxu2 }
 0x7b4   : > { %v1780_v34 = vmax.f32 %v3661_v4, %v3663_v44 }
 0x7b5   : > { %v3667_v46 = vpop.f32.mrf.mxu1 }
 0x7b6   : > { %1781 = vmax.xlane.f32.xlu1 %v1780_v34 }
 0x7bb   : > { %v3669_v42 = vpop.f32.mrf.mxu2 }
 0x7bc   : > { %v1783_v43 = vmax.f32 %v3667_v46, %v3669_v42 }
 0x7bd   : > { %v3673_v47 = vpop.f32.mrf.mxu1 }
 0x7be   : > { %1784 = vmax.xlane.f32.xlu2 %v1783_v43 }
 0x7c3   : > { %v3675_v9 = vpop.f32.mrf.mxu2 }
 0x7c4   : > { %v1786_v48 = vmax.f32 %v3673_v47, %v3675_v9 }
 0x7c5   : > { %v3679_v10 = vpop.f32.mrf.mxu1 }
 0x7c6   : > { %1787 = vmax.xlane.f32.xlu1 %v1786_v48 }
 0x7cb   : > { %v3681_v60 = vpop.f32.mrf.mxu2 }
 0x7cc   : > { %v1789_v61 = vmax.f32 %v3679_v10, %v3681_v60 }
 0x7cd   : > { %v3685_v49 = vpop.f32.mrf.mxu1 }
 0x7ce   : > { %1790 = vmax.xlane.f32.xlu2 %v1789_v61 }
 0x7d3   : > { %v3687_v59 = vpop.f32.mrf.mxu2 }
 0x7d4   : > { %v1792_v13 = vmax.f32 %v3685_v49, %v3687_v59 }
 0x7d5   : > { %v3691_v16 = vpop.f32.mrf.mxu1 }
 0x7d6   : > { %1793 = vmax.xlane.f32.xlu1 %v1792_v13 }
 0x7db   : > { %v3693_v5 = vpop.f32.mrf.mxu2 }
 0x7dc   : > { %v1795_v26 = vmax.f32 %v3691_v16, %v3693_v5 }
 0x7dd   : > { %v3697_v28 = vpop.f32.mrf.mxu1 }
 0x7de   : > { %1796 = vmax.xlane.f32.xlu2 %v1795_v26 }
 0x7e3   : > { %v3699_v51 = vpop.f32.mrf.mxu2 }
 0x7e4   : > { %v1798_v52 = vmax.f32 %v3697_v28, %v3699_v51 }
 0x7e5   : > { %v3703_v53 = vpop.f32.mrf.mxu1 }
 0x7e6   : > { %1799 = vmax.xlane.f32.xlu1 %v1798_v52 }
 0x7eb   : > { %v3705_v31 = vpop.f32.mrf.mxu2 }
 0x7ec   : > { %v1801_v36 = vmax.f32 %v3703_v53, %v3705_v31 }
 0x7ed   : > { %v3709_v8 = vpop.f32.mrf.mxu1 }
 0x7ee   : > { %1802 = vmax.xlane.f32.xlu2 %v1801_v36 }
 0x7f3   : > { %v3711_v18 = vpop.f32.mrf.mxu2 }
 0x7f4   : > { %v1804_v3 = vmax.f32 %v3709_v8, %v3711_v18 }
 0x7f5   : > { %v3715_v19 = vpop.f32.mrf.mxu1 }
 0x7f6   : > { %1805 = vmax.xlane.f32.xlu1 %v1804_v3 }
 0x7fb   : > { %v3717_v11 = vpop.f32.mrf.mxu2 }
 0x7fc   : > { %v1807_v15 = vmax.f32 %v3715_v19, %v3717_v11 }
 0x7fd   : > { %v3721_v63 = vpop.f32.mrf.mxu1 }
 0x7fe   : > { %1808 = vmax.xlane.f32.xlu2 %v1807_v15 }
 0x803   : > { %v1770_v2 = vpop.xlane.xlu1 %1769  ;;  %v3723_v34 = vpop.f32.mrf.mxu2 }
 0x804   : > { %v1816_v43 = vsub.f32 %v3637_v38, %v1770_v2  ;;  %v1817_v48 = vsub.f32 %v3639_v39, %v1770_v2  ;;  %v1810_v61 = vmax.f32 %v3721_v63, %v3723_v34 }
 0x805   : > { %v3729_v22 = vpop.f32.mrf.mxu1 }
 0x806   : > { %v1848_v13 = vmul.f32 1.442695, %v1816_v43  ;;  %v1850_v14 = vmul.f32 1.442695, %v1817_v48  ;;  %1811 = vmax.xlane.f32.xlu0 %v1810_v61 }
 0x808   : > { %2811 = vpow2.f32 %v1848_v13 }
 0x809   : > { %2813 = vpow2.f32 %v1850_v14 }
 0x80b   : > { %v1773_v0 = vpop.xlane.xlu1 %1772  ;;  %v3731_v24 = vpop.f32.mrf.mxu2 }
 0x80c   : > { %v1818_v1 = vsub.f32 %v3643_v12, %v1773_v0  ;;  %v1819_v25 = vsub.f32 %v3645_v40, %v1773_v0  ;;  %v1813_v38 = vmax.f32 %v3729_v22, %v3731_v24 }
 0x80e   : > { %v2812_v39 = vpop.eup %2811  ;;  %v1852_v26 = vmul.f32 1.442695, %v1818_v1  ;;  %v1854_v32 = vmul.f32 1.442695, %v1819_v25  ;;  %1814 = vmax.xlane.f32.xlu1 %v1813_v38 }
 0x80f   : > { %v2814_v57 = vpop.eup %2813 }
 0x810   : > { %2815 = vpow2.f32 %v1852_v26  ;;  %v3737_v33 = vadd.f32 %v2814_v57, %v2812_v39 }
 0x811   : > { %2817 = vpow2.f32 %v1854_v32 }
 0x813   : > { %v1776_v45 = vpop.xlane.xlu2 %1775 }
 0x814   : > { %v1820_v27 = vsub.f32 %v3649_v6, %v1776_v45  ;;  %v1821_v50 = vsub.f32 %v3651_v7, %v1776_v45 }
 0x816   : > { %v2816_v12 = vpop.eup %2815  ;;  %v1856_v52 = vmul.f32 1.442695, %v1820_v27  ;;  %v1858_v40 = vmul.f32 1.442695, %v1821_v50 }
 0x817   : > { %v2818_v54 = vpop.eup %2817  ;;  %v1960_v20 = vpack.c.bf16 %v2816_v12, %v2812_v39 }
 0x818   : > { %2819 = vpow2.f32 %v1856_v52  ;;  %v1961_v21 = vpack.c.bf16 %v2818_v54, %v2814_v57  ;;  %v3741_v29 = vadd.f32 %v2818_v54, %v2816_v12 }
 0x819   : > { %2821 = vpow2.f32 %v1858_v40  ;;  %2032 = vmatmul.bf16.vlgmr.msrb.gmra.mxu3 %v1960_v20 }
 0x81a   : > { %2081 = vmatmul.bf16.vlgmr.msrb.gmra.mxu0 %v1961_v21 }
 0x81b   : > { %v1779_v55 = vpop.xlane.xlu2 %1778 }
 0x81c   : > { %v1822_v30 = vsub.f32 %v3655_v17, %v1779_v55  ;;  %v1823_v36 = vsub.f32 %v3657_v23, %v1779_v55 }
 0x81e   : > { %v2820_v6 = vpop.eup %2819  ;;  %v1860_v35 = vmul.f32 1.442695, %v1822_v30  ;;  %v1862_v7 = vmul.f32 1.442695, %v1823_v36 }
 0x81f   : > { %v2822_v56 = vpop.eup %2821 }
 0x820   : > { %2823 = vpow2.f32 %v1860_v35  ;;  %v3745_v37 = vadd.f32 %v2822_v56, %v2820_v6 }
 0x821   : > { %2825 = vpow2.f32 %v1862_v7 }
 0x826   : > { %v2824_v58 = vpop.eup %2823 }
 0x827   : > { %v2826_v62 = vpop.eup %2825  ;;  %v1962_v41 = vpack.c.bf16 %v2824_v58, %v2820_v6 }
 0x828   : > { %v1963_v3 = vpack.c.bf16 %v2826_v62, %v2822_v56  ;;  %v3747_v15 = vadd.f32 %v2826_v62, %v2824_v58 }
 0x829   : > { %v1782_v2 = vpop.xlane.xlu1 %1781  ;;  %2037 = vmatmul.bf16.gmra.mxu3 %v1962_v41 }
 0x82a   : > { %2086 = vmatmul.bf16.gmra.mxu0 %v1963_v3  ;;  %v1824_v17 = vsub.f32 %v3661_v4, %v1782_v2  ;;  %v1825_v23 = vsub.f32 %v3663_v44, %v1782_v2 }
 0x82c   : > { %v1864_v43 = vmul.f32 1.442695, %v1824_v17  ;;  %v1866_v48 = vmul.f32 1.442695, %v1825_v23 }
 0x82e   : > { %2827 = vpow2.f32 %v1864_v43 }
 0x82f   : > { %2829 = vpow2.f32 %v1866_v48 }
 0x831   : > { %v1785_v61 = vpop.xlane.xlu2 %1784 }
 0x832   : > { %v1826_v13 = vsub.f32 %v3667_v46, %v1785_v61  ;;  %v1827_v14 = vsub.f32 %v3669_v42, %v1785_v61 }
 0x834   : > { %v2828_v0 = vpop.eup %2827  ;;  %v1868_v1 = vmul.f32 1.442695, %v1826_v13  ;;  %v1870_v25 = vmul.f32 1.442695, %v1827_v14 }
 0x835   : > { %v2830_v38 = vpop.eup %2829 }
 0x836   : > { %2831 = vpow2.f32 %v1868_v1  ;;  %v3753_v39 = vadd.f32 %v2830_v38, %v2828_v0 }
 0x837   : > { %2833 = vpow2.f32 %v1870_v25 }
 0x839   : > { %v1788_v4 = vpop.xlane.xlu1 %1787 }
 0x83a   : > { %v1828_v44 = vsub.f32 %v3673_v47, %v1788_v4  ;;  %v1829_v26 = vsub.f32 %v3675_v9, %v1788_v4 }
 0x83c   : > { %v2832_v32 = vpop.eup %2831  ;;  %v1872_v57 = vmul.f32 1.442695, %v1828_v44  ;;  %v1874_v45 = vmul.f32 1.442695, %v1829_v26 }
 0x83d   : > { %v2834_v27 = vpop.eup %2833  ;;  %v1964_v46 = vpack.c.bf16 %v2832_v32, %v2828_v0 }
 0x83e   : > { %2835 = vpow2.f32 %v1872_v57  ;;  %v1965_v42 = vpack.c.bf16 %v2834_v27, %v2830_v38  ;;  %v3757_v50 = vadd.f32 %v2834_v27, %v2832_v32 }
 0x83f   : > { %2837 = vpow2.f32 %v1874_v45  ;;  %2042 = vmatmul.bf16.gmra.mxu3 %v1964_v46 }
 0x840   : > { %2091 = vmatmul.bf16.gmra.mxu0 %v1965_v42 }
 0x841   : > { %v1791_v12 = vpop.xlane.xlu2 %1790 }
 0x842   : > { %v1830_v52 = vsub.f32 %v3679_v10, %v1791_v12  ;;  %v1831_v40 = vsub.f32 %v3681_v60, %v1791_v12 }
 0x844   : > { %v2836_v47 = vpop.eup %2835  ;;  %v1876_v54 = vmul.f32 1.442695, %v1830_v52  ;;  %v1878_v9 = vmul.f32 1.442695, %v1831_v40 }
 0x845   : > { %v2838_v20 = vpop.eup %2837 }
 0x846   : > { %2839 = vpow2.f32 %v1876_v54  ;;  %v3761_v21 = vadd.f32 %v2838_v20, %v2836_v47 }
 0x847   : > { %2841 = vpow2.f32 %v1878_v9 }
 0x849   : > { %v1794_v55 = vpop.xlane.xlu1 %1793 }
 0x84a   : > { %v1832_v30 = vsub.f32 %v3685_v49, %v1794_v55  ;;  %v1833_v36 = vsub.f32 %v3687_v59, %v1794_v55 }
 0x84c   : > { %v2840_v6 = vpop.eup %2839  ;;  %v1880_v35 = vmul.f32 1.442695, %v1832_v30  ;;  %v1882_v7 = vmul.f32 1.442695, %v1833_v36 }
 0x84d   : > { %v2842_v56 = vpop.eup %2841  ;;  %v1966_v10 = vpack.c.bf16 %v2840_v6, %v2836_v47 }
 0x84e   : > { %2843 = vpow2.f32 %v1880_v35  ;;  %v1967_v60 = vpack.c.bf16 %v2842_v56, %v2838_v20  ;;  %v3765_v58 = vadd.f32 %v2842_v56, %v2840_v6 }
 0x84f   : > { %2845 = vpow2.f32 %v1882_v7  ;;  %2047 = vmatmul.bf16.gmra.mxu3 %v1966_v10 }
 0x850   : > { %2096 = vmatmul.bf16.gmra.mxu0 %v1967_v60 }
 0x851   : > { %v1797_v62 = vpop.xlane.xlu2 %1796 }
 0x852   : > { %v1834_v41 = vsub.f32 %v3691_v16, %v1797_v62  ;;  %v1835_v3 = vsub.f32 %v3693_v5, %v1797_v62 }
 0x854   : > { %v2844_v49 = vpop.eup %2843  ;;  %v1884_v2 = vmul.f32 1.442695, %v1834_v41  ;;  %v1886_v59 = vmul.f32 1.442695, %v1835_v3 }
 0x855   : > { %v2846_v17 = vpop.eup %2845 }
 0x856   : > { %2847 = vpow2.f32 %v1884_v2  ;;  %v3769_v23 = vadd.f32 %v2846_v17, %v2844_v49 }
 0x857   : > { %2849 = vpow2.f32 %v1886_v59 }
 0x859   : > { %v1800_v43 = vpop.xlane.xlu1 %1799 }
 0x85a   : > { %v1836_v61 = vsub.f32 %v3697_v28, %v1800_v43  ;;  %v1837_v14 = vsub.f32 %v3699_v51, %v1800_v43 }
 0x85c   : > { %v2848_v48 = vpop.eup %2847  ;;  %v1888_v5 = vmul.f32 1.442695, %v1836_v61  ;;  %v1890_v25 = vmul.f32 1.442695, %v1837_v14 }
 0x85d   : > { %v2850_v13 = vpop.eup %2849  ;;  %v1968_v0 = vpack.c.bf16 %v2848_v48, %v2844_v49 }
 0x85e   : > { %v1969_v1 = vpack.c.bf16 %v2850_v13, %v2846_v17  ;;  %v3773_v16 = vadd.f32 %v2850_v13, %v2848_v48  ;;  %2851 = vpow2.f32 %v1888_v5 }
 0x85f   : > { %2052 = vmatmul.bf16.gmra.mxu3 %v1968_v0  ;;  %2853 = vpow2.f32 %v1890_v25 }
 0x860   : > { %2101 = vmatmul.bf16.gmra.mxu0 %v1969_v1 }
 0x861   : > { %v1803_v38 = vpop.xlane.xlu2 %1802 }
 0x862   : > { %v1838_v4 = vsub.f32 %v3703_v53, %v1803_v38  ;;  %v1839_v44 = vsub.f32 %v3705_v31, %v1803_v38 }
 0x864   : > { %v1892_v26 = vmul.f32 1.442695, %v1838_v4  ;;  %v1894_v32 = vmul.f32 1.442695, %v1839_v44  ;;  %v2852_v51 = vpop.eup %2851 }
 0x865   : > { %v2854_v57 = vpop.eup %2853 }
 0x866   : > { %2855 = vpow2.f32 %v1892_v26 }
 0x867   : > { %2857 = vpow2.f32 %v1894_v32 }
 0x869   : > { %v1806_v28 = vpop.xlane.xlu1 %1805 }
 0x86a   : > { %v1840_v27 = vsub.f32 %v3709_v8, %v1806_v28  ;;  %v1841_v42 = vsub.f32 %v3711_v18, %v1806_v28 }
 0x86c   : > { %v2856_v45 = vpop.eup %2855  ;;  %v1896_v53 = vmul.f32 1.442695, %v1840_v27  ;;  %v1898_v31 = vmul.f32 1.442695, %v1841_v42 }
 0x86d   : > { %v2858_v46 = vpop.eup %2857  ;;  %v1970_v12 = vpack.c.bf16 %v2856_v45, %v2852_v51 }
 0x86e   : > { %v1971_v52 = vpack.c.bf16 %v2858_v46, %v2854_v57  ;;  %2859 = vpow2.f32 %v1896_v53  ;;  %v1945_v1 = vadd.f32 %v2858_v46, %v2856_v45 }
 0x86f   : > { %2057 = vmatmul.bf16.gmra.mxu3 %v1970_v12  ;;  %2861 = vpow2.f32 %v1898_v31 }
 0x870   : > { %2106 = vmatmul.bf16.gmra.mxu0 %v1971_v52 }
 0x871   : > { %v1809_v40 = vpop.xlane.xlu2 %1808 }
 0x872   : > { %v1842_v47 = vsub.f32 %v3715_v19, %v1809_v40  ;;  %v1843_v54 = vsub.f32 %v3717_v11, %v1809_v40 }
 0x874   : > { %v1900_v9 = vmul.f32 1.442695, %v1842_v47  ;;  %v1902_v20 = vmul.f32 1.442695, %v1843_v54  ;;  %v2860_v55 = vpop.eup %2859 }
 0x875   : > { %v2862_v36 = vpop.eup %2861 }
 0x876   : > { %2863 = vpow2.f32 %v1900_v9  ;;  %v1948_v43 = vadd.f32 %v2862_v36, %v2860_v55 }
 0x877   : > { %2865 = vpow2.f32 %v1902_v20 }
 0x879   : > { %v1812_v8 = vpop.xlane.xlu0 %1811 }
 0x87a   : > { %v1844_v18 = vsub.f32 %v3721_v63, %v1812_v8  ;;  %v1845_v30 = vsub.f32 %v3723_v34, %v1812_v8 }
 0x87c   : > { %v2864_v6 = vpop.eup %2863  ;;  %v1904_v35 = vmul.f32 1.442695, %v1844_v18  ;;  %v1906_v7 = vmul.f32 1.442695, %v1845_v30 }
 0x87d   : > { %v2866_v56 = vpop.eup %2865  ;;  %v1972_v19 = vpack.c.bf16 %v2864_v6, %v2860_v55 }
 0x87e   : > { %2867 = vpow2.f32 %v1904_v35  ;;  %v1973_v11 = vpack.c.bf16 %v2866_v56, %v2862_v36  ;;  %v1951_v13 = vadd.f32 %v2866_v56, %v2864_v6 }
 0x87f   : > { %2869 = vpow2.f32 %v1906_v7  ;;  %2062 = vmatmul.bf16.gmra.mxu3 %v1972_v19 }
 0x880   : > { %2111 = vmatmul.bf16.gmra.mxu0 %v1973_v11 }
 0x881   : > { %v1815_v10 = vpop.xlane.xlu1 %1814 }
 0x882   : > { %v1846_v60 = vsub.f32 %v3729_v22, %v1815_v10  ;;  %v1847_v62 = vsub.f32 %v3731_v24, %v1815_v10  ;;  %v1942_v22 = vadd.f32 %v2854_v57, %v2852_v51 }
 0x884   : > { %v2868_v41 = vpop.eup %2867  ;;  %v1908_v63 = vmul.f32 1.442695, %v1846_v60  ;;  %v1910_v3 = vmul.f32 1.442695, %v1847_v62 }
 0x885   : > { %v2870_v34 = vpop.eup %2869 }
 0x886   : > { %2871 = vpow2.f32 %v1908_v63  ;;  %v1954_v49 = vadd.f32 %v2870_v34, %v2868_v41 }
 0x887   : > { %2873 = vpow2.f32 %v1910_v3 }
 0x888   : > { %1955 = vadd.xlane.f32.xlu2 %v1954_v49 }
 0x88c   : > { %v2872_v2 = vpop.eup %2871 }
 0x88d   : > { %v2874_v59 = vpop.eup %2873  ;;  %v1974_v17 = vpack.c.bf16 %v2872_v2, %v2868_v41 }
 0x88e   : > { %v1975_v48 = vpack.c.bf16 %v2874_v59, %v2870_v34  ;;  %v1957_v61 = vadd.f32 %v2874_v59, %v2872_v2 }
 0x88f   : > { %2067 = vmatmul.bf16.gmra.mxu3 %v1974_v17 }
 0x890   : > { %1949 = vadd.xlane.f32.xlu2 %v1948_v43  ;;  %2116 = vmatmul.bf16.gmra.mxu0 %v1975_v48 }
 0x891   : > { %1958 = vadd.xlane.f32.xlu1 %v1957_v61 }
 0x897   : > { %v2082_v24 = vpop.f32.mrf.mxu0 }
 0x898   : > { %1943 = vadd.xlane.f32.xlu2 %v1942_v22 }
 0x899   : > { %1952 = vadd.xlane.f32.xlu1 %v1951_v13 }
 0x89c   : > { %v2033_v14 = vpop.f32.mrf.mxu3 }
 0x89d   : > { %v3785_v0 = vadd.f32 %v2082_v24, %v2033_v14 }
 0x89f   : > { %v2084_v5 = vpop.f32.mrf.mxu0 }
 0x8a0   : > { %1937 = vadd.xlane.f32.xlu2 %v3769_v23 }
 0x8a1   : > { %1946 = vadd.xlane.f32.xlu1 %v1945_v1 }
 0x8a4   : > { %v2035_v25 = vpop.f32.mrf.mxu3 }
 0x8a5   : > { %v3788_v38 = vadd.f32 %v2084_v5, %v2035_v25 }
 0x8a7   : > { %v2087_v4 = vpop.f32.mrf.mxu0 }
 0x8a8   : > { %1931 = vadd.xlane.f32.xlu2 %v3761_v21 }
 0x8a9   : > { %1940 = vadd.xlane.f32.xlu1 %v3773_v16 }
 0x8ac   : > { %v2038_v44 = vpop.f32.mrf.mxu3 }
 0x8ad   : > { %v3792_v26 = vadd.f32 %v2087_v4, %v2038_v44 }
 0x8af   : > { %v2089_v32 = vpop.f32.mrf.mxu0 }
 0x8b0   : > { %1925 = vadd.xlane.f32.xlu2 %v3753_v39 }
 0x8b1   : > { %1934 = vadd.xlane.f32.xlu1 %v3765_v58 }
 0x8b4   : > { %v2040_v28 = vpop.f32.mrf.mxu3 }
 0x8b5   : > { %v3796_v51 = vadd.f32 %v2089_v32, %v2040_v28 }
 0x8b8   : > { %1919 = vadd.xlane.f32.xlu2 %v3745_v37 }
 0x8b9   : > { %1928 = vadd.xlane.f32.xlu1 %v3757_v50 }
 0x8bd   : > { %v2092_v23 = vpop.f32.mrf.mxu0 }
 0x8c0   : > { %1913 = vadd.xlane.f32.xlu2 %v3737_v33 }
 0x8c1   : > { %1922 = vadd.xlane.f32.xlu1 %v3747_v15 }
 0x8c2   : > { %v2043_v21 = vpop.f32.mrf.mxu3 }
 0x8c3   : > { %v3802_v16 = vadd.f32 %v2092_v23, %v2043_v21 }
 0x8c5   : > { %v2094_v57 = vpop.f32.mrf.mxu0 }
 0x8c9   : > { %1916 = vadd.xlane.f32.xlu1 %v3741_v29 }
 0x8ca   : > { %v2045_v39 = vpop.f32.mrf.mxu3 }
 0x8cb   : > { %v3805_v58 = vadd.f32 %v2094_v57, %v2045_v39 }
 0x8cd   : > { %v2097_v45 = vpop.f32.mrf.mxu0 }
 0x8d2   : > { %v2048_v27 = vpop.f32.mrf.mxu3 }
 0x8d3   : > { %v3807_v46 = vadd.f32 %v2097_v45, %v2048_v27 }
 0x8d5   : > { %v2099_v37 = vpop.f32.mrf.mxu0 }
 0x8da   : > { %v2050_v50 = vpop.f32.mrf.mxu3 }
 0x8db   : > { %v3809_v42 = vadd.f32 %v2099_v37, %v2050_v50 }
 0x8dd   : > { %v2102_v33 = vpop.f32.mrf.mxu0 }
 0x8e2   : > { %v2053_v12 = vpop.f32.mrf.mxu3 }
 0x8e3   : > { %v2103_v15 = vadd.f32 %v2102_v33, %v2053_v12 }
 0x8e5   : > { %v2104_v52 = vpop.f32.mrf.mxu0 }
 0x8ea   : > { %v2055_v53 = vpop.f32.mrf.mxu3 }
 0x8eb   : > { %v2105_v31 = vadd.f32 %v2104_v52, %v2055_v53 }
 0x8ed   : > { %v2107_v40 = vpop.f32.mrf.mxu0 }
 0x8f2   : > { %v2058_v47 = vpop.f32.mrf.mxu3 }
 0x8f3   : > { %v2108_v27 = vadd.f32 %v2107_v40, %v2058_v47 }
 0x8f5   : > { %v2109_v29 = vpop.f32.mrf.mxu0 }
 0x8fa   : > { %v2060_v54 = vpop.f32.mrf.mxu3 }
 0x8fb   : > { %v1956_v9 = vpop.xlane.xlu2 %1955  ;;  %v2110_v57 = vadd.f32 %v2109_v29, %v2060_v54 }
 0x8fc   : > { %2875 = vrcp.f32 %v1956_v9 }
 0x8fd   : > { %v2112_v20 = vpop.f32.mrf.mxu0 }
 0x902   : > { %v2063_v8 = vpop.f32.mrf.mxu3  ;;  %v2876_v41 = vpop.eup %2875 }
 0x903   : > { %v1950_v55 = vpop.xlane.xlu2 %1949  ;;  %v2113_v24 = vadd.f32 %v2112_v20, %v2063_v8 }
 0x904   : > { %v1959_v18 = vpop.xlane.xlu1 %1958 }
 0x905   : > { %v2114_v30 = vpop.f32.mrf.mxu0  ;;  %2877 = vrcp.f32 %v1959_v18 }
 0x90a   : > { %v2065_v36 = vpop.f32.mrf.mxu3 }
 0x90b   : > { %v1944_v6 = vpop.xlane.xlu2 %1943  ;;  %v2878_v34 = vpop.eup %2877  ;;  %v2115_v43 = vadd.f32 %v2114_v30, %v2065_v36 }
 0x90c   : > { %v1953_v35 = vpop.xlane.xlu1 %1952 }
 0x90d   : > { %v2117_v7 = vpop.f32.mrf.mxu0  ;;  %2879 = vrcp.f32 %v1953_v35 }
 0x90e   : > { %2881 = vrcp.f32 %v1950_v55 }
 0x912   : > { %v2068_v56 = vpop.f32.mrf.mxu3 }
 0x913   : > { %v1938_v19 = vpop.xlane.xlu2 %1937  ;;  %v2118_v10 = vadd.f32 %v2117_v7, %v2068_v56  ;;  %v2880_v17 = vpop.eup %2879 }
 0x914   : > { %v1947_v11 = vpop.xlane.xlu1 %1946  ;;  %2883 = vrcp.f32 %v1938_v19  ;;  %v2882_v61 = vpop.eup %2881  ;;  %v2151_v14 = vmul.f32 %v2880_v17, %v2115_v43  ;;  %v2176_v17 = vld [vmem:[%s3945_s12 + $0x30] sm:$0xff]  ;;  %v2177_v43 = vld [vmem:[%s3945_s12 + $0x38] sm:$0xff] }
 0x915   : > { %v2119_v60 = vpop.f32.mrf.mxu0  ;;  %v2152_v2 = vmul.f32 %v2876_v41, %v2118_v10  ;;  %v2150_v5 = vmul.f32 %v2882_v61, %v2113_v24  ;;  %v2692_v61 = vld [vmem:[%s3941_s8 + $0x18] sm:$0xff] }
 0x917   : > { %v2168_v28 = vpack.c.bf16 %v2151_v14, %v2150_v5  ;;  %v2307_v14 = vld [vmem:[%s3869_s30 + $0x20] sm:$0xff] }
 0x918   : > { %v2305_v5 = vld [vmem:[%s3869_s30] sm:$0xff] }
 0x919   : > { %v2269_v37 = vsel %vm1516_vm0, %v2168_v28, 0 }
 0x91a   : > { %v2070_v62 = vpop.f32.mrf.mxu3  ;;  %v2884_v22 = vpop.eup %2883 }
 0x91b   : > { %v1932_v63 = vpop.xlane.xlu2 %1931  ;;  %v2120_v3 = vadd.f32 %v2119_v60, %v2070_v62  ;;  %v2146_v44 = vmul.f32 %v2884_v22, %v2103_v15 }
 0x91c   : > { %v1941_v49 = vpop.xlane.xlu1 %1940 }
 0x91d   : > { %v2153_v59 = vmul.f32 %v2878_v34, %v2120_v3  ;;  %2885 = vrcp.f32 %v1941_v49  ;;  %v2690_v3 = vld [vmem:[%s3941_s8 + $0x8] sm:$0xff]  ;;  %v2689_v34 = vld [vmem:[%s3941_s8] sm:$0xff]  ;;  %v2173_v49 = vld [vmem:[%s3945_s12 + $0x18] sm:$0xff] }
 0x91e   : > { %2887 = vrcp.f32 %v1947_v11 }
 0x91f   : > { %v2169_v48 = vpack.c.bf16 %v2153_v59, %v2152_v2  ;;  %2889 = vrcp.f32 %v1944_v6  ;;  %v2174_v2 = vld [vmem:[%s3945_s12 + $0x20] sm:$0xff]  ;;  %v2175_v59 = vld [vmem:[%s3945_s12 + $0x28] sm:$0xff] }
 0x920   : > { %2891 = vrcp.f32 %v1932_v63 }
 0x921   : > { %v2272_v13 = vsel %vm1516_vm0, %v2169_v48, 0  ;;  %v2691_v48 = vld [vmem:[%s3941_s8 + $0x10] sm:$0xff] }
 0x922   : > { %2274 = vmatpush.bf16.xpose.msra.mxu0 %v2272_v13  ;;  %2701 = vmatpush.bf16.xpose.msrb.mxu1 %v2272_v13 }
 0x923   : > { %v2886_v1 = vpop.eup %2885  ;;  %v1926_v25 = vpop.xlane.xlu2 %1925 }
 0x924   : > { %v1935_v4 = vpop.xlane.xlu1 %1934  ;;  %v2147_v32 = vmul.f32 %v2886_v1, %v2105_v31  ;;  %v2888_v23 = vpop.eup %2887 }
 0x925   : > { %2893 = vrcp.f32 %v1935_v4  ;;  %v2890_v39 = vpop.eup %2889  ;;  %v2149_v50 = vmul.f32 %v2888_v23, %v2110_v57  ;;  %v2308_v57 = vld [vmem:[%s3869_s30 + $0x30] sm:$0xff] }
 0x926   : > { %v2166_v21 = vpack.c.bf16 %v2147_v32, %v2146_v44  ;;  %v2892_v45 = vpop.eup %2891  ;;  %2895 = vrcp.f32 %v1926_v25  ;;  %v2148_v12 = vmul.f32 %v2890_v39, %v2108_v27 }
 0x927   : > { %v2144_v15 = vmul.f32 %v2892_v45, %v3807_v46  ;;  %v2306_v45 = vld [vmem:[%s3869_s30 + $0x10] sm:$0xff] }
 0x928   : > { %v2167_v31 = vpack.c.bf16 %v2149_v50, %v2148_v12  ;;  %v2263_v30 = vsel %vm1516_vm0, %v2166_v21, 0 }
 0x92a   : > { %2275 = vmatpush.bf16.xpose.msra.mxu0 %v2269_v37  ;;  %2702 = vmatpush.bf16.xpose.msrb.mxu1 %v2269_v37  ;;  %v2266_v40 = vsel %vm1516_vm0, %v2167_v31, 0 }
 0x92b   : > { %v2894_v33 = vpop.eup %2893  ;;  %v1920_v9 = vpop.xlane.xlu2 %1919 }
 0x92c   : > { %v1929_v52 = vpop.xlane.xlu1 %1928  ;;  %v2145_v53 = vmul.f32 %v2894_v33, %v3809_v42  ;;  %v2896_v54 = vpop.eup %2895 }
 0x92d   : > { %2897 = vrcp.f32 %v1929_v52  ;;  %v2142_v8 = vmul.f32 %v2896_v54, %v3802_v16 }
 0x92e   : > { %v2165_v29 = vpack.c.bf16 %v2145_v53, %v2144_v15  ;;  %2899 = vrcp.f32 %v1920_v9  ;;  %v2309_v15 = vld [vmem:[%s3869_s30 + $0x40] sm:$0xff] }
 0x932   : > { %2276 = vmatpush.bf16.xpose.msra.mxu0 %v2266_v40  ;;  %2703 = vmatpush.bf16.xpose.msrb.mxu1 %v2266_v40 }
 0x933   : > { %v2898_v47 = vpop.eup %2897  ;;  %v1914_v18 = vpop.xlane.xlu2 %1913 }
 0x934   : > { %v1923_v20 = vpop.xlane.xlu1 %1922  ;;  %v2143_v55 = vmul.f32 %v2898_v47, %v3805_v58  ;;  %v2900_v42 = vpop.eup %2899  ;;  %v2260_v58 = vsel %vm1516_vm0, %v2165_v29, 0  ;;  %v2310_v29 = vld [vmem:[%s3869_s30 + $0x50] sm:$0xff] }
 0x935   : > { %2901 = vrcp.f32 %v1923_v20  ;;  %v2140_v35 = vmul.f32 %v2900_v42, %v3792_v26  ;;  %v3005_v26 = vmov 0  }
 0x936   : > { %v2164_v46 = vpack.c.bf16 %v2143_v55, %v2142_v8  ;;  %2903 = vrcp.f32 %v1914_v18  ;;  %2807 = vset.pattern.permute.xlu2 %v3005_v26  ;;  %2808 = vset.pattern.permute.xlu1 %v3005_v26  ;;  %v2311_v8 = vld [vmem:[%s3869_s30 + $0x60] sm:$0xff] }
 0x937   : > { %2809 = vset.pattern.permute.xlu0 %v3005_v26 }
 0x938   : > { %v2257_v62 = vsel %vm1516_vm0, %v2164_v46, 0 }
 0x93a   : > { %2277 = vmatpush.bf16.xpose.msra.mxu0 %v2263_v30  ;;  %2704 = vmatpush.bf16.xpose.msrb.mxu1 %v2263_v30 }
 0x93b   : > { %v2902_v36 = vpop.eup %2901 }
 0x93c   : > { %v1917_v6 = vpop.xlane.xlu1 %1916  ;;  %v2141_v7 = vmul.f32 %v2902_v36, %v3796_v51  ;;  %v2904_v16 = vpop.eup %2903  ;;  %v2170_v51 = vld [vmem:[%s3945_s12] sm:$0xff]  ;;  %v2312_v36 = vld [vmem:[%s3869_s30 + $0x70] sm:$0xff] }
 0x93d   : > { %2905 = vrcp.f32 %v1917_v6  ;;  %v2138_v11 = vmul.f32 %v2904_v16, %v3785_v0  ;;  %2180 = vperm.xlu2 %2807, %v2170_v51   ;;  %v2172_v0 = vld [vmem:[%s3945_s12 + $0x10] sm:$0xff] }
 0x93e   : > { %v2163_v56 = vpack.c.bf16 %v2141_v7, %v2140_v35 }
 0x940   : > { %v2254_v41 = vsel %vm1516_vm0, %v2163_v56, 0 }
 0x942   : > { %2278 = vmatpush.bf16.xpose.msra.mxu0 %v2260_v58  ;;  %2705 = vmatpush.bf16.xpose.msrb.mxu1 %v2260_v58 }
 0x943   : > { %v2906_v19 = vpop.eup %2905 }
 0x944   : > { %v2139_v10 = vmul.f32 %v2906_v19, %v3788_v38  ;;  %v2171_v38 = vld [vmem:[%s3945_s12 + $0x8] sm:$0xff] }
 0x945   : > { %2190 = vperm.xlu2 %2807, %v2172_v0   ;;  %2185 = vperm.xlu1 %2808, %v2171_v38  }
 0x946   : > { %v2162_v60 = vpack.c.bf16 %v2139_v10, %v2138_v11 }
 0x948   : > { %v2251_v63 = vsel %vm1516_vm0, %v2162_v60, 0 }
 0x94a   : > { %2279 = vmatpush.bf16.xpose.msra.mxu0 %v2257_v62  ;;  %2706 = vmatpush.bf16.xpose.msrb.mxu1 %v2257_v62 }
 0x94d   : > { %2195 = vperm.xlu2 %2807, %v2173_v49   ;;  %2200 = vperm.xlu1 %2808, %v2174_v2  }
 0x952   : > { %2280 = vmatpush.bf16.xpose.msra.mxu0 %v2254_v41  ;;  %2707 = vmatpush.bf16.xpose.msrb.mxu1 %v2254_v41 }
 0x955   : > { %2205 = vperm.xlu2 %2807, %v2175_v59   ;;  %2210 = vperm.xlu1 %2808, %v2176_v17  }
 0x95a   : > { %2281 = vmatpush.bf16.xpose.msra.mxu0 %v2251_v63  ;;  %2708 = vmatpush.bf16.xpose.msrb.mxu1 %v2251_v63 }
 0x95d   : > { %2215 = vperm.xlu2 %2807, %v2177_v43  }
 0x961   : > { %2647 = vmatmul.msk.bf16.vlgmr.msrb.gmra.mxu1 %vm1516_vm0, %v2690_v3  ;;  %2646 = vmatmul.msk.bf16.vlgmr.msra.gmra.mxu0 %vm1516_vm0, %v2689_v34 }
 0x971   : > { %2648 = vmatmul.msk.bf16.gmra.mxu1 %vm1516_vm0, %v2691_v48 }
 0x981   : > { %2649 = vmatmul.msk.bf16.gmra.mxu1 %vm1516_vm0, %v2692_v61 }
 0x997   : > { %v2181_v22 = vpop.permute.xlu2 %2180 }
 0x99f   : > { %v2191_v24 = vpop.permute.xlu2 %2190 }
 0x9a7   : > { %v2196_v23 = vpop.permute.xlu2 %2195 }
 0x9af   : > { %v2206_v54 = vpop.permute.xlu2 %2205 }
 0x9b7   : > { %v2186_v28 = vpop.permute.xlu1 %2185  ;;  %v2216_v42 = vpop.permute.xlu2 %2215 }
 0x9bf   : > { %v2201_v12 = vpop.permute.xlu1 %2200 }
 0x9c7   : > { %v2211_v55 = vpop.permute.xlu1 %2210 }
 0x9de   : > { %v2288_v13 = vpop.f32.mrf.mxu1  ;;  %v2283_v1 = vpop.f32.mrf.mxu0 }
 0x9df   : > { %v2289_v25 = vadd.f32 %v2288_v13, %v2191_v24  ;;  %v2284_v4 = vadd.f32 %v2283_v1, %v2181_v22 }
 0x9e1   : > { %v2315_v44 = vadd.f32 %v2307_v14, %v2289_v25  ;;  %v2313_v32 = vadd.f32 %v2305_v5, %v2284_v4 }
 0x9e3   : > { %2323 = vst [vmem:[%s3160_s20 + $0x10] sm:$0xff] %v2315_v44 }
 0x9e4   : > { %2321 = vst [vmem:[%s3160_s20] sm:$0xff] %v2313_v32 }
 0x9e6   : > { %v2290_v21 = vpop.f32.mrf.mxu1  ;;  %v2285_v39 = vpop.f32.mrf.mxu0 }
 0x9e7   : > { %v2291_v27 = vadd.f32 %v2290_v21, %v2196_v23  ;;  %v2286_v37 = vadd.f32 %v2285_v39, %v2186_v28 }
 0x9e9   : > { %v2316_v50 = vadd.f32 %v2308_v57, %v2291_v27  ;;  %v2314_v33 = vadd.f32 %v2306_v45, %v2286_v37 }
 0x9eb   : > { %2324 = vst [vmem:[%s3160_s20 + $0x18] sm:$0xff] %v2316_v50 }
 0x9ec   : > { %2322 = vst [vmem:[%s3160_s20 + $0x8] sm:$0xff] %v2314_v33 }
 0x9ee   : > { %v2293_v52 = vpop.f32.mrf.mxu1 }
 0x9ef   : > { %v2294_v53 = vadd.f32 %v2293_v52, %v2201_v12 }
 0x9f1   : > { %v2317_v31 = vadd.f32 %v2309_v15, %v2294_v53 }
 0x9f3   : > { %2325 = vst [vmem:[%s3160_s20 + $0x20] sm:$0xff] %v2317_v31 }
 0x9f6   : > { %v2295_v9 = vpop.f32.mrf.mxu1 }
 0x9f7   : > { %v2296_v40 = vadd.f32 %v2295_v9, %v2206_v54 }
 0x9f9   : > { %v2318_v47 = vadd.f32 %v2310_v29, %v2296_v40 }
 0x9fb   : > { %2326 = vst [vmem:[%s3160_s20 + $0x28] sm:$0xff] %v2318_v47 }
 0x9fe   : > { %v2298_v20 = vpop.f32.mrf.mxu1 }
 0x9ff   : > { %v2299_v46 = vadd.f32 %v2298_v20, %v2211_v55 }
 0xa01   : > { %v2319_v18 = vadd.f32 %v2311_v8, %v2299_v46 }
 0xa03   : > { %2327 = vst [vmem:[%s3160_s20 + $0x30] sm:$0xff] %v2319_v18 }
 0xa06   : > { %v2300_v30 = vpop.f32.mrf.mxu1 }
 0xa07   : > { %v2301_v6 = vadd.f32 %v2300_v30, %v2216_v42 }
 0xa09   : > { %v2320_v35 = vadd.f32 %v2312_v36, %v2301_v6 }
 0xa0b   : > { %2328 = vst [vmem:[%s3160_s20 + $0x38] sm:$0xff] %v2320_v35 }
 0xa0c   : > { %2934 = shalt.err (!%p2931_p7)
}
 0xa0d   : > { %s3006_s20 = smov 128   ;;  %s3007_s17 = smov 256  }
 0xa0e   : > { %s3008_s28 = smov 8  }
 0xa0f   : > { %2709 = dma.vmem_to_hbm [thread:$0]  (%p3130_p3), %s2344_s24, 1024, %s2346_s16, %s2330_s29, %s3006_s20, %s3007_s17, %s3008_s28  }
 0xa10 PF: > { %s3976_s1 = sld [smem:[#allocation10_spill]] }
 0xa11   : > { %s3977_s2 = sld [smem:[#allocation8_spill]] }
 0xa16   : > { %p2715_p9 = scmp.ge.s32.totalorder %s3976_s1, 2 }
 0xa17   : > { %s2360_s25 = sand.u32 1, %s3977_s2  }
 0xa18   : > { %p2712_p10 = pnand %p2715_p9, %p3139_p8  ;;  %s2361_s0 = scalar_lea.sflag [#allocation6], %s2360_s25 }
 0xa1a   : > { %p2713_p11 = pneg %p2712_p10 }
 0xa1c   : > { %2968 = dma.done.wait (%p2713_p11), %s2361_s0, 1024  }
 0xa1d   : > { %2970 = vsyncadd (%p2713_p11), %s2361_s0, 4294966272  ;;  %s26_s15 = sadd.s32 1, %s3976_s1   ;;  %s3979_s28 = sld [smem:[#allocation9_spill]] }
 0xa1e   : > { %p23_p12 = scmp.ge.s32.totalorder %s26_s15, 6   ;;  %s3980_s30 = sld [smem:[#allocation11_spill]] }
 0xa1f   : > { %s3981_s23 = sld [smem:[#allocation13_spill]]  ;;  %s3982_s25 = smov %s2977_s26 }
 0xa20   : > { %s3983_s26 = smov %s2981_s27  ;;  %s3984_s27 = smov %s3148_s18 }
 0xa21   : > { %s3985_s29 = smov %s2997_s14  ;;  %25 = sbr.rel (!%p23_p12) target bundleno = 10 (0xa), region = 113 }
 0xa25   : > { %s3986_s14 = smov %s3981_s23 }
 0xa26   :  { %2367 = vsyncpa [#allocation6], 1 }
 0xa27   :  { %2369 = vsyncpa [#allocation6 + $0x1], 1 }

// kernel: tpu_custom_call.1
= control target key start
LH: loop header
LB: loop body
LE: loop exit
PB: predicated region body
PF: predicated region fallthrough
CT: control target
= control target key end

     0   :  { %s3931_s0 = inlined_call_operand.vmem [shape: f32[2,64,256], index: 0, kind: input, shape index: {}]   ;;  %s3932_s1 = inlined_call_operand.vmem [shape: f32[64,1], index: 1, kind: input, shape index: {}]   ;;  %s3933_s2 = inlined_call_operand.vmem [shape: f32[64,1], index: 2, kind: input, shape index: {}]   ;;  %s3934_s3 = inlined_call_operand.vmem [shape: f32[64,32], index: 3, kind: input, shape index: {}]   ;;  %s3935_s4 = inlined_call_operand.vmem [shape: f32[32,64], index: 4, kind: input, shape index: {}]   ;;  %s3936_s5 = inlined_call_operand.vmem [shape: bf16[64,64], index: 5, kind: input, shape index: {}]   ;;  %s3937_s6 = inlined_call_operand.vmem [shape: bf16[64,64], index: 6, kind: input, shape index: {}]   ;;  %s3938_s7 = inlined_call_operand.vmem [shape: bf16[64,64], index: 7, kind: input, shape index: {}]   ;;  %s3939_s8 = inlined_call_operand.vmem [shape: bf16[64,64], index: 8, kind: input, shape index: {}]   ;;  %s3940_s9 = inlined_call_operand.vmem [shape: f32[1,64], index: 9, kind: input, shape index: {}]   ;;  %s3941_s10 = inlined_call_operand.vmem [shape: f32[64,1], index: 10, kind: input, shape index: {}]   ;;  %s3942_s11 = inlined_call_operand.vmem [shape: f32[64,1], index: 11, kind: input, shape index: {}]   ;;  %s3943_s12 = inlined_call_operand.vmem [shape: f32[64,1], index: 12, kind: input, shape index: {}]   ;;  %s3944_s13 = inlined_call_operand.hbm [shape: f32[2,64,256], index: 13, kind: output, shape index: {}]  }
   0x1   :  { %3955 = sst [smem:[#allocation15_spill]] %s3931_s0 }
   0x2   :  { %3956 = sst [smem:[#allocation16_spill]] %s3932_s1 }
   0x3   :  { %3957 = sst [smem:[#allocation17_spill]] %s3933_s2 }
   0x4   :  { %3958 = sst [smem:[#allocation18_spill]] %s3934_s3 }
   0x5   :  { %18 = vsyncpa [#allocation6], 0 }
   0x6   :  { %20 = vsyncpa [#allocation6 + $0x1], 0  ;;  %s3077_s25 = smov 0   ;;  %s3079_s26 = smov 0  }
   0x7   :  { %s3081_s27 = smov 0   ;;  %s3083_s28 = smov 0  }
   0x8   :  { %s3085_s29 = smov 0   ;;  %s3087_s30 = smov 0  }
   0x9   :  { %s3089_s14 = smov 0   ;;  %s3091_s15 = smov 0  }
   0xa LB: > { %3959 = sst [smem:[#allocation8_spill]] %s2971_s25  ;;  %s2425_s16 = sadd.s32 4294967295, %s2999_s15   ;;  %s2999_s15 = sphi %s3091_s15, %s26_s15   ;;  %s2995_s14 = sphi %s3089_s14, %s3984_s14   ;;  %s2991_s30 = sphi %s3087_s30, %s3978_s30   ;;  %s2987_s29 = sphi %s3085_s29, %s3983_s29   ;;  %s2983_s28 = sphi %s3083_s28, %s3977_s28   ;;  %s2979_s27 = sphi %s3081_s27, %s3982_s27   ;;  %s2975_s26 = sphi %s3079_s26, %s3981_s26   ;;  %s2971_s25 = sphi %s3077_s25, %s3980_s25  }
   0xb   : > { %3960 = sst [smem:[#allocation9_spill]] %s2991_s30  ;;  %s2426_s17 = sadd.s32 4294967294, %s2999_s15  }
   0xc   : > { %3961 = sst [smem:[#allocation10_spill]] %s2999_s15  ;;  %s35_s18 = sadd.s32 1, %s2991_s30 }
   0xd   : > { %p36_p0 = scmp.ge.s32.totalorder %s35_s18, 2  ;;  %s38_s19 = sadd.s32 1, %s2995_s14 }
   0xe   : > { %p335_p1 = scmp.ne.s32.totalorder %s2979_s27, %s2975_s26  ;;  %p336_p2 = scmp.eq.s32.totalorder %s2425_s16, 3 }
   0xf   : > { %s3986_s18 = smov (%p36_p0, %s35_s18), 0  ;;  %s3988_s19 = smov (!%p36_p0, %s38_s19), %s2995_s14 }
  0x10   : > { %3962 = sst [smem:[#allocation11_spill]] %s3986_s18  ;;  %s321_s20 = ssub.s32 %s2991_s30, %s3986_s18 }
  0x11   : > { %p3128_p3 = por %p336_p2, %p335_p1  ;;  %p40_p4 = scmp.ge.s32.totalorder %s3988_s19, 2 }
  0x12   : > { %p341_p5 = scmp.ne.s32.totalorder %s2975_s26, %s2971_s25  ;;  %p342_p6 = scmp.eq.s32.totalorder %s2426_s17, 3 }
  0x13   : > { %s3963_s21 = scalar_select %p3128_p3, 1, 0 }
  0x14   : > { %p2429_p7 = scmp.ge.s32.totalorder %s2999_s15, 1  ;;  %s3990_s19 = smov (%p40_p4, %s3988_s19), 0 }
  0x15   : > { %3964 = sst [smem:[#allocation12_spill]] %s3963_s21  ;;  %p3137_p8 = por %p342_p6, %p341_p5 }
  0x16   : > { %3965 = sst [smem:[#allocation13_spill]] %s3990_s19  ;;  %p404_p9 = scmp.lt.s32.totalorder %s2999_s15, 5 }
  0x17   : > { %s3966_s22 = scalar_select %p3137_p8, 1, 0 }
  0x18   : > { %s320_s23 = ssub.s32 %s2995_s14, %s3990_s19  ;;  %s325_s24 = sadd.s32 1, %s2979_s27 }
  0x19   : > { %3967 = sst [smem:[#allocation14_spill]] %s3966_s22  ;;  %s322_s16 = sor.u32 %s321_s20, %s320_s23 }
  0x1a   : > { %p405_p10 = pnand %p2429_p7, %p404_p9  ;;  %p323_p11 = scmp.eq.s32.totalorder %s322_s16, 0 }
  0x1b   : > { %s3954_s17 = sand.u32 (!%p405_p10), 1, %s2975_s26   ;;  %p448_p12 = scmp.lt.s32.totalorder (!%p405_p10), %s2987_s29, 1 }
  0x1c   : > { %s3146_s18 = scalar_select %p323_p11, %s2979_s27, %s325_s24  }
  0x1d   : > { %408 = sbr.rel (%p405_p10) target bundleno = 2576 (0xa10), region = 72  ;;  %s2430_s30 = sshll.u32 (!%p405_p10), %s3954_s17, 6 }
  0x1e   : > { %s3968_s0 = sld [smem:[#allocation15_spill]] (!%p405_p10)  ;;  %s3158_s20 = scalar_lea.vmem (!%p405_p10), [#allocation5], %s2430_s30 }
  0x1f   : > { %p2433_p13 = scmp.ne.s32.totalorder (!%p405_p10), %s2983_s28, 0 }
  0x22   : > { %s449_s25 = scalar_select %p448_p12, %s2987_s29, 1 }
  0x23   : > { %457 = sbr.rel (%p2433_p13) target bundleno = 1484 (0x5cc), region = 76  ;;  %s3969_s3 = sld [smem:[#allocation18_spill]] (!%p2433_p13) }
  0x24   : > { %s2654_s21 = sshll.u32 %s449_s25, 7  ;;  %s3970_s1 = sld [smem:[#allocation16_spill]] (!%p2433_p13) }
  0x25   : > { %s3156_s19 = scalar_lea.vmem %s3968_s0, %s2654_s21  ;;  %s3971_s2 = sld [smem:[#allocation17_spill]] (!%p2433_p13) }
  0x28   : > { %v3162_v0 = vld [vmem:[%s3156_s19 + $0x70] sm:$0xff]  ;;  %v3165_v1 = vld [vmem:[%s3156_s19 + $0x78] sm:$0xff]  ;;  %v3186_v9 = vld [vmem:[%s3156_s19 + $0x60] sm:$0xff]  ;;  %vm510_vm0 = vcmask 523264   ;;  %v3001_v36 = vmov 512.0   ;;  %vm571_vm2 = vcmask 261120  }
  0x29   : > { %v3168_v2 = vld [vmem:[%s3156_s19 + $0x50] sm:$0xff]  ;;  %v495_v3 = vadd.f32 %v3165_v1, %v3162_v0  ;;  %v3173_v4 = vld [vmem:[%s3156_s19 + $0x58] sm:$0xff]  ;;  %v3189_v10 = vld [vmem:[%s3156_s19 + $0x68] sm:$0xff]  ;;  %2787 = vrcp.f32 %v3001_v36  ;;  %v3002_v59 = vmov 0  }
  0x2a   : > { %v489_v5 = vadd.f32 %v3173_v4, %v3168_v2  ;;  %v3178_v6 = vld [vmem:[%s3156_s19 + $0x30] sm:$0xff]  ;;  %v3181_v7 = vld [vmem:[%s3156_s19 + $0x38] sm:$0xff]  ;;  %v3192_v11 = vld [vmem:[%s3156_s19 + $0x40] sm:$0xff]  ;;  %v492_v15 = vadd.f32 %v3189_v10, %v3186_v9  ;;  %2786 = vset.pattern.permute.xlu2 %v3002_v59  ;;  %2785 = vset.pattern.permute.xlu1 %v3002_v59 }
  0x2b   : > { %496 = vadd.xlane.f32.xlu0 %v495_v3  ;;  %v483_v8 = vadd.f32 %v3181_v7, %v3178_v6  ;;  %v3195_v12 = vld [vmem:[%s3156_s19 + $0x48] sm:$0xff]  ;;  %v3198_v13 = vld [vmem:[%s3156_s19 + $0x20] sm:$0xff]  ;;  %v3210_v18 = vld [vmem:[%s3156_s19 + $0x10] sm:$0xff] }
  0x2c   : > { %490 = vadd.xlane.f32.xlu1 %v489_v5  ;;  %v3201_v14 = vld [vmem:[%s3156_s19 + $0x28] sm:$0xff]  ;;  %v486_v16 = vadd.f32 %v3195_v12, %v3192_v11  ;;  %v3213_v19 = vld [vmem:[%s3156_s19 + $0x18] sm:$0xff]  ;;  %v3216_v20 = vld [vmem:[%s3156_s19] sm:$0xff]  ;;  %2784 = vset.pattern.permute.xlu0 %v3002_v59 }
  0x2d   : > { %484 = vadd.xlane.f32.xlu2 %v483_v8  ;;  %v480_v17 = vadd.f32 %v3201_v14, %v3198_v13  ;;  %v3219_v21 = vld [vmem:[%s3156_s19 + $0x8] sm:$0xff]  ;;  %v477_v22 = vadd.f32 %v3213_v19, %v3210_v18  ;;  %v3228_v32 = vld [vmem:[%s3935_s4] sm:$0xff]  ;;  %v3242_v34 = vld [vmem:[%s3935_s4 + $0x10] sm:$0xff] }
  0x2e   : > { %v474_v23 = vadd.f32 %v3219_v21, %v3216_v20  ;;  %v3235_v33 = vld [vmem:[%s3935_s4 + $0x8] sm:$0xff]  ;;  %v3249_v35 = vld [vmem:[%s3935_s4 + $0x18] sm:$0xff]  ;;  %v3262_v51 = vld [vmem:[%s3969_s3] sm:$0xff] }
  0x2f   : > { %v2788_v38 = vpop.eup %2787  ;;  %v3269_v52 = vld [vmem:[%s3969_s3 + $0x8] sm:$0xff]  ;;  %v3276_v53 = vld [vmem:[%s3969_s3 + $0x10] sm:$0xff]  ;;  %v3283_v54 = vld [vmem:[%s3969_s3 + $0x18] sm:$0xff] }
  0x30   : > { %v553_v39 = vmul.f32 512.0, %v2788_v38  ;;  %vm557_vm1 = vweird.f32 %v2788_v38  ;;  %v3290_v55 = vld [vmem:[%s3969_s3 + $0x20] sm:$0xff]  ;;  %v3297_v56 = vld [vmem:[%s3969_s3 + $0x28] sm:$0xff]  ;;  %v3304_v57 = vld [vmem:[%s3969_s3 + $0x30] sm:$0xff] }
  0x31   : > { %v3311_v58 = vld [vmem:[%s3969_s3 + $0x38] sm:$0xff] }
  0x32   : > { %v554_v41 = vsub.f32 1.0, %v553_v39 }
  0x33   : > { %493 = vadd.xlane.f32.xlu0 %v492_v15 }
  0x34   : > { %487 = vadd.xlane.f32.xlu1 %v486_v16  ;;  %v555_v42 = vmul.f32 %v2788_v38, %v554_v41 }
  0x35   : > { %481 = vadd.xlane.f32.xlu2 %v480_v17 }
  0x36   : > { %v556_v44 = vadd.f32 %v2788_v38, %v555_v42 }
  0x38   : > { %v3253_v45 = vsel %vm557_vm1, %v2788_v38, %v556_v44 }
  0x3b   : > { %478 = vadd.xlane.f32.xlu0 %v477_v22 }
  0x3c   : > { %475 = vadd.xlane.f32.xlu1 %v474_v23 }
  0x9e   : > { %v497_v24 = vpop.xlane.xlu0 %496 }
  0x9f   : > { %531 = vmatpush.msra.mxu0 %v497_v24  ;;  %v491_v25 = vpop.xlane.xlu1 %490 }
  0xa0   : > { %v485_v26 = vpop.xlane.xlu2 %484 }
  0xa6   : > { %v494_v27 = vpop.xlane.xlu0 %493 }
  0xa7   : > { %532 = vmatpush.msra.mxu0 %v494_v27  ;;  %v488_v28 = vpop.xlane.xlu1 %487 }
  0xa8   : > { %v482_v29 = vpop.xlane.xlu2 %481 }
  0xa9   : > { %533 = vmatpush.msra.mxu0 %v491_v25 }
  0xab   : > { %534 = vmatpush.msra.mxu0 %v488_v28 }
  0xad   : > { %535 = vmatpush.msra.mxu0 %v485_v26 }
  0xae   : > { %v479_v30 = vpop.xlane.xlu0 %478 }
  0xaf   : > { %536 = vmatpush.msra.mxu0 %v482_v29  ;;  %v476_v31 = vpop.xlane.xlu1 %475 }
  0xb1   : > { %537 = vmatpush.msra.mxu0 %v479_v30 }
  0xb3   : > { %538 = vmatpush.msra.mxu0 %v476_v31 }
  0xb4   : > { %2434 = vmatmul.msk.f32.vlgmr.msra.gmra.mxu0 %vm510_vm0, %v3228_v32 }
  0xbc   : > { %2435 = vmatmul.msk.f32.gmra.mxu0 %vm510_vm0, %v3235_v33 }
  0xc4   : > { %2436 = vmatmul.msk.f32.gmra.mxu0 %vm510_vm0, %v3242_v34 }
  0xcc   : > { %2437 = vmatmul.msk.f32.gmra.mxu0 %vm510_vm0, %v3249_v35 }
 0x131   : > { %v540_v37 = vpop.f32.mrf.mxu0 }
 0x132   : > { %v559_v50 = vmul.f32 %v3253_v45, %v540_v37 }
 0x139   : > { %v543_v40 = vpop.f32.mrf.mxu0 }
 0x13a   : > { %v560_v49 = vmul.f32 %v3253_v45, %v543_v40 }
 0x141   : > { %v546_v43 = vpop.f32.mrf.mxu0 }
 0x142   : > { %v561_v48 = vmul.f32 %v3253_v45, %v546_v43 }
 0x149   : > { %v549_v46 = vpop.f32.mrf.mxu0 }
 0x14a   : > { %v562_v47 = vmul.f32 %v3253_v45, %v549_v46 }
 0x14c   : > { %608 = vmatpush.msra.mxu1 %v562_v47 }
 0x14e   : > { %609 = vmatpush.msra.mxu1 %v561_v48 }
 0x150   : > { %610 = vmatpush.msra.mxu1 %v560_v49 }
 0x152   : > { %611 = vmatpush.msra.mxu1 %v559_v50 }
 0x153   : > { %2438 = vmatmul.msk.f32.vlgmr.msra.gmra.mxu1 %vm571_vm2, %v3262_v51 }
 0x15b   : > { %2439 = vmatmul.msk.f32.gmra.mxu1 %vm571_vm2, %v3269_v52 }
 0x163   : > { %2440 = vmatmul.msk.f32.gmra.mxu1 %vm571_vm2, %v3276_v53 }
 0x16b   : > { %2441 = vmatmul.msk.f32.gmra.mxu1 %vm571_vm2, %v3283_v54 }
 0x173   : > { %2442 = vmatmul.msk.f32.gmra.mxu1 %vm571_vm2, %v3290_v55 }
 0x17b   : > { %2443 = vmatmul.msk.f32.gmra.mxu1 %vm571_vm2, %v3297_v56 }
 0x183   : > { %2444 = vmatmul.msk.f32.gmra.mxu1 %vm571_vm2, %v3304_v57 }
 0x18b   : > { %2445 = vmatmul.msk.f32.gmra.mxu1 %vm571_vm2, %v3311_v58 }
 0x1d0   : > { %v3315_v60 = vpop.f32.mrf.mxu1 }
 0x1d8   : > { %v3317_v61 = vpop.f32.mrf.mxu1 }
 0x1e0   : > { %v3319_v62 = vpop.f32.mrf.mxu1 }
 0x1e8   : > { %v3321_v63 = vpop.f32.mrf.mxu1 }
 0x1f0   : > { %v3323_v3 = vpop.f32.mrf.mxu1 }
 0x1f1   : > { %659 = vperm.xlu2 %2786, %v3323_v3  }
 0x1f8   : > { %v3326_v5 = vpop.f32.mrf.mxu1 }
 0x1f9   : > { %664 = vperm.xlu1 %2785, %v3326_v5  }
 0x200   : > { %v3329_v8 = vpop.f32.mrf.mxu1 }
 0x201   : > { %649 = vperm.xlu1 %2785, %v3319_v62   ;;  %669 = vperm.xlu0 %2784, %v3329_v8  }
 0x208   : > { %v3333_v15 = vpop.f32.mrf.mxu1 }
 0x209   : > { %639 = vperm.xlu1 %2785, %v3315_v60   ;;  %674 = vperm.xlu2 %2786, %v3333_v15  }
 0x211   : > { %654 = vperm.xlu2 %2786, %v3321_v63  }
 0x219   : > { %644 = vperm.xlu2 %2786, %v3317_v61  }
 0x24b   : > { %v660_v16 = vpop.permute.xlu2 %659 }
 0x263   : > { %v675_v17 = vpop.permute.xlu2 %674 }
 0x264   : > { %v691_v22 = vsub.f32 %v3162_v0, %v675_v17  ;;  %v692_v23 = vsub.f32 %v3165_v1, %v675_v17 }
 0x266   : > { %v707_v24 = vmul.f32 %v691_v22, %v691_v22  ;;  %v708_v25 = vmul.f32 %v692_v23, %v692_v23  ;;  %v685_v23 = vsub.f32 %v3192_v11, %v660_v16 }
 0x268   : > { %v730_v26 = vadd.f32 %v708_v25, %v707_v24  ;;  %v686_v24 = vsub.f32 %v3195_v12, %v660_v16 }
 0x26a   : > { %731 = vadd.xlane.f32.xlu0 %v730_v26 }
 0x26b   : > { %v665_v27 = vpop.permute.xlu1 %664  ;;  %v655_v28 = vpop.permute.xlu2 %654 }
 0x26c   : > { %v687_v29 = vsub.f32 %v3168_v2, %v665_v27  ;;  %v688_v30 = vsub.f32 %v3173_v4, %v665_v27  ;;  %v683_v31 = vsub.f32 %v3178_v6, %v655_v28  ;;  %v684_v36 = vsub.f32 %v3181_v7, %v655_v28 }
 0x26d   : > { %v701_v28 = vmul.f32 %v685_v23, %v685_v23 }
 0x26e   : > { %v703_v37 = vmul.f32 %v687_v29, %v687_v29  ;;  %v704_v38 = vmul.f32 %v688_v30, %v688_v30  ;;  %v699_v39 = vmul.f32 %v683_v31, %v683_v31  ;;  %v700_v40 = vmul.f32 %v684_v36, %v684_v36 }
 0x26f   : > { %v702_v29 = vmul.f32 %v686_v24, %v686_v24 }
 0x270   : > { %v724_v41 = vadd.f32 %v704_v38, %v703_v37  ;;  %v718_v42 = vadd.f32 %v700_v40, %v699_v39 }
 0x272   : > { %725 = vadd.xlane.f32.xlu1 %v724_v41  ;;  %719 = vadd.xlane.f32.xlu0 %v718_v42  ;;  %v721_v41 = vadd.f32 %v702_v29, %v701_v28 }
 0x273   : > { %v650_v43 = vpop.permute.xlu1 %649  ;;  %v670_v44 = vpop.permute.xlu0 %669 }
 0x274   : > { %v681_v46 = vsub.f32 %v3198_v13, %v650_v43  ;;  %v682_v47 = vsub.f32 %v3201_v14, %v650_v43  ;;  %v689_v48 = vsub.f32 %v3186_v9, %v670_v44  ;;  %v690_v49 = vsub.f32 %v3189_v10, %v670_v44  ;;  %v645_v36 = vpop.permute.xlu2 %644 }
 0x275   : > { %v679_v39 = vsub.f32 %v3210_v18, %v645_v36  ;;  %v680_v40 = vsub.f32 %v3213_v19, %v645_v36 }
 0x276   : > { %v697_v50 = vmul.f32 %v681_v46, %v681_v46  ;;  %v698_v59 = vmul.f32 %v682_v47, %v682_v47  ;;  %v705_v17 = vmul.f32 %v689_v48, %v689_v48  ;;  %v706_v22 = vmul.f32 %v690_v49, %v690_v49 }
 0x277   : > { %v695_v42 = vmul.f32 %v679_v39, %v679_v39  ;;  %v696_v43 = vmul.f32 %v680_v40, %v680_v40 }
 0x278   : > { %v715_v25 = vadd.f32 %v698_v59, %v697_v50  ;;  %v727_v26 = vadd.f32 %v706_v22, %v705_v17 }
 0x279   : > { %v712_v44 = vadd.f32 %v696_v43, %v695_v42 }
 0x27a   : > { %716 = vadd.xlane.f32.xlu1 %v715_v25  ;;  %728 = vadd.xlane.f32.xlu2 %v727_v26 }
 0x27b   : > { %v640_v27 = vpop.permute.xlu1 %639 }
 0x27c   : > { %v677_v30 = vsub.f32 %v3216_v20, %v640_v27  ;;  %v678_v31 = vsub.f32 %v3219_v21, %v640_v27 }
 0x27e   : > { %v693_v37 = vmul.f32 %v677_v30, %v677_v30  ;;  %v694_v38 = vmul.f32 %v678_v31, %v678_v31 }
 0x280   : > { %v709_v16 = vadd.f32 %v694_v38, %v693_v37  ;;  %v897_v38 = vld [vmem:[%s3970_s1 + $0x10] sm:$0xff] }
 0x282   : > { %722 = vadd.xlane.f32.xlu2 %v721_v41  ;;  %710 = vadd.xlane.f32.xlu0 %v709_v16 }
 0x28a   : > { %713 = vadd.xlane.f32.xlu2 %v712_v44 }
 0x2dd   : > { %v732_v46 = vpop.xlane.xlu0 %731 }
 0x2de   : > { %749 = vmatpush.msra.mxu2 %v732_v46 }
 0x2e5   : > { %v726_v48 = vpop.xlane.xlu1 %725  ;;  %v720_v50 = vpop.xlane.xlu0 %719 }
 0x2ed   : > { %v729_v47 = vpop.xlane.xlu2 %728  ;;  %v717_v59 = vpop.xlane.xlu1 %716 }
 0x2ee   : > { %750 = vmatpush.msra.mxu2 %v729_v47 }
 0x2f0   : > { %751 = vmatpush.msra.mxu2 %v726_v48 }
 0x2f5   : > { %v723_v49 = vpop.xlane.xlu2 %722  ;;  %v711_v22 = vpop.xlane.xlu0 %710 }
 0x2f6   : > { %752 = vmatpush.msra.mxu2 %v723_v49  ;;  %v898_v49 = vld [vmem:[%s3970_s1 + $0x18] sm:$0xff] }
 0x2f8   : > { %753 = vmatpush.msra.mxu2 %v720_v50 }
 0x2fa   : > { %754 = vmatpush.msra.mxu2 %v717_v59 }
 0x2fd   : > { %v714_v17 = vpop.xlane.xlu2 %713 }
 0x2fe   : > { %755 = vmatpush.msra.mxu2 %v714_v17 }
 0x300   : > { %756 = vmatpush.msra.mxu2 %v711_v22 }
 0x301   : > { %2446 = vmatmul.msk.f32.vlgmr.msra.gmra.mxu2 %vm510_vm0, %v3228_v32 }
 0x309   : > { %2447 = vmatmul.msk.f32.gmra.mxu2 %vm510_vm0, %v3235_v33 }
 0x311   : > { %2448 = vmatmul.msk.f32.gmra.mxu2 %vm510_vm0, %v3242_v34 }
 0x319   : > { %2449 = vmatmul.msk.f32.gmra.mxu2 %vm510_vm0, %v3249_v35 }
 0x384   : > { %v758_v23 = vpop.f32.mrf.mxu2 }
 0x385   : > { %v770_v33 = vmul.f32 %v758_v23, %v3253_v45 }
 0x38c   : > { %v761_v24 = vpop.f32.mrf.mxu2 }
 0x38d   : > { %v771_v32 = vmul.f32 %v761_v24, %v3253_v45 }
 0x394   : > { %v764_v25 = vpop.f32.mrf.mxu2 }
 0x395   : > { %v772_v28 = vmul.f32 %v764_v25, %v3253_v45 }
 0x39c   : > { %v767_v26 = vpop.f32.mrf.mxu2 }
 0x39d   : > { %v773_v27 = vmul.f32 %v767_v26, %v3253_v45 }
 0x39f   : > { %786 = vmatpush.msra.mxu3 %v773_v27 }
 0x3a1   : > { %787 = vmatpush.msra.mxu3 %v772_v28 }
 0x3a3   : > { %788 = vmatpush.msra.mxu3 %v771_v32 }
 0x3a5   : > { %789 = vmatpush.msra.mxu3 %v770_v33  ;;  %v899_v33 = vld [vmem:[%s3970_s1 + $0x20] sm:$0xff] }
 0x3a6   : > { %2450 = vmatmul.msk.f32.vlgmr.msra.gmra.mxu3 %vm571_vm2, %v3262_v51 }
 0x3ae   : > { %2451 = vmatmul.msk.f32.gmra.mxu3 %vm571_vm2, %v3269_v52 }
 0x3b6   : > { %2452 = vmatmul.msk.f32.gmra.mxu3 %vm571_vm2, %v3276_v53 }
 0x3be   : > { %2453 = vmatmul.msk.f32.gmra.mxu3 %vm571_vm2, %v3283_v54 }
 0x3c6   : > { %2454 = vmatmul.msk.f32.gmra.mxu3 %vm571_vm2, %v3290_v55 }
 0x3ce   : > { %2455 = vmatmul.msk.f32.gmra.mxu3 %vm571_vm2, %v3297_v56 }
 0x3d6   : > { %2456 = vmatmul.msk.f32.gmra.mxu3 %vm571_vm2, %v3304_v57 }
 0x3de   : > { %2457 = vmatmul.msk.f32.gmra.mxu3 %vm571_vm2, %v3311_v58 }
 0x429   : > { %v791_v34 = vpop.f32.mrf.mxu3 }
 0x42a   : > { %v3395_v23 = vadd.f32 1e-05, %v791_v34 }
 0x431   : > { %v794_v35 = vpop.f32.mrf.mxu3 }
 0x432   : > { %v3401_v34 = vadd.f32 1e-05, %v794_v35 }
 0x439   : > { %v797_v45 = vpop.f32.mrf.mxu3 }
 0x43a   : > { %v798_v51 = vadd.f32 1e-05, %v797_v45 }
 0x43c   : > { %2789 = vrsqrt.f32 %v798_v51  ;;  %vm841_vm4 = vweird.f32 %v798_v51 }
 0x441   : > { %v800_v52 = vpop.f32.mrf.mxu3 }
 0x442   : > { %v2790_v53 = vpop.eup %2789  ;;  %v801_v54 = vadd.f32 1e-05, %v800_v52 }
 0x443   : > { %v836_v29 = vmul.f32 %v2790_v53, %v798_v51  ;;  %vm842_vm3 = vweird.f32 %v2790_v53 }
 0x444   : > { %2791 = vrsqrt.f32 %v801_v54  ;;  %vm843_vm5 = vmor %vm841_vm4, %vm842_vm3  ;;  %vm851_vm7 = vweird.f32 %v801_v54 }
 0x445   : > { %v837_v55 = vmul.f32 %v2790_v53, %v836_v29 }
 0x447   : > { %v838_v30 = vmul.f32 0.5, %v837_v55 }
 0x449   : > { %v839_v31 = vsub.f32 1.5, %v838_v30  ;;  %v803_v56 = vpop.f32.mrf.mxu3 }
 0x44a   : > { %v2792_v36 = vpop.eup %2791  ;;  %v804_v57 = vadd.f32 1e-05, %v803_v56 }
 0x44b   : > { %v846_v37 = vmul.f32 %v2792_v36, %v801_v54  ;;  %v840_v58 = vmul.f32 %v2790_v53, %v839_v31  ;;  %vm852_vm6 = vweird.f32 %v2792_v36  ;;  %v915_v54 = vld [vmem:[%s3971_s2 + $0x20] sm:$0xff] }
 0x44c   : > { %2793 = vrsqrt.f32 %v804_v57  ;;  %vm853_vm8 = vmor %vm851_vm7, %vm852_vm6  ;;  %vm861_vm10 = vweird.f32 %v804_v57  ;;  %vm821_vm7 = vweird.f32 %v3395_v23 }
 0x44d   : > { %v847_v39 = vmul.f32 %v2792_v36, %v846_v37  ;;  %v844_v40 = vsel %vm843_vm5, %v2790_v53, %v840_v58  ;;  %v900_v58 = vld [vmem:[%s3970_s1 + $0x28] sm:$0xff] }
 0x44e   : > { %v3386_v41 = vmul.f32 %v897_v38, %v844_v40 }
 0x44f   : > { %v848_v16 = vmul.f32 0.5, %v847_v39 }
 0x450   : > { %947 = vperm.xlu2 %2786, %v3386_v41  }
 0x451   : > { %v849_v42 = vsub.f32 1.5, %v848_v16  ;;  %v806_v43 = vpop.f32.mrf.mxu3 }
 0x452   : > { %v2794_v44 = vpop.eup %2793  ;;  %v807_v46 = vadd.f32 1e-05, %v806_v43 }
 0x453   : > { %v856_v47 = vmul.f32 %v2794_v44, %v804_v57  ;;  %v850_v48 = vmul.f32 %v2792_v36, %v849_v42  ;;  %vm862_vm9 = vweird.f32 %v2794_v44  ;;  %v916_v42 = vld [vmem:[%s3971_s2 + $0x28] sm:$0xff] }
 0x454   : > { %2795 = vrsqrt.f32 %v807_v46  ;;  %vm863_vm11 = vmor %vm861_vm10, %vm862_vm9  ;;  %vm871_vm13 = vweird.f32 %v807_v46  ;;  %vm831_vm10 = vweird.f32 %v3401_v34 }
 0x455   : > { %v857_v50 = vmul.f32 %v2794_v44, %v856_v47  ;;  %v854_v59 = vsel %vm853_vm8, %v2792_v36, %v850_v48 }
 0x456   : > { %v3392_v17 = vmul.f32 %v898_v49, %v854_v59 }
 0x457   : > { %v858_v22 = vmul.f32 0.5, %v857_v50 }
 0x458   : > { %952 = vperm.xlu1 %2785, %v3392_v17  }
 0x459   : > { %v859_v24 = vsub.f32 1.5, %v858_v22  ;;  %v809_v25 = vpop.f32.mrf.mxu3 }
 0x45a   : > { %v2796_v26 = vpop.eup %2795  ;;  %v810_v27 = vadd.f32 1e-05, %v809_v25 }
 0x45b   : > { %v866_v28 = vmul.f32 %v2796_v26, %v807_v46  ;;  %v860_v32 = vmul.f32 %v2794_v44, %v859_v24  ;;  %vm872_vm12 = vweird.f32 %v2796_v26  ;;  %v901_v24 = vld [vmem:[%s3970_s1 + $0x30] sm:$0xff] }
 0x45c   : > { %2797 = vrsqrt.f32 %v810_v27  ;;  %vm873_vm14 = vmor %vm871_vm13, %vm872_vm12  ;;  %vm881_vm1 = vweird.f32 %v810_v27 }
 0x45d   : > { %2799 = vrsqrt.f32 %v3395_v23  ;;  %v867_v45 = vmul.f32 %v2796_v26, %v866_v28  ;;  %v864_v51 = vsel %vm863_vm11, %v2794_v44, %v860_v32 }
 0x45e   : > { %v907_v52 = vmul.f32 %v899_v33, %v864_v51  ;;  %2801 = vrsqrt.f32 %v3401_v34 }
 0x45f   : > { %v868_v53 = vmul.f32 0.5, %v867_v45  ;;  %v917_v45 = vld [vmem:[%s3971_s2 + $0x30] sm:$0xff] }
 0x460   : > { %957 = vperm.xlu0 %2784, %v907_v52   ;;  %v923_v29 = vmul.f32 %v907_v52, %v3323_v3 }
 0x461   : > { %v869_v55 = vsub.f32 1.5, %v868_v53  ;;  %v812_v30 = vpop.f32.mrf.mxu3 }
 0x462   : > { %v2798_v31 = vpop.eup %2797  ;;  %v813_v56 = vadd.f32 1e-05, %v812_v30  ;;  %v931_v36 = vsub.f32 %v915_v54, %v923_v29 }
 0x463   : > { %v3408_v57 = vpop.eup %2799  ;;  %v876_v35 = vmul.f32 %v2798_v31, %v810_v27  ;;  %v870_v37 = vmul.f32 %v2796_v26, %v869_v55  ;;  %vm882_vm15 = vweird.f32 %v2798_v31  ;;  %v902_v55 = vld [vmem:[%s3970_s1 + $0x38] sm:$0xff] }
 0x464   : > { %2803 = vrsqrt.f32 %v813_v56  ;;  %1013 = vperm.xlu1 %2785, %v931_v36   ;;  %v816_v39 = vmul.f32 %v3408_v57, %v3395_v23  ;;  %v3418_v43 = vpop.eup %2801  ;;  %vm883_vm2 = vmor %vm881_vm1, %vm882_vm15  ;;  %vm891_vm4 = vweird.f32 %v813_v56  ;;  %v921_v36 = vmul.f32 %v3386_v41, %v3319_v62 }
 0x465   : > { %v877_v3 = vmul.f32 %v2798_v31, %v876_v35  ;;  %v874_v38 = vsel %vm873_vm14, %v2796_v26, %v870_v37  ;;  %v826_v50 = vmul.f32 %v3418_v43, %v3401_v34  ;;  %vm822_vm6 = vweird.f32 %v3408_v57  ;;  %v918_v35 = vld [vmem:[%s3971_s2 + $0x38] sm:$0xff] }
 0x466   : > { %v908_v40 = vmul.f32 %v900_v58, %v874_v38  ;;  %v817_v48 = vmul.f32 %v3408_v57, %v816_v39  ;;  %vm823_vm8 = vmor %vm821_vm7, %vm822_vm6  ;;  %vm832_vm9 = vweird.f32 %v3418_v43  ;;  %v914_v38 = vld [vmem:[%s3971_s2 + $0x18] sm:$0xff] }
 0x467   : > { %v878_v16 = vmul.f32 0.5, %v877_v3  ;;  %v827_v32 = vmul.f32 %v3418_v43, %v826_v50  ;;  %v922_v3 = vmul.f32 %v3392_v17, %v3321_v63  ;;  %vm833_vm11 = vmor %vm831_vm10, %vm832_vm9  ;;  %v1075_v50 = vld [vmem:[%s3941_s10 + $0x20] sm:$0xff] }
 0x468   : > { %962 = vperm.xlu2 %2786, %v908_v40   ;;  %v924_v44 = vmul.f32 %v908_v40, %v3326_v5  ;;  %v818_v28 = vmul.f32 0.5, %v817_v48 }
 0x469   : > { %v879_v46 = vsub.f32 1.5, %v878_v16  ;;  %v828_v54 = vmul.f32 0.5, %v827_v32  ;;  %v930_v63 = vsub.f32 %v914_v38, %v922_v3  ;;  %v896_v16 = vld [vmem:[%s3970_s1 + $0x8] sm:$0xff]  ;;  %v1276_v32 = vld [vmem:[%s3942_s11 + $0x18] sm:$0xff] }
 0x46a   : > { %v2804_v47 = vpop.eup %2803  ;;  %v932_v49 = vsub.f32 %v916_v42, %v924_v44  ;;  %v819_v53 = vsub.f32 1.5, %v818_v28  ;;  %v911_v44 = vld [vmem:[%s3971_s2] sm:$0xff] }
 0x46b   : > { %v886_v59 = vmul.f32 %v2804_v47, %v813_v56  ;;  %v880_v22 = vmul.f32 %v2798_v31, %v879_v46  ;;  %vm892_vm3 = vweird.f32 %v2804_v47  ;;  %v913_v56 = vld [vmem:[%s3971_s2 + $0x10] sm:$0xff]  ;;  %v1277_v28 = vld [vmem:[%s3942_s11 + $0x20] sm:$0xff] }
 0x46c   : > { %1018 = vperm.xlu0 %2784, %v932_v49   ;;  %vm893_vm5 = vmor %vm891_vm4, %vm892_vm3  ;;  %v820_v37 = vmul.f32 %v3408_v57, %v819_v53  ;;  %v929_v41 = vsub.f32 %v913_v56, %v921_v36  ;;  %v1073_v49 = vld [vmem:[%s3941_s10 + $0x10] sm:$0xff] }
 0x46d   : > { %v887_v25 = vmul.f32 %v2804_v47, %v886_v59  ;;  %v884_v5 = vsel %vm883_vm2, %v2798_v31, %v880_v22  ;;  %v1077_v59 = vld [vmem:[%s3941_s10 + $0x30] sm:$0xff]  ;;  %v1076_v22 = vld [vmem:[%s3941_s10 + $0x28] sm:$0xff] }
 0x46e   : > { %v909_v26 = vmul.f32 %v901_v24, %v884_v5  ;;  %v824_v40 = vsel %vm823_vm8, %v3408_v57, %v820_v37  ;;  %v1078_v24 = vld [vmem:[%s3941_s10 + $0x38] sm:$0xff]  ;;  %v1273_v5 = vld [vmem:[%s3942_s11] sm:$0xff] }
 0x46f   : > { %v888_v33 = vmul.f32 0.5, %v887_v25  ;;  %v1274_v25 = vld [vmem:[%s3942_s11 + $0x8] sm:$0xff] }
 0x470   : > { %967 = vperm.xlu1 %2785, %v909_v26   ;;  %v925_v27 = vmul.f32 %v909_v26, %v3329_v8  ;;  %v829_v8 = vsub.f32 1.5, %v828_v54  ;;  %v1275_v26 = vld [vmem:[%s3942_s11 + $0x10] sm:$0xff] }
 0x471   : > { %v889_v51 = vsub.f32 1.5, %v888_v33  ;;  %v1278_v33 = vld [vmem:[%s3942_s11 + $0x28] sm:$0xff] }
 0x472   : > { %v933_v52 = vsub.f32 %v917_v45, %v925_v27  ;;  %v830_v39 = vmul.f32 %v3418_v43, %v829_v8  ;;  %v1280_v45 = vld [vmem:[%s3942_s11 + $0x38] sm:$0xff]  ;;  %v1279_v27 = vld [vmem:[%s3942_s11 + $0x30] sm:$0xff] }
 0x473   : > { %v890_v29 = vmul.f32 %v2804_v47, %v889_v51 }
 0x474   : > { %1023 = vperm.xlu0 %2784, %v933_v52   ;;  %v834_v23 = vsel %vm833_vm11, %v3418_v43, %v830_v39  ;;  %v912_v43 = vld [vmem:[%s3971_s2 + $0x8] sm:$0xff] }
 0x475   : > { %v894_v30 = vsel %vm893_vm5, %v2804_v47, %v890_v29  ;;  %v904_v42 = vmul.f32 %v896_v16, %v834_v23  ;;  %v1071_v47 = vld [vmem:[%s3941_s10] sm:$0xff] }
 0x476   : > { %v910_v31 = vmul.f32 %v902_v55, %v894_v30 }
 0x477   : > { %v920_v46 = vmul.f32 %v904_v42, %v3317_v61  ;;  %v1074_v61 = vld [vmem:[%s3941_s10 + $0x18] sm:$0xff] }
 0x478   : > { %972 = vperm.xlu2 %2786, %v910_v31   ;;  %v926_v58 = vmul.f32 %v910_v31, %v3333_v15  ;;  %v895_v15 = vld [vmem:[%s3970_s1] sm:$0xff] }
 0x479   : > { %v903_v17 = vmul.f32 %v895_v15, %v824_v40  ;;  %v928_v48 = vsub.f32 %v912_v43, %v920_v46 }
 0x47a   : > { %v934_v62 = vsub.f32 %v918_v35, %v926_v58 }
 0x47b   : > { %v919_v57 = vmul.f32 %v903_v17, %v3315_v60  ;;  %v1072_v60 = vld [vmem:[%s3941_s10 + $0x8] sm:$0xff] }
 0x47c   : > { %1028 = vperm.xlu1 %2785, %v934_v62   ;;  %1003 = vperm.xlu0 %2784, %v929_v41  }
 0x47d   : > { %v927_v34 = vsub.f32 %v911_v44, %v919_v57 }
 0x480   : > { %1008 = vperm.xlu2 %2786, %v930_v63  }
 0x484   : > { %942 = vperm.xlu0 %2784, %v904_v42   ;;  %937 = vperm.xlu1 %2785, %v903_v17  }
 0x488   : > { %993 = vperm.xlu2 %2786, %v927_v34  }
 0x48c   : > { %1081 = vperm.xlu0 %2784, %v1071_v47   ;;  %998 = vperm.xlu1 %2785, %v928_v48  }
 0x490   : > { %1086 = vperm.xlu2 %2786, %v1072_v60  }
 0x494   : > { %1096 = vperm.xlu0 %2784, %v1074_v61   ;;  %1091 = vperm.xlu1 %2785, %v1073_v49  }
 0x498   : > { %1101 = vperm.xlu2 %2786, %v1075_v50  }
 0x49c   : > { %1111 = vperm.xlu0 %2784, %v1077_v59   ;;  %1106 = vperm.xlu1 %2785, %v1076_v22  }
 0x4a0   : > { %1116 = vperm.xlu2 %2786, %v1078_v24  }
 0x4a4   : > { %1288 = vperm.xlu0 %2784, %v1274_v25   ;;  %1283 = vperm.xlu1 %2785, %v1273_v5  }
 0x4a8   : > { %1293 = vperm.xlu2 %2786, %v1275_v26  }
 0x4aa   : > { %v948_v51 = vpop.permute.xlu2 %947 }
 0x4ab   : > { %v980_v42 = vmul.f32 %v948_v51, %v3201_v14 }
 0x4ac   : > { %1303 = vperm.xlu0 %2784, %v1277_v28   ;;  %1298 = vperm.xlu1 %2785, %v1276_v32  }
 0x4b0   : > { %1308 = vperm.xlu2 %2786, %v1278_v33  }
 0x4b4   : > { %1318 = vperm.xlu0 %2784, %v1280_v45   ;;  %1313 = vperm.xlu1 %2785, %v1279_v27  }
 0x4c2   : > { %v963_v52 = vpop.permute.xlu2 %962 }
 0x4c3   : > { %v985_v3 = vmul.f32 %v963_v52, %v3168_v2  ;;  %v986_v38 = vmul.f32 %v963_v52, %v3173_v4  ;;  %v979_v4 = vmul.f32 %v948_v51, %v3198_v13 }
 0x4ca   : > { %v953_v53 = vpop.permute.xlu1 %952 }
 0x4cb   : > { %v981_v35 = vmul.f32 %v953_v53, %v3178_v6  ;;  %v982_v56 = vmul.f32 %v953_v53, %v3181_v7 }
 0x4d2   : > { %v958_v54 = vpop.permute.xlu0 %957  ;;  %v973_v29 = vpop.permute.xlu2 %972 }
 0x4d3   : > { %v983_v55 = vmul.f32 %v958_v54, %v3192_v11  ;;  %v984_v30 = vmul.f32 %v958_v54, %v3195_v12  ;;  %v989_v57 = vmul.f32 %v973_v29, %v3162_v0  ;;  %v990_v44 = vmul.f32 %v973_v29, %v3165_v1 }
 0x4d6   : > { %v1014_v31 = vpop.permute.xlu1 %1013 }
 0x4d7   : > { %v1039_v36 = vadd.f32 %v1014_v31, %v983_v55  ;;  %v1040_v8 = vadd.f32 %v1014_v31, %v984_v30 }
 0x4d9   : > { %v1051_v37 = vpack.c.bf16 %v1040_v8, %v1039_v36 }
 0x4da   : > { %v1009_v58 = vpop.permute.xlu2 %1008 }
 0x4db   : > { %1059 = vst [vmem:[#allocation2 + $0x20] sm:$0xff] %v1051_v37  ;;  %v1037_v62 = vadd.f32 %v1009_v58, %v981_v35  ;;  %v1038_v41 = vadd.f32 %v1009_v58, %v982_v56  ;;  %v1155_v5 = vunpack.c.l.b16 %v1051_v37  ;;  %v1156_v28 = vunpack.c.h.b16 %v1051_v37 }
 0x4dd   : > { %v3525_v39 = vpack.c.bf16 %v1038_v41, %v1037_v62 }
 0x4de   : > { %v1019_v11 = vpop.permute.xlu0 %1018 }
 0x4df   : > { %1058 = vst [vmem:[#allocation2 + $0x18] sm:$0xff] %v3525_v39  ;;  %v1041_v12 = vadd.f32 %v1019_v11, %v985_v3  ;;  %v1042_v40 = vadd.f32 %v1019_v11, %v986_v38  ;;  %v2659_v38 = vld [vmem:[%s3938_s7] sm:$0xff]  ;;  %v2660_v11 = vld [vmem:[%s3938_s7 + $0x8] sm:$0xff] }
 0x4e1   : > { %v1052_v15 = vpack.c.bf16 %v1042_v40, %v1041_v12  ;;  %v2657_v12 = vld [vmem:[%s3937_s6 + $0x10] sm:$0xff] }
 0x4e2   : > { %v968_v6 = vpop.permute.xlu1 %967  ;;  %v994_v26 = vpop.permute.xlu2 %993  ;;  %v2661_v40 = vld [vmem:[%s3938_s7 + $0x10] sm:$0xff] }
 0x4e3   : > { %1060 = vst [vmem:[#allocation2 + $0x28] sm:$0xff] %v1052_v15  ;;  %v987_v7 = vmul.f32 %v968_v6, %v3186_v9  ;;  %v988_v63 = vmul.f32 %v968_v6, %v3189_v10  ;;  %v1157_v22 = vunpack.c.l.b16 %v1052_v15  ;;  %v1158_v24 = vunpack.c.h.b16 %v1052_v15  ;;  %v2658_v15 = vld [vmem:[%s3937_s6 + $0x18] sm:$0xff] }
 0x4e4   : > { %v2662_v6 = vld [vmem:[%s3938_s7 + $0x18] sm:$0xff] }
 0x4e5   : > { %v1167_v45 = vpack.c.b16 %v1157_v22, %v1155_v5  ;;  %v1168_v52 = vpack.c.b16 %v1158_v24, %v1156_v28 }
 0x4e6   : > { %v1024_v17 = vpop.permute.xlu0 %1023 }
 0x4e7   : > { %v1043_v23 = vadd.f32 %v1024_v17, %v987_v7  ;;  %v1044_v16 = vadd.f32 %v1024_v17, %v988_v63 }
 0x4e9   : > { %v1053_v2 = vpack.c.bf16 %v1044_v16, %v1043_v23 }
 0x4ea   : > { %v1087_v17 = vpop.permute.xlu2 %1086 }
 0x4eb   : > { %1061 = vst [vmem:[#allocation2 + $0x30] sm:$0xff] %v1053_v2  ;;  %v1159_v61 = vunpack.c.l.b16 %v1053_v2  ;;  %v1160_v50 = vunpack.c.h.b16 %v1053_v2 }
 0x4ee   : > { %v1029_v34 = vpop.permute.xlu1 %1028  ;;  %v1004_v46 = vpop.permute.xlu0 %1003 }
 0x4ef   : > { %v1045_v43 = vadd.f32 %v1029_v34, %v989_v57  ;;  %v1046_v47 = vadd.f32 %v1029_v34, %v990_v44  ;;  %v1035_v9 = vadd.f32 %v1004_v46, %v979_v4  ;;  %v1036_v48 = vadd.f32 %v1004_v46, %v980_v42 }
 0x4f1   : > { %v1054_v10 = vpack.c.bf16 %v1046_v47, %v1045_v43  ;;  %v1049_v60 = vpack.c.bf16 %v1036_v48, %v1035_v9 }
 0x4f2   : > { %v1102_v42 = vpop.permute.xlu2 %1101 }
 0x4f3   : > { %1062 = vst [vmem:[#allocation2 + $0x38] sm:$0xff] %v1054_v10  ;;  %v1161_v49 = vunpack.c.l.b16 %v1054_v10  ;;  %v1162_v59 = vunpack.c.h.b16 %v1054_v10  ;;  %v1151_v27 = vunpack.c.l.b16 %v1049_v60  ;;  %v1152_v53 = vunpack.c.h.b16 %v1049_v60 }
 0x4f4   : > { %1057 = vst [vmem:[#allocation2 + $0x10] sm:$0xff] %v1049_v60 }
 0x4f5   : > { %v1169_v13 = vpack.c.b16 %v1161_v49, %v1159_v61  ;;  %v1170_v14 = vpack.c.b16 %v1162_v59, %v1160_v50 }
 0x4f6   : > { %v938_v0 = vpop.permute.xlu1 %937  ;;  %v943_v51 = vpop.permute.xlu0 %942 }
 0x4f7   : > { %v975_v1 = vmul.f32 %v938_v0, %v3216_v20  ;;  %v976_v25 = vmul.f32 %v938_v0, %v3219_v21  ;;  %1195 = vmatpush.bf16.msrb.mxu0 %v1169_v13  ;;  %1224 = vmatpush.bf16.msrb.mxu2 %v1170_v14  ;;  %v1153_v20 = vunpack.c.l.b16 %v3525_v39  ;;  %v1154_v21 = vunpack.c.h.b16 %v3525_v39  ;;  %v2656_v39 = vld [vmem:[%s3937_s6 + $0x8] sm:$0xff] }
 0x4f8   : > { %1357 = vmatpush.bf16.msrb.mxu1 %v1169_v13  ;;  %1386 = vmatpush.bf16.msrb.mxu3 %v1170_v14  ;;  %v977_v29 = vmul.f32 %v943_v51, %v3210_v18  ;;  %v978_v55 = vmul.f32 %v943_v51, %v3213_v19  ;;  %v2655_v19 = vld [vmem:[%s3937_s6] sm:$0xff] }
 0x4f9   : > { %v1031_v32 = vadd.f32 %v994_v26, %v975_v1  ;;  %v1032_v33 = vadd.f32 %v994_v26, %v976_v25  ;;  %v1165_v30 = vpack.c.b16 %v1153_v20, %v1151_v27  ;;  %v1166_v36 = vpack.c.b16 %v1154_v21, %v1152_v53 }
 0x4fa   : > { %v3584_v50 = vpop.permute.xlu2 %1116 }
 0x4fb   : > { %v1047_v54 = vpack.c.bf16 %v1032_v33, %v1031_v32  ;;  %1196 = vmatpush.bf16.msrb.mxu0 %v1167_v45  ;;  %1225 = vmatpush.bf16.msrb.mxu2 %v1168_v52 }
 0x4fc   : > { %1358 = vmatpush.bf16.msrb.mxu1 %v1167_v45  ;;  %1387 = vmatpush.bf16.msrb.mxu3 %v1168_v52 }
 0x4fd   : > { %1055 = vst [vmem:[#allocation2] sm:$0xff] %v1047_v54  ;;  %v1147_v37 = vunpack.c.l.b16 %v1047_v54  ;;  %v1148_v62 = vunpack.c.h.b16 %v1047_v54 }
 0x4fe   : > { %v999_v31 = vpop.permute.xlu1 %998  ;;  %v1082_v7 = vpop.permute.xlu0 %1081 }
 0x4ff   : > { %v1033_v8 = vadd.f32 %v999_v31, %v977_v29  ;;  %v1034_v35 = vadd.f32 %v999_v31, %v978_v55  ;;  %1197 = vmatpush.bf16.msrb.mxu0 %v1165_v30  ;;  %1226 = vmatpush.bf16.msrb.mxu2 %v1166_v36 }
 0x500   : > { %1359 = vmatpush.bf16.msrb.mxu1 %v1165_v30  ;;  %1388 = vmatpush.bf16.msrb.mxu3 %v1166_v36 }
 0x501   : > { %v1048_v56 = vpack.c.bf16 %v1034_v35, %v1033_v8 }
 0x502   : > { %v1294_v33 = vpop.permute.xlu2 %1293 }
 0x503   : > { %1056 = vst [vmem:[#allocation2 + $0x8] sm:$0xff] %v1048_v56  ;;  %v1149_v58 = vunpack.c.l.b16 %v1048_v56  ;;  %v1150_v41 = vunpack.c.h.b16 %v1048_v56 }
 0x505   : > { %v1163_v18 = vpack.c.b16 %v1149_v58, %v1147_v37  ;;  %v1164_v3 = vpack.c.b16 %v1150_v41, %v1148_v62 }
 0x506   : > { %v1092_v63 = vpop.permute.xlu1 %1091  ;;  %v1097_v23 = vpop.permute.xlu0 %1096 }
 0x507   : > { %1198 = vmatpush.bf16.msrb.mxu0 %v1163_v18  ;;  %1227 = vmatpush.bf16.msrb.mxu2 %v1164_v3 }
 0x508   : > { %1360 = vmatpush.bf16.msrb.mxu1 %v1163_v18  ;;  %1389 = vmatpush.bf16.msrb.mxu3 %v1164_v3 }
 0x50a   : > { %2474 = vmatmul.msk.bf16.vlgmr.msrb.gmra.mxu0 %vm510_vm0, %v2655_v19  ;;  %2478 = vmatmul.msk.bf16.vlgmr.msrb.gmra.mxu2 %vm510_vm0, %v2655_v19 }
 0x50b   : > { %2498 = vmatmul.msk.bf16.vlgmr.msrb.gmra.mxu1 %vm510_vm0, %v2659_v38  ;;  %2502 = vmatmul.msk.bf16.vlgmr.msrb.gmra.mxu3 %vm510_vm0, %v2659_v38 }
 0x50e   : > { %v3580_v16 = vpop.permute.xlu1 %1106  ;;  %v3582_v57 = vpop.permute.xlu0 %1111 }
 0x516   : > { %v1284_v34 = vpop.permute.xlu1 %1283  ;;  %v1289_v13 = vpop.permute.xlu0 %1288 }
 0x51a   : > { %2475 = vmatmul.msk.bf16.gmra.mxu0 %vm510_vm0, %v2656_v39  ;;  %2479 = vmatmul.msk.bf16.gmra.mxu2 %vm510_vm0, %v2656_v39 }
 0x51b   : > { %2499 = vmatmul.msk.bf16.gmra.mxu1 %vm510_vm0, %v2660_v11  ;;  %2503 = vmatmul.msk.bf16.gmra.mxu3 %vm510_vm0, %v2660_v11 }
 0x51e   : > { %v1299_v30 = vpop.permute.xlu1 %1298  ;;  %v1304_v3 = vpop.permute.xlu0 %1303 }
 0x52a   : > { %2476 = vmatmul.msk.bf16.gmra.mxu0 %vm510_vm0, %v2657_v12  ;;  %2480 = vmatmul.msk.bf16.gmra.mxu2 %vm510_vm0, %v2657_v12 }
 0x52b   : > { %2500 = vmatmul.msk.bf16.gmra.mxu1 %vm510_vm0, %v2661_v40  ;;  %2504 = vmatmul.msk.bf16.gmra.mxu3 %vm510_vm0, %v2661_v40 }
 0x53a   : > { %2477 = vmatmul.msk.bf16.gmra.mxu0 %vm510_vm0, %v2658_v15  ;;  %2481 = vmatmul.msk.bf16.gmra.mxu2 %vm510_vm0, %v2658_v15 }
 0x53b   : > { %2501 = vmatmul.msk.bf16.gmra.mxu1 %vm510_vm0, %v2662_v6  ;;  %2505 = vmatmul.msk.bf16.gmra.mxu3 %vm510_vm0, %v2662_v6 }
 0x587   : > { %v1200_v2 = vpop.f32.mrf.mxu0 }
 0x588   : > { %v1362_v4 = vpop.f32.mrf.mxu1  ;;  %v1201_v46 = vadd.f32 %v1200_v2, %v1082_v7 }
 0x589   : > { %v1363_v9 = vadd.f32 %v1362_v4, %v1284_v34 }
 0x58d   : > { %v1229_v44 = vpop.f32.mrf.mxu2 }
 0x58e   : > { %v1230_v43 = vadd.f32 %v1229_v44, %v1082_v7  ;;  %v1391_v47 = vpop.f32.mrf.mxu3 }
 0x58f   : > { %v1392_v48 = vadd.f32 %v1391_v47, %v1284_v34  ;;  %v1202_v10 = vpop.f32.mrf.mxu0 }
 0x590   : > { %v1249_v60 = vpack.c.bf16 %v1230_v43, %v1201_v46  ;;  %v1364_v61 = vpop.f32.mrf.mxu1  ;;  %v1203_v14 = vadd.f32 %v1202_v10, %v1087_v17 }
 0x591   : > { %v1411_v49 = vpack.c.bf16 %v1392_v48, %v1363_v9  ;;  %v1365_v24 = vadd.f32 %v1364_v61, %v1289_v13  ;;  %v1314_v48 = vpop.permute.xlu1 %1313 }
 0x592   : > { %1257 = vst [vmem:[#allocation3] sm:$0xff] %v1249_v60 }
 0x593   : > { %1419 = vst [vmem:[#allocation4] sm:$0xff] %v1411_v49 }
 0x595   : > { %v1231_v59 = vpop.f32.mrf.mxu2 }
 0x596   : > { %v1232_v22 = vadd.f32 %v1231_v59, %v1087_v17  ;;  %v1393_v0 = vpop.f32.mrf.mxu3  ;;  %v1309_v17 = vpop.permute.xlu2 %1308 }
 0x597   : > { %v1394_v1 = vadd.f32 %v1393_v0, %v1289_v13  ;;  %v1205_v25 = vpop.f32.mrf.mxu0 }
 0x598   : > { %v1250_v5 = vpack.c.bf16 %v1232_v22, %v1203_v14  ;;  %v1367_v26 = vpop.f32.mrf.mxu1  ;;  %v1206_v45 = vadd.f32 %v1205_v25, %v1092_v63 }
 0x599   : > { %v1412_v28 = vpack.c.bf16 %v1394_v1, %v1365_v24  ;;  %v1368_v52 = vadd.f32 %v1367_v26, %v1294_v33  ;;  %v1319_v24 = vpop.permute.xlu0 %1318 }
 0x59a   : > { %1258 = vst [vmem:[#allocation3 + $0x8] sm:$0xff] %v1250_v5 }
 0x59b   : > { %1420 = vst [vmem:[#allocation4 + $0x8] sm:$0xff] %v1412_v28 }
 0x59d   : > { %v1234_v32 = vpop.f32.mrf.mxu2 }
 0x59e   : > { %v1235_v27 = vadd.f32 %v1234_v32, %v1092_v63  ;;  %v1396_v51 = vpop.f32.mrf.mxu3 }
 0x59f   : > { %v1397_v53 = vadd.f32 %v1396_v51, %v1294_v33  ;;  %v1207_v54 = vpop.f32.mrf.mxu0 }
 0x5a0   : > { %v1251_v20 = vpack.c.bf16 %v1235_v27, %v1206_v45  ;;  %v1369_v21 = vpop.f32.mrf.mxu1  ;;  %v1208_v31 = vadd.f32 %v1207_v54, %v1097_v23 }
 0x5a1   : > { %v1413_v29 = vpack.c.bf16 %v1397_v53, %v1368_v52  ;;  %v1370_v35 = vadd.f32 %v1369_v21, %v1299_v30 }
 0x5a2   : > { %1259 = vst [vmem:[#allocation3 + $0x10] sm:$0xff] %v1251_v20 }
 0x5a3   : > { %1421 = vst [vmem:[#allocation4 + $0x10] sm:$0xff] %v1413_v29 }
 0x5a5   : > { %v1236_v55 = vpop.f32.mrf.mxu2 }
 0x5a6   : > { %v1237_v36 = vadd.f32 %v1236_v55, %v1097_v23  ;;  %v1398_v8 = vpop.f32.mrf.mxu3 }
 0x5a7   : > { %v1399_v56 = vadd.f32 %v1398_v8, %v1299_v30  ;;  %v1210_v37 = vpop.f32.mrf.mxu0 }
 0x5a8   : > { %v1252_v58 = vpack.c.bf16 %v1237_v36, %v1208_v31  ;;  %v1372_v62 = vpop.f32.mrf.mxu1  ;;  %v1211_v19 = vadd.f32 %v1210_v37, %v1102_v42 }
 0x5a9   : > { %v1414_v41 = vpack.c.bf16 %v1399_v56, %v1370_v35  ;;  %v1373_v11 = vadd.f32 %v1372_v62, %v1304_v3 }
 0x5aa   : > { %1260 = vst [vmem:[#allocation3 + $0x18] sm:$0xff] %v1252_v58 }
 0x5ab   : > { %1422 = vst [vmem:[#allocation4 + $0x18] sm:$0xff] %v1414_v41 }
 0x5ad   : > { %v1239_v18 = vpop.f32.mrf.mxu2 }
 0x5ae   : > { %v1240_v38 = vadd.f32 %v1239_v18, %v1102_v42  ;;  %v1401_v39 = vpop.f32.mrf.mxu3 }
 0x5af   : > { %v1402_v12 = vadd.f32 %v1401_v39, %v1304_v3  ;;  %v1212_v40 = vpop.f32.mrf.mxu0 }
 0x5b0   : > { %v1253_v15 = vpack.c.bf16 %v1240_v38, %v1211_v19  ;;  %v1374_v6 = vpop.f32.mrf.mxu1  ;;  %v1213_v23 = vadd.f32 %v1212_v40, %v3580_v16 }
 0x5b1   : > { %v1415_v7 = vpack.c.bf16 %v1402_v12, %v1373_v11  ;;  %v1375_v44 = vadd.f32 %v1374_v6, %v1309_v17 }
 0x5b2   : > { %1261 = vst [vmem:[#allocation3 + $0x20] sm:$0xff] %v1253_v15 }
 0x5b3   : > { %1423 = vst [vmem:[#allocation4 + $0x20] sm:$0xff] %v1415_v7 }
 0x5b5   : > { %v1241_v63 = vpop.f32.mrf.mxu2 }
 0x5b6   : > { %v1242_v2 = vadd.f32 %v1241_v63, %v3580_v16  ;;  %v1403_v4 = vpop.f32.mrf.mxu3 }
 0x5b7   : > { %v1404_v34 = vadd.f32 %v1403_v4, %v1309_v17  ;;  %v1215_v43 = vpop.f32.mrf.mxu0 }
 0x5b8   : > { %v1254_v46 = vpack.c.bf16 %v1242_v2, %v1213_v23  ;;  %v1377_v47 = vpop.f32.mrf.mxu1  ;;  %v1216_v10 = vadd.f32 %v1215_v43, %v3582_v57 }
 0x5b9   : > { %v1416_v42 = vpack.c.bf16 %v1404_v34, %v1375_v44  ;;  %v1378_v49 = vadd.f32 %v1377_v47, %v1314_v48 }
 0x5ba   : > { %1262 = vst [vmem:[#allocation3 + $0x28] sm:$0xff] %v1254_v46 }
 0x5bb   : > { %1424 = vst [vmem:[#allocation4 + $0x28] sm:$0xff] %v1416_v42 }
 0x5bd   : > { %v1244_v9 = vpop.f32.mrf.mxu2 }
 0x5be   : > { %v1245_v60 = vadd.f32 %v1244_v9, %v3582_v57  ;;  %v1406_v61 = vpop.f32.mrf.mxu3 }
 0x5bf   : > { %v1407_v59 = vadd.f32 %v1406_v61, %v1314_v48  ;;  %v1217_v14 = vpop.f32.mrf.mxu0 }
 0x5c0   : > { %v1255_v13 = vpack.c.bf16 %v1245_v60, %v1216_v10  ;;  %v1379_v22 = vpop.f32.mrf.mxu1  ;;  %v1218_v1 = vadd.f32 %v1217_v14, %v3584_v50 }
 0x5c1   : > { %v1417_v16 = vpack.c.bf16 %v1407_v59, %v1378_v49  ;;  %v1380_v26 = vadd.f32 %v1379_v22, %v1319_v24 }
 0x5c2   : > { %1263 = vst [vmem:[#allocation3 + $0x30] sm:$0xff] %v1255_v13 }
 0x5c3   : > { %1425 = vst [vmem:[#allocation4 + $0x30] sm:$0xff] %v1417_v16 }
 0x5c5   : > { %v1246_v0 = vpop.f32.mrf.mxu2 }
 0x5c6   : > { %v1247_v25 = vadd.f32 %v1246_v0, %v3584_v50  ;;  %v1408_v5 = vpop.f32.mrf.mxu3 }
 0x5c7   : > { %v1409_v28 = vadd.f32 %v1408_v5, %v1319_v24 }
 0x5c8   : > { %v1256_v32 = vpack.c.bf16 %v1247_v25, %v1218_v1 }
 0x5c9   : > { %v1418_v57 = vpack.c.bf16 %v1409_v28, %v1380_v26 }
 0x5ca   : > { %1264 = vst [vmem:[#allocation3 + $0x38] sm:$0xff] %v1256_v32 }
 0x5cb   : > { %1426 = vst [vmem:[#allocation4 + $0x38] sm:$0xff] %v1418_v57 }
 0x5cc PF: > { %s2506_s16 = sshll.u32 %s2983_s28, 7  ;;  %v2670_v53 = vld [vmem:[%s3936_s5 + $0x18] sm:$0xff]  ;;  %v2669_v54 = vld [vmem:[%s3936_s5 + $0x10] sm:$0xff]  ;;  %v2668_v20 = vld [vmem:[%s3936_s5 + $0x8] sm:$0xff]  ;;  %vm1516_vm0 = vcmask 523264   ;;  %s2343_s24 = sshll.u32 %s3158_s20, 4  ;;  %s2344_s24 = int_to_ptr.vmem [resolvable:$true] %s2343_s24 }
 0x5cd   : > { %s3593_s25 = sshra.s32 %s2506_s16, 7  ;;  %1545 = vmatpush.bf16.msra.mxu0 %v2670_v53  ;;  %2691 = vmatpush.bf16.msra.mxu2 %v2670_v53  ;;  %v2667_v55 = vld [vmem:[%s3936_s5] sm:$0xff]  ;;  %v2574_v18 = vld [vmem:[#allocation3 + $0x30] sm:$0xf]  ;;  %v2677_v19 = vld [vmem:[#allocation3 + $0x34] sm:$0xf] }
 0x5ce   : > { %s2507_s0 = sshll.u32 %s3593_s25, 2  ;;  %2692 = vmatpush.bf16.msra.mxu3 %v2670_v53  ;;  %v2566_v12 = vld [vmem:[#allocation3 + $0x20] sm:$0xf]  ;;  %v2676_v40 = vld [vmem:[#allocation3 + $0x24] sm:$0xf0]  ;;  %s2925_s21 = scalar_lea.hbm %s3944_s13, 256 }
 0x5cf   : > { %s1431_s30 = scalar_lea.vmem [#allocation2], %s2507_s0  ;;  %v2675_v15 = vld [vmem:[#allocation3 + $0x24] sm:$0xf]  ;;  %v2567_v6 = vor.u32 %v2676_v40, %v2566_v12  ;;  %v2568_v7 = vld [vmem:[#allocation3 + $0x28] sm:$0xf0]  ;;  %s2648_s0 = sshll.u32 %s3593_s25, 3 }
 0x5d0   : > { %v2510_v33 = vld [vmem:[%s1431_s30] sm:$0xf]  ;;  %v2663_v45 = vld [vmem:[%s1431_s30 + $0x4] sm:$0xf0]  ;;  %v2514_v50 = vld [vmem:[%s1431_s30 + $0x10] sm:$0xf]  ;;  %v2571_v63 = vor.u32 %v2675_v15, %v2568_v7 }
 0x5d1   : > { %v2511_v27 = vor.u32 %v2663_v45, %v2510_v33  ;;  %v2664_v51 = vld [vmem:[%s1431_s30 + $0x14] sm:$0xf0]  ;;  %1546 = vmatpush.bf16.msra.mxu0 %v2669_v54  ;;  %2693 = vmatpush.bf16.msra.mxu2 %v2669_v54  ;;  %v2518_v21 = vld [vmem:[%s1431_s30 + $0x20] sm:$0xf]  ;;  %v2665_v29 = vld [vmem:[%s1431_s30 + $0x24] sm:$0xf0] }
 0x5d2   : > { %v2515_v52 = vor.u32 %v2664_v51, %v2514_v50  ;;  %2694 = vmatpush.bf16.msra.mxu3 %v2669_v54  ;;  %v2519_v30 = vor.u32 %v2665_v29, %v2518_v21  ;;  %v2522_v31 = vld [vmem:[%s1431_s30 + $0x30] sm:$0xf]  ;;  %v2666_v36 = vld [vmem:[%s1431_s30 + $0x34] sm:$0xf0]  ;;  %v2576_v39 = vld [vmem:[#allocation3 + $0x38] sm:$0xf0]  ;;  %s3867_s30 = scalar_lea.vmem %s3156_s19, %s2648_s0 }
 0x5d3   : > { %1464 = vxpose.xlu0.c.b16.start [1/4] (short) %v2511_v27, 128  ;;  %v2523_v8 = vor.u32 %v2666_v36, %v2522_v31  ;;  %v2678_v3 = vld [vmem:[#allocation3 + $0x34] sm:$0xf0]  ;;  %v2579_v11 = vor.u32 %v2677_v19, %v2576_v39  ;;  %v2558_v17 = vld [vmem:[#allocation3 + $0x10] sm:$0xf]  ;;  %v2673_v2 = vld [vmem:[#allocation3 + $0x14] sm:$0xf] }
 0x5d4   : > { %v2575_v38 = vor.u32 %v2678_v3, %v2574_v18  ;;  %v2674_v23 = vld [vmem:[#allocation3 + $0x14] sm:$0xf0]  ;;  %v2560_v34 = vld [vmem:[#allocation3 + $0x18] sm:$0xf0]  ;;  %v2550_v42 = vld [vmem:[#allocation3] sm:$0xf] }
 0x5d5   : > { %1547 = vmatpush.bf16.msra.mxu0 %v2668_v20  ;;  %2695 = vmatpush.bf16.msra.mxu2 %v2668_v20  ;;  %v2559_v44 = vor.u32 %v2674_v23, %v2558_v17  ;;  %v2563_v46 = vor.u32 %v2673_v2, %v2560_v34  ;;  %v2672_v43 = vld [vmem:[#allocation3 + $0x4] sm:$0xf0]  ;;  %v2671_v47 = vld [vmem:[#allocation3 + $0x4] sm:$0xf]  ;;  %v2552_v48 = vld [vmem:[#allocation3 + $0x8] sm:$0xf0] }
 0x5d6   : > { %2696 = vmatpush.bf16.msra.mxu3 %v2668_v20  ;;  %1674 = vmatpush.bf16.msra.mxu1 %v2575_v38  ;;  %v2551_v9 = vor.u32 %v2672_v43, %v2550_v42  ;;  %v2555_v10 = vor.u32 %v2671_v47, %v2552_v48  ;;  %v2808_v49 = vld [vmem:[%s3940_s9] ss:$0 sm:$0xff]  ;;  %s2650_s19 = sshll.u32 %s2987_s29, 4 }
 0x5d7   : > { %s2340_s25 = sadd.s32 %s2983_s28, %s2650_s19  ;;  %s3973_s28 = sand.u32 1, %s2975_s26  }
 0x5d8   : > { %s2651_s15 = sshll.u32 %s2340_s25, 3  ;;  %s2330_s29 = scalar_lea.sflag [#allocation6], %s3973_s28 }
 0x5d9   : > { %1548 = vmatpush.bf16.msra.mxu0 %v2667_v55  ;;  %2697 = vmatpush.bf16.msra.mxu2 %v2667_v55  ;;  %s2342_s17 = scalar_lea.hbm %s3944_s13, %s2651_s15 }
 0x5da   : > { %2698 = vmatpush.bf16.msra.mxu3 %v2667_v55  ;;  %1675 = vmatpush.bf16.msra.mxu1 %v2567_v6  ;;  %s2345_s16 = sshll.u32 %s2342_s17, 4  ;;  %s2346_s16 = int_to_ptr.hbm [resolvable:$true] %s2345_s16 }
 0x5db   : > { %s2919_s0 = sshra.s32 %s2346_s16, 4  ;;  %s2920_s0 = int_to_ptr.hbm [resolvable:$true] %s2919_s0 }
 0x5dc   : > { %s2921_s19 = scalar_lea.hbm %s2920_s0, 64  ;;  %p2926_p4 = scmp.lt.s32.totalorder %s2920_s0, %s3944_s13 }
 0x5dd   : > { %1723 = vmatpush.bf16.msrb.mxu2 %v2579_v11  ;;  %p2922_p0 = scmp.ne.s32.totalorder %s2920_s0, %s2921_s19  ;;  %p2927_p5 = scmp.lt.s32.totalorder %s2925_s21, %s2921_s19 }
 0x5de   : > { %1676 = vmatpush.bf16.msra.mxu1 %v2559_v44 }
 0x5df   : > { %p2923_p1 = pnand %p2922_p0, %p3128_p3  ;;  %p2928_p6 = por %p2927_p5, %p2926_p4 }
 0x5e1   : > { %1724 = vmatpush.bf16.msrb.mxu2 %v2571_v63  ;;  %p2924_p2 = pneg %p2923_p1 }
 0x5e2   : > { %1677 = vmatpush.bf16.msra.mxu1 %v2551_v9 }
 0x5e3   : > { %1465 = vxpose.xlu0.c.b16.cont [2/4] (short) %v2515_v52, 128  ;;  %p2929_p7 = pnand %p2928_p6, %p2924_p2 }
 0x5e5   : > { %1725 = vmatpush.bf16.msrb.mxu2 %v2563_v46 }
 0x5e9   : > { %1726 = vmatpush.bf16.msrb.mxu2 %v2555_v10 }
 0x5f3   : > { %1466 = vxpose.xlu0.c.b16.cont [3/4] (short) %v2519_v30, 128 }
 0x603   : > { %1467 = vxpose.xlu0.c.b16.end [4/4] (short) %v2523_v8, 128 }
 0x67f   : > { %v1472_v35 = vpop.trf.xlu0 }
 0x680   : > { %2540 = vmatmul.msk.bf16.vlgmr.msra.gmra.mxu0 %vm1516_vm0, %v1472_v35 }
 0x68f   : > { %v1473_v56 = vpop.trf.xlu0 }
 0x690   : > { %2541 = vmatmul.msk.bf16.gmra.mxu0 %vm1516_vm0, %v1473_v56 }
 0x69f   : > { %v1474_v37 = vpop.trf.xlu0 }
 0x6a0   : > { %2542 = vmatmul.msk.bf16.vlgmr.msra.gmra.mxu2 %vm1516_vm0, %v1474_v37 }
 0x6af   : > { %v1475_v58 = vpop.trf.xlu0 }
 0x6b0   : > { %2543 = vmatmul.msk.bf16.gmra.mxu2 %vm1516_vm0, %v1475_v58 }
 0x6bf   : > { %v1476_v62 = vpop.trf.xlu0 }
 0x6c0   : > { %2544 = vmatmul.msk.bf16.gmra.mxu2 %vm1516_vm0, %v1476_v62 }
 0x6cf   : > { %v1477_v41 = vpop.trf.xlu0 }
 0x6d0   : > { %2545 = vmatmul.msk.bf16.gmra.mxu2 %vm1516_vm0, %v1477_v41 }
 0x6df   : > { %v1478_v4 = vpop.trf.xlu0 }
 0x6e0   : > { %2546 = vmatmul.msk.bf16.vlgmr.msra.gmra.mxu3 %vm1516_vm0, %v1478_v4 }
 0x6ef   : > { %v1479_v60 = vpop.trf.xlu0 }
 0x6f0   : > { %2547 = vmatmul.msk.bf16.gmra.mxu3 %vm1516_vm0, %v1479_v60 }
 0x6fd   : > { %v1550_v61 = vpop.f32.mrf.mxu0 }
 0x6fe   : > { %v1551_v13 = vadd.f32 %v2808_v49, %v1550_v61 }
 0x705   : > { %v1552_v59 = vpop.f32.mrf.mxu0 }
 0x706   : > { %v1553_v16 = vadd.f32 %v2808_v49, %v1552_v59 }
 0x708   : > { %v1590_v14 = vpack.c.bf16 %v1553_v16, %v1551_v13 }
 0x70a   : > { %2580 = vmatmul.msk.bf16.vlgmr.msra.gmra.mxu1 %vm1516_vm0, %v1590_v14  ;;  %2588 = vmatmul.msk.bf16.vlgmr.msrb.gmra.mxu2 %vm1516_vm0, %v1590_v14  ;;  %v2622_v14 = vld [vmem:[#allocation4 + $0x30] sm:$0xf] }
 0x70d   : > { %v1555_v22 = vpop.f32.mrf.mxu0 }
 0x70e   : > { %v1556_v24 = vadd.f32 %v2808_v49, %v1555_v22  ;;  %v2686_v22 = vld [vmem:[#allocation4 + $0x34] sm:$0xf0] }
 0x715   : > { %v1557_v0 = vpop.f32.mrf.mxu0 }
 0x716   : > { %v1558_v1 = vadd.f32 %v2808_v49, %v1557_v0  ;;  %v2685_v0 = vld [vmem:[#allocation4 + $0x34] sm:$0xf] }
 0x718   : > { %v1591_v25 = vpack.c.bf16 %v1558_v1, %v1556_v24  ;;  %v2623_v24 = vor.u32 %v2686_v22, %v2622_v14  ;;  %v2624_v1 = vld [vmem:[#allocation4 + $0x38] sm:$0xf0] }
 0x71a   : > { %2581 = vmatmul.msk.bf16.gmra.mxu1 %vm1516_vm0, %v1591_v25  ;;  %2589 = vmatmul.msk.bf16.gmra.mxu2 %vm1516_vm0, %v1591_v25  ;;  %v2627_v25 = vor.u32 %v2685_v0, %v2624_v1 }
 0x71b   : > { %2028 = vmatpush.bf16.xpose.msrb.mxu3 %v2623_v24 }
 0x71c   : > { %2077 = vmatpush.bf16.xpose.msrb.mxu0 %v2627_v25 }
 0x723   : > { %v1560_v5 = vpop.f32.mrf.mxu2 }
 0x724   : > { %v1561_v28 = vadd.f32 %v2808_v49, %v1560_v5 }
 0x72b   : > { %v1562_v26 = vpop.f32.mrf.mxu2 }
 0x72c   : > { %v1563_v32 = vadd.f32 %v2808_v49, %v1562_v26 }
 0x72e   : > { %v1592_v57 = vpack.c.bf16 %v1563_v32, %v1561_v28  ;;  %v2614_v32 = vld [vmem:[#allocation4 + $0x20] sm:$0xf] }
 0x730   : > { %2582 = vmatmul.msk.bf16.gmra.mxu1 %vm1516_vm0, %v1592_v57  ;;  %2590 = vmatmul.msk.bf16.gmra.mxu2 %vm1516_vm0, %v1592_v57  ;;  %v2684_v57 = vld [vmem:[#allocation4 + $0x24] sm:$0xf0] }
 0x733   : > { %v1565_v33 = vpop.f32.mrf.mxu2 }
 0x734   : > { %v1566_v27 = vadd.f32 %v2808_v49, %v1565_v33  ;;  %v2683_v33 = vld [vmem:[#allocation4 + $0x24] sm:$0xf] }
 0x73b   : > { %v1567_v45 = vpop.f32.mrf.mxu2 }
 0x73c   : > { %v1568_v50 = vadd.f32 %v2808_v49, %v1567_v45  ;;  %v2615_v45 = vor.u32 %v2684_v57, %v2614_v32 }
 0x73e   : > { %v1593_v51 = vpack.c.bf16 %v1568_v50, %v1566_v27  ;;  %v2616_v27 = vld [vmem:[#allocation4 + $0x28] sm:$0xf0]  ;;  %2029 = vmatpush.bf16.xpose.msrb.mxu3 %v2615_v45 }
 0x73f   : > { %v2619_v50 = vor.u32 %v2683_v33, %v2616_v27 }
 0x740   : > { %2583 = vmatmul.msk.bf16.gmra.mxu1 %vm1516_vm0, %v1593_v51  ;;  %2591 = vmatmul.msk.bf16.gmra.mxu2 %vm1516_vm0, %v1593_v51 }
 0x741   : > { %2078 = vmatpush.bf16.xpose.msrb.mxu0 %v2619_v50 }
 0x743   : > { %v1570_v52 = vpop.f32.mrf.mxu2 }
 0x744   : > { %v1571_v54 = vadd.f32 %v2808_v49, %v1570_v52 }
 0x74b   : > { %v1572_v53 = vpop.f32.mrf.mxu2 }
 0x74c   : > { %v1573_v20 = vadd.f32 %v2808_v49, %v1572_v53 }
 0x74e   : > { %v1594_v21 = vpack.c.bf16 %v1573_v20, %v1571_v54  ;;  %v2606_v54 = vld [vmem:[#allocation4 + $0x10] sm:$0xf]  ;;  %v2682_v20 = vld [vmem:[#allocation4 + $0x14] sm:$0xf0] }
 0x750   : > { %2584 = vmatmul.msk.bf16.gmra.mxu1 %vm1516_vm0, %v1594_v21  ;;  %2592 = vmatmul.msk.bf16.gmra.mxu2 %vm1516_vm0, %v1594_v21  ;;  %v2681_v21 = vld [vmem:[#allocation4 + $0x14] sm:$0xf] }
 0x753   : > { %v1575_v29 = vpop.f32.mrf.mxu2 }
 0x754   : > { %v1576_v30 = vadd.f32 %v2808_v49, %v1575_v29  ;;  %v2607_v29 = vor.u32 %v2682_v20, %v2606_v54 }
 0x756   : > { %2030 = vmatpush.bf16.xpose.msrb.mxu3 %v2607_v29 }
 0x75b   : > { %v1577_v55 = vpop.f32.mrf.mxu2 }
 0x75c   : > { %v1578_v31 = vadd.f32 %v2808_v49, %v1577_v55  ;;  %v2608_v55 = vld [vmem:[#allocation4 + $0x18] sm:$0xf0] }
 0x75e   : > { %v1595_v36 = vpack.c.bf16 %v1578_v31, %v1576_v30  ;;  %v2611_v30 = vor.u32 %v2681_v21, %v2608_v55 }
 0x760   : > { %2585 = vmatmul.msk.bf16.gmra.mxu1 %vm1516_vm0, %v1595_v36  ;;  %2593 = vmatmul.msk.bf16.gmra.mxu2 %vm1516_vm0, %v1595_v36 }
 0x761   : > { %2079 = vmatpush.bf16.xpose.msrb.mxu0 %v2611_v30 }
 0x763   : > { %v1580_v8 = vpop.f32.mrf.mxu3 }
 0x764   : > { %v1581_v56 = vadd.f32 %v2808_v49, %v1580_v8 }
 0x76b   : > { %v1582_v35 = vpop.f32.mrf.mxu3 }
 0x76c   : > { %v1583_v37 = vadd.f32 %v2808_v49, %v1582_v35  ;;  %v2598_v35 = vld [vmem:[#allocation4] sm:$0xf] }
 0x76e   : > { %v1596_v58 = vpack.c.bf16 %v1583_v37, %v1581_v56  ;;  %v2680_v56 = vld [vmem:[#allocation4 + $0x4] sm:$0xf0]  ;;  %v2679_v37 = vld [vmem:[#allocation4 + $0x4] sm:$0xf] }
 0x770   : > { %2586 = vmatmul.msk.bf16.gmra.mxu1 %vm1516_vm0, %v1596_v58  ;;  %2594 = vmatmul.msk.bf16.gmra.mxu2 %vm1516_vm0, %v1596_v58  ;;  %v2599_v58 = vor.u32 %v2680_v56, %v2598_v35 }
 0x772   : > { %2031 = vmatpush.bf16.xpose.msrb.mxu3 %v2599_v58 }
 0x773   : > { %v1585_v62 = vpop.f32.mrf.mxu3 }
 0x774   : > { %v1586_v18 = vadd.f32 %v2808_v49, %v1585_v62  ;;  %v2600_v62 = vld [vmem:[#allocation4 + $0x8] sm:$0xf0] }
 0x77b   : > { %v1587_v41 = vpop.f32.mrf.mxu3 }
 0x77c   : > { %v1588_v3 = vadd.f32 %v2808_v49, %v1587_v41  ;;  %v2603_v41 = vor.u32 %v2679_v37, %v2600_v62 }
 0x77e   : > { %v1597_v19 = vpack.c.bf16 %v1588_v3, %v1586_v18  ;;  %2080 = vmatpush.bf16.xpose.msrb.mxu0 %v2603_v41 }
 0x780   : > { %2587 = vmatmul.msk.bf16.gmra.mxu1 %vm1516_vm0, %v1597_v19  ;;  %2595 = vmatmul.msk.bf16.gmra.mxu2 %vm1516_vm0, %v1597_v19 }
 0x787   : > { %v3635_v38 = vpop.f32.mrf.mxu1 }
 0x78d   : > { %v3637_v39 = vpop.f32.mrf.mxu2 }
 0x78e   : > { %v1768_v11 = vmax.f32 %v3635_v38, %v3637_v39 }
 0x78f   : > { %v3641_v12 = vpop.f32.mrf.mxu1 }
 0x790   : > { %1769 = vmax.xlane.f32.xlu1 %v1768_v11 }
 0x795   : > { %v3643_v40 = vpop.f32.mrf.mxu2 }
 0x796   : > { %v1771_v15 = vmax.f32 %v3641_v12, %v3643_v40 }
 0x797   : > { %v3647_v6 = vpop.f32.mrf.mxu1 }
 0x798   : > { %1772 = vmax.xlane.f32.xlu1 %v1771_v15 }
 0x79d   : > { %v3649_v7 = vpop.f32.mrf.mxu2 }
 0x79e   : > { %v1774_v63 = vmax.f32 %v3647_v6, %v3649_v7 }
 0x79f   : > { %v3653_v17 = vpop.f32.mrf.mxu1 }
 0x7a0   : > { %1775 = vmax.xlane.f32.xlu2 %v1774_v63 }
 0x7a5   : > { %v3655_v23 = vpop.f32.mrf.mxu2 }
 0x7a6   : > { %v1777_v2 = vmax.f32 %v3653_v17, %v3655_v23 }
 0x7a8   : > { %1778 = vmax.xlane.f32.xlu2 %v1777_v2 }
 0x7ad   : > { %v3659_v4 = vpop.f32.mrf.mxu1 }
 0x7b3   : > { %v3661_v44 = vpop.f32.mrf.mxu2 }
 0x7b4   : > { %v1780_v34 = vmax.f32 %v3659_v4, %v3661_v44 }
 0x7b5   : > { %v3665_v46 = vpop.f32.mrf.mxu1 }
 0x7b6   : > { %1781 = vmax.xlane.f32.xlu1 %v1780_v34 }
 0x7bb   : > { %v3667_v42 = vpop.f32.mrf.mxu2 }
 0x7bc   : > { %v1783_v43 = vmax.f32 %v3665_v46, %v3667_v42 }
 0x7bd   : > { %v3671_v47 = vpop.f32.mrf.mxu1 }
 0x7be   : > { %1784 = vmax.xlane.f32.xlu2 %v1783_v43 }
 0x7c3   : > { %v3673_v9 = vpop.f32.mrf.mxu2 }
 0x7c4   : > { %v1786_v48 = vmax.f32 %v3671_v47, %v3673_v9 }
 0x7c5   : > { %v3677_v10 = vpop.f32.mrf.mxu1 }
 0x7c6   : > { %1787 = vmax.xlane.f32.xlu1 %v1786_v48 }
 0x7cb   : > { %v3679_v60 = vpop.f32.mrf.mxu2 }
 0x7cc   : > { %v1789_v61 = vmax.f32 %v3677_v10, %v3679_v60 }
 0x7cd   : > { %v3683_v49 = vpop.f32.mrf.mxu1 }
 0x7ce   : > { %1790 = vmax.xlane.f32.xlu2 %v1789_v61 }
 0x7d3   : > { %v3685_v59 = vpop.f32.mrf.mxu2 }
 0x7d4   : > { %v1792_v13 = vmax.f32 %v3683_v49, %v3685_v59 }
 0x7d5   : > { %v3689_v16 = vpop.f32.mrf.mxu1 }
 0x7d6   : > { %1793 = vmax.xlane.f32.xlu1 %v1792_v13 }
 0x7db   : > { %v3691_v5 = vpop.f32.mrf.mxu2 }
 0x7dc   : > { %v1795_v26 = vmax.f32 %v3689_v16, %v3691_v5 }
 0x7dd   : > { %v3695_v28 = vpop.f32.mrf.mxu1 }
 0x7de   : > { %1796 = vmax.xlane.f32.xlu2 %v1795_v26 }
 0x7e3   : > { %v3697_v51 = vpop.f32.mrf.mxu2 }
 0x7e4   : > { %v1798_v52 = vmax.f32 %v3695_v28, %v3697_v51 }
 0x7e5   : > { %v3701_v53 = vpop.f32.mrf.mxu1 }
 0x7e6   : > { %1799 = vmax.xlane.f32.xlu1 %v1798_v52 }
 0x7eb   : > { %v3703_v31 = vpop.f32.mrf.mxu2 }
 0x7ec   : > { %v1801_v36 = vmax.f32 %v3701_v53, %v3703_v31 }
 0x7ed   : > { %v3707_v8 = vpop.f32.mrf.mxu1 }
 0x7ee   : > { %1802 = vmax.xlane.f32.xlu2 %v1801_v36 }
 0x7f3   : > { %v3709_v18 = vpop.f32.mrf.mxu2 }
 0x7f4   : > { %v1804_v3 = vmax.f32 %v3707_v8, %v3709_v18 }
 0x7f5   : > { %v3713_v19 = vpop.f32.mrf.mxu1 }
 0x7f6   : > { %1805 = vmax.xlane.f32.xlu1 %v1804_v3 }
 0x7fb   : > { %v3715_v11 = vpop.f32.mrf.mxu2 }
 0x7fc   : > { %v1807_v15 = vmax.f32 %v3713_v19, %v3715_v11 }
 0x7fd   : > { %v3719_v63 = vpop.f32.mrf.mxu1 }
 0x7fe   : > { %1808 = vmax.xlane.f32.xlu2 %v1807_v15 }
 0x803   : > { %v1770_v2 = vpop.xlane.xlu1 %1769  ;;  %v3721_v34 = vpop.f32.mrf.mxu2 }
 0x804   : > { %v1816_v43 = vsub.f32 %v3635_v38, %v1770_v2  ;;  %v1817_v48 = vsub.f32 %v3637_v39, %v1770_v2  ;;  %v1810_v61 = vmax.f32 %v3719_v63, %v3721_v34 }
 0x805   : > { %v3727_v22 = vpop.f32.mrf.mxu1 }
 0x806   : > { %v1848_v13 = vmul.f32 1.442695, %v1816_v43  ;;  %v1850_v14 = vmul.f32 1.442695, %v1817_v48  ;;  %1811 = vmax.xlane.f32.xlu0 %v1810_v61 }
 0x808   : > { %2809 = vpow2.f32 %v1848_v13 }
 0x809   : > { %2811 = vpow2.f32 %v1850_v14 }
 0x80b   : > { %v1773_v0 = vpop.xlane.xlu1 %1772  ;;  %v3729_v24 = vpop.f32.mrf.mxu2 }
 0x80c   : > { %v1818_v1 = vsub.f32 %v3641_v12, %v1773_v0  ;;  %v1819_v25 = vsub.f32 %v3643_v40, %v1773_v0  ;;  %v1813_v38 = vmax.f32 %v3727_v22, %v3729_v24 }
 0x80e   : > { %v2810_v39 = vpop.eup %2809  ;;  %v1852_v26 = vmul.f32 1.442695, %v1818_v1  ;;  %v1854_v32 = vmul.f32 1.442695, %v1819_v25  ;;  %1814 = vmax.xlane.f32.xlu1 %v1813_v38 }
 0x80f   : > { %v2812_v57 = vpop.eup %2811 }
 0x810   : > { %2813 = vpow2.f32 %v1852_v26  ;;  %v3735_v33 = vadd.f32 %v2812_v57, %v2810_v39 }
 0x811   : > { %2815 = vpow2.f32 %v1854_v32 }
 0x813   : > { %v1776_v45 = vpop.xlane.xlu2 %1775 }
 0x814   : > { %v1820_v27 = vsub.f32 %v3647_v6, %v1776_v45  ;;  %v1821_v50 = vsub.f32 %v3649_v7, %v1776_v45 }
 0x816   : > { %v2814_v12 = vpop.eup %2813  ;;  %v1856_v52 = vmul.f32 1.442695, %v1820_v27  ;;  %v1858_v40 = vmul.f32 1.442695, %v1821_v50 }
 0x817   : > { %v2816_v54 = vpop.eup %2815  ;;  %v1960_v20 = vpack.c.bf16 %v2814_v12, %v2810_v39 }
 0x818   : > { %2817 = vpow2.f32 %v1856_v52  ;;  %v1961_v21 = vpack.c.bf16 %v2816_v54, %v2812_v57  ;;  %v3739_v29 = vadd.f32 %v2816_v54, %v2814_v12 }
 0x819   : > { %2819 = vpow2.f32 %v1858_v40  ;;  %2032 = vmatmul.bf16.vlgmr.msrb.gmra.mxu3 %v1960_v20 }
 0x81a   : > { %2081 = vmatmul.bf16.vlgmr.msrb.gmra.mxu0 %v1961_v21 }
 0x81b   : > { %v1779_v55 = vpop.xlane.xlu2 %1778 }
 0x81c   : > { %v1822_v30 = vsub.f32 %v3653_v17, %v1779_v55  ;;  %v1823_v36 = vsub.f32 %v3655_v23, %v1779_v55 }
 0x81e   : > { %v2818_v6 = vpop.eup %2817  ;;  %v1860_v35 = vmul.f32 1.442695, %v1822_v30  ;;  %v1862_v7 = vmul.f32 1.442695, %v1823_v36 }
 0x81f   : > { %v2820_v56 = vpop.eup %2819 }
 0x820   : > { %2821 = vpow2.f32 %v1860_v35  ;;  %v3743_v37 = vadd.f32 %v2820_v56, %v2818_v6 }
 0x821   : > { %2823 = vpow2.f32 %v1862_v7 }
 0x826   : > { %v2822_v58 = vpop.eup %2821 }
 0x827   : > { %v2824_v62 = vpop.eup %2823  ;;  %v1962_v41 = vpack.c.bf16 %v2822_v58, %v2818_v6 }
 0x828   : > { %v1963_v3 = vpack.c.bf16 %v2824_v62, %v2820_v56  ;;  %v3745_v15 = vadd.f32 %v2824_v62, %v2822_v58 }
 0x829   : > { %v1782_v2 = vpop.xlane.xlu1 %1781  ;;  %2037 = vmatmul.bf16.gmra.mxu3 %v1962_v41 }
 0x82a   : > { %2086 = vmatmul.bf16.gmra.mxu0 %v1963_v3  ;;  %v1824_v17 = vsub.f32 %v3659_v4, %v1782_v2  ;;  %v1825_v23 = vsub.f32 %v3661_v44, %v1782_v2 }
 0x82c   : > { %v1864_v43 = vmul.f32 1.442695, %v1824_v17  ;;  %v1866_v48 = vmul.f32 1.442695, %v1825_v23 }
 0x82e   : > { %2825 = vpow2.f32 %v1864_v43 }
 0x82f   : > { %2827 = vpow2.f32 %v1866_v48 }
 0x831   : > { %v1785_v61 = vpop.xlane.xlu2 %1784 }
 0x832   : > { %v1826_v13 = vsub.f32 %v3665_v46, %v1785_v61  ;;  %v1827_v14 = vsub.f32 %v3667_v42, %v1785_v61 }
 0x834   : > { %v2826_v0 = vpop.eup %2825  ;;  %v1868_v1 = vmul.f32 1.442695, %v1826_v13  ;;  %v1870_v25 = vmul.f32 1.442695, %v1827_v14 }
 0x835   : > { %v2828_v38 = vpop.eup %2827 }
 0x836   : > { %2829 = vpow2.f32 %v1868_v1  ;;  %v3751_v39 = vadd.f32 %v2828_v38, %v2826_v0 }
 0x837   : > { %2831 = vpow2.f32 %v1870_v25 }
 0x839   : > { %v1788_v4 = vpop.xlane.xlu1 %1787 }
 0x83a   : > { %v1828_v44 = vsub.f32 %v3671_v47, %v1788_v4  ;;  %v1829_v26 = vsub.f32 %v3673_v9, %v1788_v4 }
 0x83c   : > { %v2830_v32 = vpop.eup %2829  ;;  %v1872_v57 = vmul.f32 1.442695, %v1828_v44  ;;  %v1874_v45 = vmul.f32 1.442695, %v1829_v26 }
 0x83d   : > { %v2832_v27 = vpop.eup %2831  ;;  %v1964_v46 = vpack.c.bf16 %v2830_v32, %v2826_v0 }
 0x83e   : > { %2833 = vpow2.f32 %v1872_v57  ;;  %v1965_v42 = vpack.c.bf16 %v2832_v27, %v2828_v38  ;;  %v3755_v50 = vadd.f32 %v2832_v27, %v2830_v32 }
 0x83f   : > { %2835 = vpow2.f32 %v1874_v45  ;;  %2042 = vmatmul.bf16.gmra.mxu3 %v1964_v46 }
 0x840   : > { %2091 = vmatmul.bf16.gmra.mxu0 %v1965_v42 }
 0x841   : > { %v1791_v12 = vpop.xlane.xlu2 %1790 }
 0x842   : > { %v1830_v52 = vsub.f32 %v3677_v10, %v1791_v12  ;;  %v1831_v40 = vsub.f32 %v3679_v60, %v1791_v12 }
 0x844   : > { %v2834_v47 = vpop.eup %2833  ;;  %v1876_v54 = vmul.f32 1.442695, %v1830_v52  ;;  %v1878_v9 = vmul.f32 1.442695, %v1831_v40 }
 0x845   : > { %v2836_v20 = vpop.eup %2835 }
 0x846   : > { %2837 = vpow2.f32 %v1876_v54  ;;  %v3759_v21 = vadd.f32 %v2836_v20, %v2834_v47 }
 0x847   : > { %2839 = vpow2.f32 %v1878_v9 }
 0x849   : > { %v1794_v55 = vpop.xlane.xlu1 %1793 }
 0x84a   : > { %v1832_v30 = vsub.f32 %v3683_v49, %v1794_v55  ;;  %v1833_v36 = vsub.f32 %v3685_v59, %v1794_v55 }
 0x84c   : > { %v2838_v6 = vpop.eup %2837  ;;  %v1880_v35 = vmul.f32 1.442695, %v1832_v30  ;;  %v1882_v7 = vmul.f32 1.442695, %v1833_v36 }
 0x84d   : > { %v2840_v56 = vpop.eup %2839  ;;  %v1966_v10 = vpack.c.bf16 %v2838_v6, %v2834_v47 }
 0x84e   : > { %2841 = vpow2.f32 %v1880_v35  ;;  %v1967_v60 = vpack.c.bf16 %v2840_v56, %v2836_v20  ;;  %v3763_v58 = vadd.f32 %v2840_v56, %v2838_v6 }
 0x84f   : > { %2843 = vpow2.f32 %v1882_v7  ;;  %2047 = vmatmul.bf16.gmra.mxu3 %v1966_v10 }
 0x850   : > { %2096 = vmatmul.bf16.gmra.mxu0 %v1967_v60 }
 0x851   : > { %v1797_v62 = vpop.xlane.xlu2 %1796 }
 0x852   : > { %v1834_v41 = vsub.f32 %v3689_v16, %v1797_v62  ;;  %v1835_v3 = vsub.f32 %v3691_v5, %v1797_v62 }
 0x854   : > { %v2842_v49 = vpop.eup %2841  ;;  %v1884_v2 = vmul.f32 1.442695, %v1834_v41  ;;  %v1886_v59 = vmul.f32 1.442695, %v1835_v3 }
 0x855   : > { %v2844_v17 = vpop.eup %2843 }
 0x856   : > { %2845 = vpow2.f32 %v1884_v2  ;;  %v3767_v23 = vadd.f32 %v2844_v17, %v2842_v49 }
 0x857   : > { %2847 = vpow2.f32 %v1886_v59 }
 0x859   : > { %v1800_v43 = vpop.xlane.xlu1 %1799 }
 0x85a   : > { %v1836_v61 = vsub.f32 %v3695_v28, %v1800_v43  ;;  %v1837_v14 = vsub.f32 %v3697_v51, %v1800_v43 }
 0x85c   : > { %v2846_v48 = vpop.eup %2845  ;;  %v1888_v5 = vmul.f32 1.442695, %v1836_v61  ;;  %v1890_v25 = vmul.f32 1.442695, %v1837_v14 }
 0x85d   : > { %v2848_v13 = vpop.eup %2847  ;;  %v1968_v0 = vpack.c.bf16 %v2846_v48, %v2842_v49 }
 0x85e   : > { %v1969_v1 = vpack.c.bf16 %v2848_v13, %v2844_v17  ;;  %v3771_v16 = vadd.f32 %v2848_v13, %v2846_v48  ;;  %2849 = vpow2.f32 %v1888_v5 }
 0x85f   : > { %2052 = vmatmul.bf16.gmra.mxu3 %v1968_v0  ;;  %2851 = vpow2.f32 %v1890_v25 }
 0x860   : > { %2101 = vmatmul.bf16.gmra.mxu0 %v1969_v1 }
 0x861   : > { %v1803_v38 = vpop.xlane.xlu2 %1802 }
 0x862   : > { %v1838_v4 = vsub.f32 %v3701_v53, %v1803_v38  ;;  %v1839_v44 = vsub.f32 %v3703_v31, %v1803_v38 }
 0x864   : > { %v1892_v26 = vmul.f32 1.442695, %v1838_v4  ;;  %v1894_v32 = vmul.f32 1.442695, %v1839_v44  ;;  %v2850_v51 = vpop.eup %2849 }
 0x865   : > { %v2852_v57 = vpop.eup %2851 }
 0x866   : > { %2853 = vpow2.f32 %v1892_v26 }
 0x867   : > { %2855 = vpow2.f32 %v1894_v32 }
 0x869   : > { %v1806_v28 = vpop.xlane.xlu1 %1805 }
 0x86a   : > { %v1840_v27 = vsub.f32 %v3707_v8, %v1806_v28  ;;  %v1841_v42 = vsub.f32 %v3709_v18, %v1806_v28 }
 0x86c   : > { %v2854_v45 = vpop.eup %2853  ;;  %v1896_v53 = vmul.f32 1.442695, %v1840_v27  ;;  %v1898_v31 = vmul.f32 1.442695, %v1841_v42 }
 0x86d   : > { %v2856_v46 = vpop.eup %2855  ;;  %v1970_v12 = vpack.c.bf16 %v2854_v45, %v2850_v51 }
 0x86e   : > { %v1971_v52 = vpack.c.bf16 %v2856_v46, %v2852_v57  ;;  %2857 = vpow2.f32 %v1896_v53  ;;  %v1945_v1 = vadd.f32 %v2856_v46, %v2854_v45 }
 0x86f   : > { %2057 = vmatmul.bf16.gmra.mxu3 %v1970_v12  ;;  %2859 = vpow2.f32 %v1898_v31 }
 0x870   : > { %2106 = vmatmul.bf16.gmra.mxu0 %v1971_v52 }
 0x871   : > { %v1809_v40 = vpop.xlane.xlu2 %1808 }
 0x872   : > { %v1842_v47 = vsub.f32 %v3713_v19, %v1809_v40  ;;  %v1843_v54 = vsub.f32 %v3715_v11, %v1809_v40 }
 0x874   : > { %v1900_v9 = vmul.f32 1.442695, %v1842_v47  ;;  %v1902_v20 = vmul.f32 1.442695, %v1843_v54  ;;  %v2858_v55 = vpop.eup %2857 }
 0x875   : > { %v2860_v36 = vpop.eup %2859 }
 0x876   : > { %2861 = vpow2.f32 %v1900_v9  ;;  %v1948_v43 = vadd.f32 %v2860_v36, %v2858_v55 }
 0x877   : > { %2863 = vpow2.f32 %v1902_v20 }
 0x879   : > { %v1812_v8 = vpop.xlane.xlu0 %1811 }
 0x87a   : > { %v1844_v18 = vsub.f32 %v3719_v63, %v1812_v8  ;;  %v1845_v30 = vsub.f32 %v3721_v34, %v1812_v8 }
 0x87c   : > { %v2862_v6 = vpop.eup %2861  ;;  %v1904_v35 = vmul.f32 1.442695, %v1844_v18  ;;  %v1906_v7 = vmul.f32 1.442695, %v1845_v30 }
 0x87d   : > { %v2864_v56 = vpop.eup %2863  ;;  %v1972_v19 = vpack.c.bf16 %v2862_v6, %v2858_v55 }
 0x87e   : > { %2865 = vpow2.f32 %v1904_v35  ;;  %v1973_v11 = vpack.c.bf16 %v2864_v56, %v2860_v36  ;;  %v1951_v13 = vadd.f32 %v2864_v56, %v2862_v6 }
 0x87f   : > { %2867 = vpow2.f32 %v1906_v7  ;;  %2062 = vmatmul.bf16.gmra.mxu3 %v1972_v19 }
 0x880   : > { %2111 = vmatmul.bf16.gmra.mxu0 %v1973_v11 }
 0x881   : > { %v1815_v10 = vpop.xlane.xlu1 %1814 }
 0x882   : > { %v1846_v60 = vsub.f32 %v3727_v22, %v1815_v10  ;;  %v1847_v62 = vsub.f32 %v3729_v24, %v1815_v10  ;;  %v1942_v22 = vadd.f32 %v2852_v57, %v2850_v51 }
 0x884   : > { %v2866_v41 = vpop.eup %2865  ;;  %v1908_v63 = vmul.f32 1.442695, %v1846_v60  ;;  %v1910_v3 = vmul.f32 1.442695, %v1847_v62 }
 0x885   : > { %v2868_v34 = vpop.eup %2867 }
 0x886   : > { %2869 = vpow2.f32 %v1908_v63  ;;  %v1954_v49 = vadd.f32 %v2868_v34, %v2866_v41 }
 0x887   : > { %2871 = vpow2.f32 %v1910_v3 }
 0x888   : > { %1955 = vadd.xlane.f32.xlu2 %v1954_v49 }
 0x88c   : > { %v2870_v2 = vpop.eup %2869 }
 0x88d   : > { %v2872_v59 = vpop.eup %2871  ;;  %v1974_v17 = vpack.c.bf16 %v2870_v2, %v2866_v41 }
 0x88e   : > { %v1975_v48 = vpack.c.bf16 %v2872_v59, %v2868_v34  ;;  %v1957_v61 = vadd.f32 %v2872_v59, %v2870_v2 }
 0x88f   : > { %2067 = vmatmul.bf16.gmra.mxu3 %v1974_v17 }
 0x890   : > { %1949 = vadd.xlane.f32.xlu2 %v1948_v43  ;;  %2116 = vmatmul.bf16.gmra.mxu0 %v1975_v48 }
 0x891   : > { %1958 = vadd.xlane.f32.xlu1 %v1957_v61 }
 0x897   : > { %v2082_v24 = vpop.f32.mrf.mxu0 }
 0x898   : > { %1943 = vadd.xlane.f32.xlu2 %v1942_v22 }
 0x899   : > { %1952 = vadd.xlane.f32.xlu1 %v1951_v13 }
 0x89c   : > { %v2033_v14 = vpop.f32.mrf.mxu3 }
 0x89d   : > { %v3783_v0 = vadd.f32 %v2082_v24, %v2033_v14 }
 0x89f   : > { %v2084_v5 = vpop.f32.mrf.mxu0 }
 0x8a0   : > { %1937 = vadd.xlane.f32.xlu2 %v3767_v23 }
 0x8a1   : > { %1946 = vadd.xlane.f32.xlu1 %v1945_v1 }
 0x8a4   : > { %v2035_v25 = vpop.f32.mrf.mxu3 }
 0x8a5   : > { %v3786_v38 = vadd.f32 %v2084_v5, %v2035_v25 }
 0x8a7   : > { %v2087_v4 = vpop.f32.mrf.mxu0 }
 0x8a8   : > { %1931 = vadd.xlane.f32.xlu2 %v3759_v21 }
 0x8a9   : > { %1940 = vadd.xlane.f32.xlu1 %v3771_v16 }
 0x8ac   : > { %v2038_v44 = vpop.f32.mrf.mxu3 }
 0x8ad   : > { %v3790_v26 = vadd.f32 %v2087_v4, %v2038_v44 }
 0x8af   : > { %v2089_v32 = vpop.f32.mrf.mxu0 }
 0x8b0   : > { %1925 = vadd.xlane.f32.xlu2 %v3751_v39 }
 0x8b1   : > { %1934 = vadd.xlane.f32.xlu1 %v3763_v58 }
 0x8b4   : > { %v2040_v28 = vpop.f32.mrf.mxu3 }
 0x8b5   : > { %v3794_v51 = vadd.f32 %v2089_v32, %v2040_v28 }
 0x8b8   : > { %1919 = vadd.xlane.f32.xlu2 %v3743_v37 }
 0x8b9   : > { %1928 = vadd.xlane.f32.xlu1 %v3755_v50 }
 0x8bd   : > { %v2092_v23 = vpop.f32.mrf.mxu0 }
 0x8c0   : > { %1913 = vadd.xlane.f32.xlu2 %v3735_v33 }
 0x8c1   : > { %1922 = vadd.xlane.f32.xlu1 %v3745_v15 }
 0x8c2   : > { %v2043_v21 = vpop.f32.mrf.mxu3 }
 0x8c3   : > { %v3800_v16 = vadd.f32 %v2092_v23, %v2043_v21 }
 0x8c5   : > { %v2094_v57 = vpop.f32.mrf.mxu0 }
 0x8c9   : > { %1916 = vadd.xlane.f32.xlu1 %v3739_v29 }
 0x8ca   : > { %v2045_v39 = vpop.f32.mrf.mxu3 }
 0x8cb   : > { %v3803_v58 = vadd.f32 %v2094_v57, %v2045_v39 }
 0x8cd   : > { %v2097_v45 = vpop.f32.mrf.mxu0 }
 0x8d2   : > { %v2048_v27 = vpop.f32.mrf.mxu3 }
 0x8d3   : > { %v3805_v46 = vadd.f32 %v2097_v45, %v2048_v27 }
 0x8d5   : > { %v2099_v37 = vpop.f32.mrf.mxu0 }
 0x8da   : > { %v2050_v50 = vpop.f32.mrf.mxu3 }
 0x8db   : > { %v3807_v42 = vadd.f32 %v2099_v37, %v2050_v50 }
 0x8dd   : > { %v2102_v33 = vpop.f32.mrf.mxu0 }
 0x8e2   : > { %v2053_v12 = vpop.f32.mrf.mxu3 }
 0x8e3   : > { %v2103_v15 = vadd.f32 %v2102_v33, %v2053_v12 }
 0x8e5   : > { %v2104_v52 = vpop.f32.mrf.mxu0 }
 0x8ea   : > { %v2055_v53 = vpop.f32.mrf.mxu3 }
 0x8eb   : > { %v2105_v31 = vadd.f32 %v2104_v52, %v2055_v53 }
 0x8ed   : > { %v2107_v40 = vpop.f32.mrf.mxu0 }
 0x8f2   : > { %v2058_v47 = vpop.f32.mrf.mxu3 }
 0x8f3   : > { %v2108_v27 = vadd.f32 %v2107_v40, %v2058_v47 }
 0x8f5   : > { %v2109_v29 = vpop.f32.mrf.mxu0 }
 0x8fa   : > { %v2060_v54 = vpop.f32.mrf.mxu3 }
 0x8fb   : > { %v1956_v9 = vpop.xlane.xlu2 %1955  ;;  %v2110_v57 = vadd.f32 %v2109_v29, %v2060_v54 }
 0x8fc   : > { %2873 = vrcp.f32 %v1956_v9 }
 0x8fd   : > { %v2112_v20 = vpop.f32.mrf.mxu0 }
 0x902   : > { %v2063_v8 = vpop.f32.mrf.mxu3  ;;  %v2874_v41 = vpop.eup %2873 }
 0x903   : > { %v1950_v55 = vpop.xlane.xlu2 %1949  ;;  %v2113_v24 = vadd.f32 %v2112_v20, %v2063_v8 }
 0x904   : > { %v1959_v18 = vpop.xlane.xlu1 %1958 }
 0x905   : > { %v2114_v30 = vpop.f32.mrf.mxu0  ;;  %2875 = vrcp.f32 %v1959_v18 }
 0x90a   : > { %v2065_v36 = vpop.f32.mrf.mxu3 }
 0x90b   : > { %v1944_v6 = vpop.xlane.xlu2 %1943  ;;  %v2876_v34 = vpop.eup %2875  ;;  %v2115_v43 = vadd.f32 %v2114_v30, %v2065_v36 }
 0x90c   : > { %v1953_v35 = vpop.xlane.xlu1 %1952 }
 0x90d   : > { %v2117_v7 = vpop.f32.mrf.mxu0  ;;  %2877 = vrcp.f32 %v1953_v35 }
 0x90e   : > { %2879 = vrcp.f32 %v1950_v55 }
 0x912   : > { %v2068_v56 = vpop.f32.mrf.mxu3 }
 0x913   : > { %v1938_v19 = vpop.xlane.xlu2 %1937  ;;  %v2118_v10 = vadd.f32 %v2117_v7, %v2068_v56  ;;  %v2878_v17 = vpop.eup %2877 }
 0x914   : > { %v1947_v11 = vpop.xlane.xlu1 %1946  ;;  %2881 = vrcp.f32 %v1938_v19  ;;  %v2880_v61 = vpop.eup %2879  ;;  %v2151_v14 = vmul.f32 %v2878_v17, %v2115_v43  ;;  %v2176_v17 = vld [vmem:[%s3943_s12 + $0x30] sm:$0xff]  ;;  %v2177_v43 = vld [vmem:[%s3943_s12 + $0x38] sm:$0xff] }
 0x915   : > { %v2119_v60 = vpop.f32.mrf.mxu0  ;;  %v2152_v2 = vmul.f32 %v2874_v41, %v2118_v10  ;;  %v2150_v5 = vmul.f32 %v2880_v61, %v2113_v24  ;;  %v2690_v61 = vld [vmem:[%s3939_s8 + $0x18] sm:$0xff] }
 0x917   : > { %v2168_v28 = vpack.c.bf16 %v2151_v14, %v2150_v5  ;;  %v2307_v14 = vld [vmem:[%s3867_s30 + $0x20] sm:$0xff] }
 0x918   : > { %v2305_v5 = vld [vmem:[%s3867_s30] sm:$0xff] }
 0x919   : > { %v2269_v37 = vsel %vm1516_vm0, %v2168_v28, 0 }
 0x91a   : > { %v2070_v62 = vpop.f32.mrf.mxu3  ;;  %v2882_v22 = vpop.eup %2881 }
 0x91b   : > { %v1932_v63 = vpop.xlane.xlu2 %1931  ;;  %v2120_v3 = vadd.f32 %v2119_v60, %v2070_v62  ;;  %v2146_v44 = vmul.f32 %v2882_v22, %v2103_v15 }
 0x91c   : > { %v1941_v49 = vpop.xlane.xlu1 %1940 }
 0x91d   : > { %v2153_v59 = vmul.f32 %v2876_v34, %v2120_v3  ;;  %2883 = vrcp.f32 %v1941_v49  ;;  %v2688_v3 = vld [vmem:[%s3939_s8 + $0x8] sm:$0xff]  ;;  %v2687_v34 = vld [vmem:[%s3939_s8] sm:$0xff]  ;;  %v2173_v49 = vld [vmem:[%s3943_s12 + $0x18] sm:$0xff] }
 0x91e   : > { %2885 = vrcp.f32 %v1947_v11 }
 0x91f   : > { %v2169_v48 = vpack.c.bf16 %v2153_v59, %v2152_v2  ;;  %2887 = vrcp.f32 %v1944_v6  ;;  %v2174_v2 = vld [vmem:[%s3943_s12 + $0x20] sm:$0xff]  ;;  %v2175_v59 = vld [vmem:[%s3943_s12 + $0x28] sm:$0xff] }
 0x920   : > { %2889 = vrcp.f32 %v1932_v63 }
 0x921   : > { %v2272_v13 = vsel %vm1516_vm0, %v2169_v48, 0  ;;  %v2689_v48 = vld [vmem:[%s3939_s8 + $0x10] sm:$0xff] }
 0x922   : > { %2274 = vmatpush.bf16.xpose.msra.mxu0 %v2272_v13  ;;  %2699 = vmatpush.bf16.xpose.msrb.mxu1 %v2272_v13 }
 0x923   : > { %v2884_v1 = vpop.eup %2883  ;;  %v1926_v25 = vpop.xlane.xlu2 %1925 }
 0x924   : > { %v1935_v4 = vpop.xlane.xlu1 %1934  ;;  %v2147_v32 = vmul.f32 %v2884_v1, %v2105_v31  ;;  %v2886_v23 = vpop.eup %2885 }
 0x925   : > { %2891 = vrcp.f32 %v1935_v4  ;;  %v2888_v39 = vpop.eup %2887  ;;  %v2149_v50 = vmul.f32 %v2886_v23, %v2110_v57  ;;  %v2308_v57 = vld [vmem:[%s3867_s30 + $0x30] sm:$0xff] }
 0x926   : > { %v2166_v21 = vpack.c.bf16 %v2147_v32, %v2146_v44  ;;  %v2890_v45 = vpop.eup %2889  ;;  %2893 = vrcp.f32 %v1926_v25  ;;  %v2148_v12 = vmul.f32 %v2888_v39, %v2108_v27 }
 0x927   : > { %v2144_v15 = vmul.f32 %v2890_v45, %v3805_v46  ;;  %v2306_v45 = vld [vmem:[%s3867_s30 + $0x10] sm:$0xff] }
 0x928   : > { %v2167_v31 = vpack.c.bf16 %v2149_v50, %v2148_v12  ;;  %v2263_v30 = vsel %vm1516_vm0, %v2166_v21, 0 }
 0x92a   : > { %2275 = vmatpush.bf16.xpose.msra.mxu0 %v2269_v37  ;;  %2700 = vmatpush.bf16.xpose.msrb.mxu1 %v2269_v37  ;;  %v2266_v40 = vsel %vm1516_vm0, %v2167_v31, 0 }
 0x92b   : > { %v2892_v33 = vpop.eup %2891  ;;  %v1920_v9 = vpop.xlane.xlu2 %1919 }
 0x92c   : > { %v1929_v52 = vpop.xlane.xlu1 %1928  ;;  %v2145_v53 = vmul.f32 %v2892_v33, %v3807_v42  ;;  %v2894_v54 = vpop.eup %2893 }
 0x92d   : > { %2895 = vrcp.f32 %v1929_v52  ;;  %v2142_v8 = vmul.f32 %v2894_v54, %v3800_v16 }
 0x92e   : > { %v2165_v29 = vpack.c.bf16 %v2145_v53, %v2144_v15  ;;  %2897 = vrcp.f32 %v1920_v9  ;;  %v2309_v15 = vld [vmem:[%s3867_s30 + $0x40] sm:$0xff] }
 0x932   : > { %2276 = vmatpush.bf16.xpose.msra.mxu0 %v2266_v40  ;;  %2701 = vmatpush.bf16.xpose.msrb.mxu1 %v2266_v40 }
 0x933   : > { %v2896_v47 = vpop.eup %2895  ;;  %v1914_v18 = vpop.xlane.xlu2 %1913 }
 0x934   : > { %v1923_v20 = vpop.xlane.xlu1 %1922  ;;  %v2143_v55 = vmul.f32 %v2896_v47, %v3803_v58  ;;  %v2898_v42 = vpop.eup %2897  ;;  %v2260_v58 = vsel %vm1516_vm0, %v2165_v29, 0  ;;  %v2310_v29 = vld [vmem:[%s3867_s30 + $0x50] sm:$0xff] }
 0x935   : > { %2899 = vrcp.f32 %v1923_v20  ;;  %v2140_v35 = vmul.f32 %v2898_v42, %v3790_v26  ;;  %v3003_v26 = vmov 0  }
 0x936   : > { %v2164_v46 = vpack.c.bf16 %v2143_v55, %v2142_v8  ;;  %2901 = vrcp.f32 %v1914_v18  ;;  %2805 = vset.pattern.permute.xlu2 %v3003_v26  ;;  %2806 = vset.pattern.permute.xlu1 %v3003_v26  ;;  %v2311_v8 = vld [vmem:[%s3867_s30 + $0x60] sm:$0xff] }
 0x937   : > { %2807 = vset.pattern.permute.xlu0 %v3003_v26 }
 0x938   : > { %v2257_v62 = vsel %vm1516_vm0, %v2164_v46, 0 }
 0x93a   : > { %2277 = vmatpush.bf16.xpose.msra.mxu0 %v2263_v30  ;;  %2702 = vmatpush.bf16.xpose.msrb.mxu1 %v2263_v30 }
 0x93b   : > { %v2900_v36 = vpop.eup %2899 }
 0x93c   : > { %v1917_v6 = vpop.xlane.xlu1 %1916  ;;  %v2141_v7 = vmul.f32 %v2900_v36, %v3794_v51  ;;  %v2902_v16 = vpop.eup %2901  ;;  %v2170_v51 = vld [vmem:[%s3943_s12] sm:$0xff]  ;;  %v2312_v36 = vld [vmem:[%s3867_s30 + $0x70] sm:$0xff] }
 0x93d   : > { %2903 = vrcp.f32 %v1917_v6  ;;  %v2138_v11 = vmul.f32 %v2902_v16, %v3783_v0  ;;  %2180 = vperm.xlu2 %2805, %v2170_v51   ;;  %v2172_v0 = vld [vmem:[%s3943_s12 + $0x10] sm:$0xff] }
 0x93e   : > { %v2163_v56 = vpack.c.bf16 %v2141_v7, %v2140_v35 }
 0x940   : > { %v2254_v41 = vsel %vm1516_vm0, %v2163_v56, 0 }
 0x942   : > { %2278 = vmatpush.bf16.xpose.msra.mxu0 %v2260_v58  ;;  %2703 = vmatpush.bf16.xpose.msrb.mxu1 %v2260_v58 }
 0x943   : > { %v2904_v19 = vpop.eup %2903 }
 0x944   : > { %v2139_v10 = vmul.f32 %v2904_v19, %v3786_v38  ;;  %v2171_v38 = vld [vmem:[%s3943_s12 + $0x8] sm:$0xff] }
 0x945   : > { %2190 = vperm.xlu2 %2805, %v2172_v0   ;;  %2185 = vperm.xlu1 %2806, %v2171_v38  }
 0x946   : > { %v2162_v60 = vpack.c.bf16 %v2139_v10, %v2138_v11 }
 0x948   : > { %v2251_v63 = vsel %vm1516_vm0, %v2162_v60, 0 }
 0x94a   : > { %2279 = vmatpush.bf16.xpose.msra.mxu0 %v2257_v62  ;;  %2704 = vmatpush.bf16.xpose.msrb.mxu1 %v2257_v62 }
 0x94d   : > { %2195 = vperm.xlu2 %2805, %v2173_v49   ;;  %2200 = vperm.xlu1 %2806, %v2174_v2  }
 0x952   : > { %2280 = vmatpush.bf16.xpose.msra.mxu0 %v2254_v41  ;;  %2705 = vmatpush.bf16.xpose.msrb.mxu1 %v2254_v41 }
 0x955   : > { %2205 = vperm.xlu2 %2805, %v2175_v59   ;;  %2210 = vperm.xlu1 %2806, %v2176_v17  }
 0x95a   : > { %2281 = vmatpush.bf16.xpose.msra.mxu0 %v2251_v63  ;;  %2706 = vmatpush.bf16.xpose.msrb.mxu1 %v2251_v63 }
 0x95d   : > { %2215 = vperm.xlu2 %2805, %v2177_v43  }
 0x961   : > { %2645 = vmatmul.msk.bf16.vlgmr.msrb.gmra.mxu1 %vm1516_vm0, %v2688_v3  ;;  %2644 = vmatmul.msk.bf16.vlgmr.msra.gmra.mxu0 %vm1516_vm0, %v2687_v34 }
 0x971   : > { %2646 = vmatmul.msk.bf16.gmra.mxu1 %vm1516_vm0, %v2689_v48 }
 0x981   : > { %2647 = vmatmul.msk.bf16.gmra.mxu1 %vm1516_vm0, %v2690_v61 }
 0x997   : > { %v2181_v22 = vpop.permute.xlu2 %2180 }
 0x99f   : > { %v2191_v24 = vpop.permute.xlu2 %2190 }
 0x9a7   : > { %v2196_v23 = vpop.permute.xlu2 %2195 }
 0x9af   : > { %v2206_v54 = vpop.permute.xlu2 %2205 }
 0x9b7   : > { %v2186_v28 = vpop.permute.xlu1 %2185  ;;  %v2216_v42 = vpop.permute.xlu2 %2215 }
 0x9bf   : > { %v2201_v12 = vpop.permute.xlu1 %2200 }
 0x9c7   : > { %v2211_v55 = vpop.permute.xlu1 %2210 }
 0x9de   : > { %v2288_v13 = vpop.f32.mrf.mxu1  ;;  %v2283_v1 = vpop.f32.mrf.mxu0 }
 0x9df   : > { %v2289_v25 = vadd.f32 %v2288_v13, %v2191_v24  ;;  %v2284_v4 = vadd.f32 %v2283_v1, %v2181_v22 }
 0x9e1   : > { %v2315_v44 = vadd.f32 %v2307_v14, %v2289_v25  ;;  %v2313_v32 = vadd.f32 %v2305_v5, %v2284_v4 }
 0x9e3   : > { %2323 = vst [vmem:[%s3158_s20 + $0x10] sm:$0xff] %v2315_v44 }
 0x9e4   : > { %2321 = vst [vmem:[%s3158_s20] sm:$0xff] %v2313_v32 }
 0x9e6   : > { %v2290_v21 = vpop.f32.mrf.mxu1  ;;  %v2285_v39 = vpop.f32.mrf.mxu0 }
 0x9e7   : > { %v2291_v27 = vadd.f32 %v2290_v21, %v2196_v23  ;;  %v2286_v37 = vadd.f32 %v2285_v39, %v2186_v28 }
 0x9e9   : > { %v2316_v50 = vadd.f32 %v2308_v57, %v2291_v27  ;;  %v2314_v33 = vadd.f32 %v2306_v45, %v2286_v37 }
 0x9eb   : > { %2324 = vst [vmem:[%s3158_s20 + $0x18] sm:$0xff] %v2316_v50 }
 0x9ec   : > { %2322 = vst [vmem:[%s3158_s20 + $0x8] sm:$0xff] %v2314_v33 }
 0x9ee   : > { %v2293_v52 = vpop.f32.mrf.mxu1 }
 0x9ef   : > { %v2294_v53 = vadd.f32 %v2293_v52, %v2201_v12 }
 0x9f1   : > { %v2317_v31 = vadd.f32 %v2309_v15, %v2294_v53 }
 0x9f3   : > { %2325 = vst [vmem:[%s3158_s20 + $0x20] sm:$0xff] %v2317_v31 }
 0x9f6   : > { %v2295_v9 = vpop.f32.mrf.mxu1 }
 0x9f7   : > { %v2296_v40 = vadd.f32 %v2295_v9, %v2206_v54 }
 0x9f9   : > { %v2318_v47 = vadd.f32 %v2310_v29, %v2296_v40 }
 0x9fb   : > { %2326 = vst [vmem:[%s3158_s20 + $0x28] sm:$0xff] %v2318_v47 }
 0x9fe   : > { %v2298_v20 = vpop.f32.mrf.mxu1 }
 0x9ff   : > { %v2299_v46 = vadd.f32 %v2298_v20, %v2211_v55 }
 0xa01   : > { %v2319_v18 = vadd.f32 %v2311_v8, %v2299_v46 }
 0xa03   : > { %2327 = vst [vmem:[%s3158_s20 + $0x30] sm:$0xff] %v2319_v18 }
 0xa06   : > { %v2300_v30 = vpop.f32.mrf.mxu1 }
 0xa07   : > { %v2301_v6 = vadd.f32 %v2300_v30, %v2216_v42 }
 0xa09   : > { %v2320_v35 = vadd.f32 %v2312_v36, %v2301_v6 }
 0xa0b   : > { %2328 = vst [vmem:[%s3158_s20 + $0x38] sm:$0xff] %v2320_v35 }
 0xa0c   : > { %2932 = shalt.err (!%p2929_p7)
}
 0xa0d   : > { %s3004_s20 = smov 128   ;;  %s3005_s17 = smov 256  }
 0xa0e   : > { %s3006_s28 = smov 8  }
 0xa0f   : > { %2707 = dma.vmem_to_hbm [thread:$0]  (%p3128_p3), %s2344_s24, 1024, %s2346_s16, %s2330_s29, %s3004_s20, %s3005_s17, %s3006_s28  }
 0xa10 PF: > { %s3974_s1 = sld [smem:[#allocation10_spill]] }
 0xa11   : > { %s3975_s2 = sld [smem:[#allocation8_spill]] }
 0xa16   : > { %p2713_p9 = scmp.ge.s32.totalorder %s3974_s1, 2 }
 0xa17   : > { %s2360_s25 = sand.u32 1, %s3975_s2  }
 0xa18   : > { %p2710_p10 = pnand %p2713_p9, %p3137_p8  ;;  %s2361_s0 = scalar_lea.sflag [#allocation6], %s2360_s25 }
 0xa1a   : > { %p2711_p11 = pneg %p2710_p10 }
 0xa1c   : > { %2966 = dma.done.wait (%p2711_p11), %s2361_s0, 1024  }
 0xa1d   : > { %2968 = vsyncadd (%p2711_p11), %s2361_s0, 4294966272  ;;  %s26_s15 = sadd.s32 1, %s3974_s1   ;;  %s3977_s28 = sld [smem:[#allocation9_spill]] }
 0xa1e   : > { %p23_p12 = scmp.ge.s32.totalorder %s26_s15, 6   ;;  %s3978_s30 = sld [smem:[#allocation11_spill]] }
 0xa1f   : > { %s3979_s23 = sld [smem:[#allocation13_spill]]  ;;  %s3980_s25 = smov %s2975_s26 }
 0xa20   : > { %s3981_s26 = smov %s2979_s27  ;;  %s3982_s27 = smov %s3146_s18 }
 0xa21   : > { %s3983_s29 = smov %s2995_s14  ;;  %25 = sbr.rel (!%p23_p12) target bundleno = 10 (0xa), region = 113 }
 0xa25   : > { %s3984_s14 = smov %s3979_s23 }
 0xa26   :  { %2367 = vsyncpa [#allocation6], 1 }
 0xa27   :  { %2369 = vsyncpa [#allocation6 + $0x1], 1 }

</bundles_post_ra>
